<compile_context>
chip_gen: v6e
topology: v6e:2x2x1
jax: 0.10.0
libtpu: 0.0.40
codegen_flags: <defaults>
</compile_context>

<pallas_src>
import functools

import jax
import jax.numpy as jnp
import numpy as np
from jax.experimental import pallas as pl
from jax.experimental.pallas import tpu as pltpu


# ---------------------------------------------------------------------------
# Generalised-kernel math, shared by the Pallas kernel body and the reference.
# ---------------------------------------------------------------------------
def _fpow(x, e):
    # torch.pow with an integer-valued float exponent handles negative bases;
    # use integer_pow in that case so TPU semantics match exactly.
    e = float(e)
    if e.is_integer():
        return jax.lax.integer_pow(x, int(e))
    return jnp.power(x, e)


def _kernel_math(spec, v1v2, v1sq, v2sq):
    """Apply one named similarity kernel.

    spec : string such as 'L', 'O2', 'P2', 'Y2,1,1', 'R0.5', 'H', 'W1,1'
    v1v2 : <htilde, key>   broadcastable to (..., L, S)
    v1sq : ||htilde||^2    broadcastable to (..., L, 1)
    v2sq : ||key||^2       broadcastable to (..., 1, S)
    """
    t, args = spec[0], spec[1:]
    if t == 'L':                                  # LinearKernel
        return v1v2
    if t == 'Y':                                  # polYnomialKernel
        p, alpha, c0 = (float(v) for v in (args or '2,1,1').split(','))
        return _fpow(alpha * v1v2 + c0, p)
    # NormSquared; clamp tiny negatives caused by bf16/f32 rounding so
    # fractional exponents stay NaN-free (ns >= 0 holds in exact arithmetic).
    ns = jnp.maximum(v1sq + v2sq - 2.0 * v1v2, 0.0)
    if t == 'O':                                  # lOgarithmicKernel
        p = float(args or '2')
        return -jnp.log(1.0 + _fpow(ns, p / 2.0))
    if t == 'P':                                  # PowerKernel
        p = float(args or '2')
        return -_fpow(ns, p / 2.0)
    if t == 'R':                                  # RbfKernel
        gamma = float(args or '0.5')
        return jnp.exp(-gamma * ns)
    if t == 'W':                                  # WaveletKernel
        a, b = (float(v) for v in (args or '1,1').split(','))
        return jnp.cos(ns / a) * jnp.exp(-ns / b)
    if t == 'H':                                  # HyperbolicKernel
        # TODO(synk): acos(1 + hyp) with hyp >= 0 is NaN by construction (same
        # in PyTorch) and lax.acos has no guaranteed Mosaic lowering, so 'H'
        # is implemented but not exercised in the demo style below.
        hyp = ns / (1.0 - v1sq - v2sq + v1sq * v2sq)
        return -jnp.arccos(1.0 + hyp)
    raise ValueError(f"unknown kernel spec {spec!r}")


# ---------------------------------------------------------------------------
# Pallas kernel: one (batch, head-block, L-tile) per grid point.
# ---------------------------------------------------------------------------
def _gsm_kernel(len_ref, *refs, kernel_specs, softmax_temp, causal, has_attn):
    # len_ref : (N,) int32 in SMEM (scalar prefetch)        -- key lengths
    # q_ref   : (1, hb, tL, E) bf16
    # k_ref   : (1, hb, S,  E) bf16
    # cm_ref  : (hb, E, K*E+K) bf16   fused [C_0|...|C_{K-1}|M] per head
    # attn_ref: (1, tL, S) bf16       (only when has_attn)
    # o_ref   : (1, hb, tL, S)
    if has_attn:
        q_ref, k_ref, cm_ref, attn_ref, o_ref = refs
    else:
        q_ref, k_ref, cm_ref, o_ref = refs
        attn_ref = None

    n = pl.program_id(0)
    li = pl.program_id(2)

    K = len(kernel_specs)
    hb, tL, E = q_ref.shape[1], q_ref.shape[2], q_ref.shape[3]
    S = k_ref.shape[2]
    KE = K * E

    # Additive mask (key-length + optional causal + optional explicit attn),
    # built ONCE per grid step and shared by all heads and all kernels.
    length = len_ref[n]
    col = jax.lax.broadcasted_iota(jnp.int32, (tL, S), 1)
    keep = col < length
    if causal:
        row = jax.lax.broadcasted_iota(jnp.int32, (tL, S), 0) + li * tL
        keep = jnp.logical_and(keep, col <= row)
    mask_add = jnp.where(keep, 0.0, -jnp.inf).astype(jnp.float32)
    if has_attn:
        mask_add = mask_add + attn_ref[0].astype(jnp.float32)

    ones_e = jnp.ones((1, E), jnp.bfloat16)
    dimnums = (((1,), (1,)), ((), ()))            # contract last dims, no batch

    for h in range(hb):                           # static unroll over heads
        q = q_ref[0, h]                           # (tL, E) bf16
        k = k_ref[0, h]                           # (S,  E) bf16

        # ||key_s||^2 as a (1, S) row via a tiny MXU contraction (avoids a
        # cross-lane transpose of the (S,) VPU reduction).
        k_sq = jax.lax.dot_general(ones_e, k * k, dimnums,
                                   preferred_element_type=jnp.float32)  # (1,S)

        # Fused weight matmul:  q @ [C_0 | ... | C_{K-1} | M]  -> (tL, K*E+K).
        full = jnp.dot(q, cm_ref[h], preferred_element_type=jnp.float32)
        ht_all = jnp.tanh(full[:, :KE])           # (tL, K*E) f32
        ht_bf = ht_all.astype(jnp.bfloat16)

        # pi = softmax_K(q @ M[h]) -- per-query mixture weights over kernels.
        pm = full[:, KE:]                         # (tL, K)
        pm = pm - jnp.max(pm, axis=-1, keepdims=True)
        pe = jnp.exp(pm)
        pi = pe * pl.reciprocal(jnp.sum(pe, axis=-1, keepdims=True),
                                approx=True)

        acc = jnp.zeros((tL, S), jnp.float32)
        for c, spec in enumerate(kernel_specs):   # static unroll over kernels
            ht = ht_bf[:, c * E:(c + 1) * E]      # (tL, E) bf16
            v1v2 = jax.lax.dot_general(ht, k, dimnums,
                                       preferred_element_type=jnp.float32)
            ht32 = ht_all[:, c * E:(c + 1) * E]
            ht_sq = jnp.sum(ht32 * ht32, axis=-1, keepdims=True)   # (tL, 1)

            qk = _kernel_math(spec, v1v2, ht_sq, k_sq)             # (tL, S)
            logits = qk + mask_add
            if softmax_temp != 1.0:
                logits = logits * softmax_temp
            logits = logits - jnp.max(logits, axis=-1, keepdims=True)
            e = jnp.exp(logits)
            sm = e * pl.reciprocal(jnp.sum(e, axis=-1, keepdims=True),
                                   approx=True)                    # softmax_S
            acc = acc + sm * pi[:, c:c + 1]       # 'nhlsk,nlhk->nhls'
        o_ref[0, h] = acc.astype(o_ref.dtype)


# ---------------------------------------------------------------------------
# Wrapper: parameter plumbing, tiling choices, pallas_call, pi statistic.
# ---------------------------------------------------------------------------
def _pick_vmem_limit(block_bytes):
    """Scoped-VMEM request: blocks are double-buffered; leave headroom for
    in-kernel temporaries, capped well below the device's physical VMEM."""
    want = 2 * int(block_bytes) + (24 << 20)
    cap = 100 << 20
    try:
        cap = min(cap, int(pltpu.get_tpu_info().vmem_capacity_bytes) * 3 // 4)
    except Exception:           # info query is best-effort
        pass
    return int(max(32 << 20, min(want, cap)))


def generalised_softmax(query, key, M, C, key_lengths, attn_additive=None, *,
                        kernel_args, softmax_temp=1.0, causal=False,
                        heads_per_block=None, l_tile=None,
                        out_dtype=jnp.float32):
    """GeneralisedSoftmax.forward.

    query        : (N, L, H, E)      key          : (N, S, H, E)
    M            : (H, E, K)         C            : (K, H, E, E)
    key_lengths  : (N,) int          valid key length per batch (LengthMask)
    attn_additive: optional (N, L, S) additive attention mask; None == all_ones
    causal       : build the triangular causal mask in-kernel

    Returns (attention_map (N, H, L, S), pi_statistic (K,)).
    """
    N, L, H, E = query.shape
    S = key.shape[1]
    K = len(kernel_args)

    if l_tile is None:
        l_tile = L if (L <= 256 or L % 128 != 0) else 128
    if L % l_tile != 0:
        l_tile = L
    if heads_per_block is None:
        # Fold all heads into one grid step for small (decode-like) tiles to
        # amortise per-step overhead; keep one head per step for big tiles so
        # the per-step VMEM footprint stays bounded (v7x: 64 MiB).
        heads_per_block = H if (H * l_tile * S * 4) <= (4 << 20) else 1
    if H % heads_per_block != 0:
        heads_per_block = 1
    hb = heads_per_block

    # bf16 MXU operands; f32 accumulation happens inside the kernel.
    q_t = jnp.transpose(query, (0, 2, 1, 3)).astype(jnp.bfloat16)   # (N,H,L,E)
    k_t = jnp.transpose(key, (0, 2, 1, 3)).astype(jnp.bfloat16)     # (N,H,S,E)
    # Fused weight operand CM[h] = [C[0,h] | ... | C[K-1,h] | M[h]].
    c_all = jnp.transpose(C, (1, 2, 0, 3)).reshape(H, E, K * E)
    cm = jnp.concatenate([c_all, M], axis=-1).astype(jnp.bfloat16)  # (H,E,KE+K)
    lengths = key_lengths.astype(jnp.int32)                         # (N,)

    has_attn = attn_additive is not None
    grid = (N, H // hb, L // l_tile)

    in_specs = [
        pl.BlockSpec((1, hb, l_tile, E), lambda n, hi, li, lens: (n, hi, li, 0)),
        pl.BlockSpec((1, hb, S, E), lambda n, hi, li, lens: (n, hi, 0, 0)),
        pl.BlockSpec((hb, E, K * E + K), lambda n, hi, li, lens: (hi, 0, 0)),
    ]
    operands = [q_t, k_t, cm]
    if has_attn:
        # 0 / -inf masks are exact in bf16; shipping bf16 halves the mask DMA.
        in_specs.append(pl.BlockSpec((1, l_tile, S),
                                     lambda n, hi, li, lens: (n, li, 0)))
        operands.append(attn_additive.astype(jnp.bfloat16))
    out_spec = pl.BlockSpec((1, hb, l_tile, S),
                            lambda n, hi, li, lens: (n, hi, li, 0))

    blk_bytes = 2 * (hb * l_tile * E + hb * S * E + hb * E * (K * E + K))
    if has_attn:
        blk_bytes += 2 * l_tile * S
    blk_bytes += hb * l_tile * S * jnp.dtype(out_dtype).itemsize

    kernel_fn = functools.partial(_gsm_kernel,
                                  kernel_specs=tuple(kernel_args),
                                  softmax_temp=float(softmax_temp),
                                  causal=bool(causal),
                                  has_attn=has_attn)

    out = pl.pallas_call(
        kernel_fn,
        out_shape=jax.ShapeDtypeStruct((N, H, L, S), out_dtype),
        grid_spec=pltpu.PrefetchScalarGridSpec(
            num_scalar_prefetch=1,
            grid=grid,
            in_specs=in_specs,
            out_specs=out_spec,
        ),
        compiler_params=pltpu.CompilerParams(
            dimension_semantics=("parallel", "parallel", "parallel"),
            vmem_limit_bytes=_pick_vmem_limit(blk_bytes)),
    )(lengths, *operands)

    # `self.pi` side statistic (cheap host-side glue, not the hot path).  The
    # torch module broadcasts key_lengths.float_matrix (N, S) against pi of
    # shape (N, L, H, K), i.e. it implicitly assumes L == S.
    keylen_float = (jnp.arange(S)[None, :] < lengths[:, None]).astype(jnp.float32)
    pi_full = jax.nn.softmax(
        jnp.einsum('nlhe,hek->nlhk', query.astype(jnp.float32), M,
                   precision='highest'), axis=-1)
    pi_stat = jnp.sum(pi_full * keylen_float[:, :, None, None], axis=(0, 1, 2))
    return out, pi_stat


# ---------------------------------------------------------------------------
# Pure-JAX reference (mirrors the PyTorch forward) for the correctness check.
# ---------------------------------------------------------------------------
def reference_forward(query, key, M, C, attn_additive, keylen_additive,
                      keylen_float, kernel_args, softmax_temp=1.0):
    outs = []
    for c, spec in enumerate(kernel_args):
        htilde = jnp.tanh(
            jnp.einsum('nlhe,hef->nlhf', query, C[c], precision='highest'))
        v1v2 = jnp.einsum('nlhe,nshe->nhls', htilde, key, precision='highest')
        v1sq = jnp.einsum('nlhe,nlhe->nhl', htilde, htilde,
                          precision='highest')[..., None]             # (N,H,L,1)
        v2sq = jnp.einsum('nshe,nshe->nhs', key, key,
                          precision='highest')[:, :, None, :]         # (N,H,1,S)
        qk = _kernel_math(spec, v1v2, v1sq, v2sq)
        qk = qk + attn_additive[:, None]                              # head dim
        qk = qk + keylen_additive[:, None, None]
        outs.append(jax.nn.softmax(softmax_temp * qk, axis=-1))
    pi = jax.nn.softmax(
        jnp.einsum('nlhe,hek->nlhk', query, M, precision='highest'), axis=-1)
    pi_stat = jnp.sum(pi * keylen_float[:, :, None, None], axis=(0, 1, 2))
    kernel_out = jnp.stack(outs, axis=-1)
    return (jnp.einsum('nhlsk,nlhk->nhls', kernel_out, pi, precision='highest'),
            pi_stat)


if __name__ == "__main__":
    # Default module style is 'L;O2;P2;Y2,1,1;R0.5;H;W1,1'; 'H' is NaN by
    # construction (see _kernel_math) so the demo style drops it.
    style = 'L;O2;P2;Y2,1,1;R0.5;W1,1'
    kernel_args = style.split(';')
    K = len(kernel_args)

    N, L, S, H, E = 2, 8, 8, 4, 32
    sm_temp = 1.0

    root = jax.random.PRNGKey(0)
    kq, kk, kM, kC = jax.random.split(root, 4)
    query = jax.random.normal(kq, (N, L, H, E), jnp.float32) * 0.5
    key = jax.random.normal(kk, (N, S, H, E), jnp.float32) * 0.5
    M = jax.random.uniform(kM, (H, E, K), jnp.float32)        # torch.rand-like
    C = jax.random.uniform(kC, (K, H, E, E), jnp.float32)

    lengths = jnp.array([S, S - 2], jnp.int32)                # LengthMask

    # Reference masks (what the torch module sees as additive matrices).
    causal_keep = jnp.tril(jnp.ones((L, S), jnp.float32))
    attn_additive = jnp.broadcast_to(
        jnp.where(causal_keep > 0, 0.0, -jnp.inf).astype(jnp.float32), (N, L, S))
    valid = jnp.arange(S)[None, :] < lengths[:, None]
    keylen_additive = jnp.where(valid, 0.0, -jnp.inf).astype(jnp.float32)
    keylen_float = valid.astype(jnp.float32)

    ref_out, ref_pi = reference_forward(query, key, M, C, attn_additive,
                                        keylen_additive, keylen_float,
                                        kernel_args, sm_temp)

    # Path 1: causal + length masks generated in-kernel (no (N,L,S) mask DMA).
    fwd_causal = jax.jit(functools.partial(generalised_softmax,
                                           kernel_args=kernel_args,
                                           softmax_temp=sm_temp, causal=True))
    out, pi_stat = fwd_causal(query, key, M, C, lengths)
    out = jax.block_until_ready(out)
    pi_stat = jax.block_until_ready(pi_stat)

    # bf16 MXU inputs + approx-reciprocal softmax vs the f32 'highest' ref.
    np.testing.assert_allclose(np.asarray(out), np.asarray(ref_out),
                               rtol=2e-2, atol=2e-2)
    np.testing.assert_allclose(np.asarray(pi_stat), np.asarray(ref_pi),
                               rtol=1e-3, atol=1e-4)

    # Path 2: explicit additive attention mask (general attn_mask case).
    fwd_mask = jax.jit(functools.partial(generalised_softmax,
                                         kernel_args=kernel_args,
                                         softmax_temp=sm_temp, causal=False))
    out2, _ = fwd_mask(query, key, M, C, lengths, attn_additive)
    out2 = jax.block_until_ready(out2)
    np.testing.assert_allclose(np.asarray(out2), np.asarray(ref_out),
                               rtol=2e-2, atol=2e-2)

    print("KERNEL_OK")
</pallas_src>

<mosaic_0001>
module attributes {stable_mosaic.version = 11 : i64} {
  func.func @_gsm_kernel(%arg0: i32, %arg1: i32, %arg2: i32, %arg3: memref<2xi32, #tpu.memory_space<smem>>, %arg4: memref<1x4x8x32xbf16, #tpu.memory_space<vmem>>, %arg5: memref<1x4x8x32xbf16, #tpu.memory_space<vmem>>, %arg6: memref<4x32x198xbf16, #tpu.memory_space<vmem>>, %arg7: memref<1x4x8x8xf32, #tpu.memory_space<vmem>>) attributes {dimension_semantics = [#tpu.dimension_semantics<parallel>, #tpu.dimension_semantics<parallel>, #tpu.dimension_semantics<parallel>], iteration_bounds = array<i64: 2, 1, 1>, scalar_prefetch = 1 : i64, scratch_operands = 0 : i64, tpu.core_type = #tpu.core_type<tc>, window_params = [{transform_indices = @transform_0, window_bounds = array<i64: 1, 4, 8, 32>}, {transform_indices = @transform_1, window_bounds = array<i64: 1, 4, 8, 32>}, {transform_indices = @transform_2, window_bounds = array<i64: 4, 32, 198>}, {transform_indices = @transform_3, window_bounds = array<i64: 1, 4, 8, 8>}]} {
    %0 = arith.index_cast %arg0 : i32 to index
    %1 = memref.load %arg3[%0] : memref<2xi32, #tpu.memory_space<smem>>
    %2 = tpu.iota {dimensions = array<i32: 1>} : vector<8x8xi32>
    %3 = vector.broadcast %1 : i32 to vector<8x8xi32>
    %4 = arith.cmpi slt, %2, %3 : vector<8x8xi32>
    %5 = tpu.iota {dimensions = array<i32: 0>} : vector<8x8xi32>
    %c8_i32 = arith.constant 8 : i32
    %6 = arith.muli %arg2, %c8_i32 : i32
    %7 = vector.broadcast %6 : i32 to vector<8x8xi32>
    %8 = arith.addi %5, %7 : vector<8x8xi32>
    %9 = arith.cmpi sle, %2, %8 : vector<8x8xi32>
    %10 = arith.andi %4, %9 : vector<8x8xi1>
    %cst = arith.constant 0.000000e+00 : f32
    %cst_0 = arith.constant 0xFF800000 : f32
    %11 = vector.broadcast %cst : f32 to vector<8x8xf32>
    %12 = vector.broadcast %cst_0 : f32 to vector<8x8xf32>
    %13 = arith.select %10, %11, %12 : vector<8x8xi1>, vector<8x8xf32>
    %cst_1 = arith.constant 1.000000e+00 : bf16
    %14 = vector.broadcast %cst_1 : bf16 to vector<1x32xbf16>
    %c0 = arith.constant 0 : index
    %c0_2 = arith.constant 0 : index
    %c0_3 = arith.constant 0 : index
    %c0_4 = arith.constant 0 : index
    %15 = vector.load %arg4[%c0, %c0_2, %c0_3, %c0_4] : memref<1x4x8x32xbf16, #tpu.memory_space<vmem>>, vector<1x1x8x32xbf16>
    %16 = vector.shape_cast %15 : vector<1x1x8x32xbf16> to vector<8x32xbf16>
    %c0_5 = arith.constant 0 : index
    %c0_6 = arith.constant 0 : index
    %c0_7 = arith.constant 0 : index
    %c0_8 = arith.constant 0 : index
    %17 = vector.load %arg5[%c0_5, %c0_6, %c0_7, %c0_8] : memref<1x4x8x32xbf16, #tpu.memory_space<vmem>>, vector<1x1x8x32xbf16>
    %18 = vector.shape_cast %17 : vector<1x1x8x32xbf16> to vector<8x32xbf16>
    %19 = arith.mulf %18, %18 : vector<8x32xbf16>
    %cst_9 = arith.constant dense<0.000000e+00> : vector<1x8xf32>
    %20 = tpu.matmul %14, %19, %cst_9 {dimension_numbers = #tpu.dot_dimension_numbers<[1], [1], [0], [0], [0, 0, 1, 0], [], []>} : vector<1x32xbf16>, vector<8x32xbf16>, vector<1x8xf32> -> vector<1x8xf32>
    %c0_10 = arith.constant 0 : index
    %c0_11 = arith.constant 0 : index
    %c0_12 = arith.constant 0 : index
    %21 = vector.load %arg6[%c0_10, %c0_11, %c0_12] : memref<4x32x198xbf16, #tpu.memory_space<vmem>>, vector<1x32x198xbf16>
    %22 = vector.shape_cast %21 : vector<1x32x198xbf16> to vector<32x198xbf16>
    %cst_13 = arith.constant dense<0.000000e+00> : vector<8x198xf32>
    %23 = tpu.matmul %16, %22, %cst_13 {dimension_numbers = #tpu.dot_dimension_numbers<[1], [0], [0], [1], [0, 0, 1, 1], [], []>} : vector<8x32xbf16>, vector<32x198xbf16>, vector<8x198xf32> -> vector<8x198xf32>
    %24 = vector.extract_strided_slice %23 {offsets = [0, 0], sizes = [8, 192], strides = [1, 1]} : vector<8x198xf32> to vector<8x192xf32>
    %25 = math.tanh %24 : vector<8x192xf32>
    %26 = arith.truncf %25 : vector<8x192xf32> to vector<8x192xbf16>
    %27 = vector.extract_strided_slice %23 {offsets = [0, 192], sizes = [8, 6], strides = [1, 1]} : vector<8x198xf32> to vector<8x6xf32>
    %cst_14 = arith.constant dense<0xFF800000> : vector<8xf32>
    %28 = vector.multi_reduction <maximumf>, %27, %cst_14 [1] : vector<8x6xf32> to vector<8xf32>
    %29 = vector.shape_cast %28 : vector<8xf32> to vector<8x1xf32>
    %30 = vector.broadcast %29 : vector<8x1xf32> to vector<8x6xf32>
    %31 = arith.subf %27, %30 : vector<8x6xf32>
    %32 = math.exp %31 : vector<8x6xf32>
    %cst_15 = arith.constant dense<0.000000e+00> : vector<8xf32>
    %33 = vector.multi_reduction <add>, %32, %cst_15 [1] : vector<8x6xf32> to vector<8xf32>
    %34 = vector.shape_cast %33 : vector<8xf32> to vector<8x1xf32>
    %35 = tpu.reciprocal %34 {approx = true} : vector<8x1xf32> -> vector<8x1xf32>
    %36 = vector.broadcast %35 : vector<8x1xf32> to vector<8x6xf32>
    %37 = arith.mulf %32, %36 : vector<8x6xf32>
    %cst_16 = arith.constant 0.000000e+00 : f32
    %38 = vector.broadcast %cst_16 : f32 to vector<8x8xf32>
    %39 = vector.extract_strided_slice %26 {offsets = [0, 0], sizes = [8, 32], strides = [1, 1]} : vector<8x192xbf16> to vector<8x32xbf16>
    %cst_17 = arith.constant dense<0.000000e+00> : vector<8x8xf32>
    %40 = tpu.matmul %39, %18, %cst_17 {dimension_numbers = #tpu.dot_dimension_numbers<[1], [1], [0], [0], [0, 0, 1, 0], [], []>} : vector<8x32xbf16>, vector<8x32xbf16>, vector<8x8xf32> -> vector<8x8xf32>
    %41 = arith.addf %40, %13 : vector<8x8xf32>
    %cst_18 = arith.constant dense<0xFF800000> : vector<8xf32>
    %42 = vector.multi_reduction <maximumf>, %41, %cst_18 [1] : vector<8x8xf32> to vector<8xf32>
    %43 = vector.shape_cast %42 : vector<8xf32> to vector<8x1xf32>
    %44 = vector.broadcast %43 : vector<8x1xf32> to vector<8x8xf32>
    %45 = arith.subf %41, %44 : vector<8x8xf32>
    %46 = math.exp %45 : vector<8x8xf32>
    %cst_19 = arith.constant dense<0.000000e+00> : vector<8xf32>
    %47 = vector.multi_reduction <add>, %46, %cst_19 [1] : vector<8x8xf32> to vector<8xf32>
    %48 = vector.shape_cast %47 : vector<8xf32> to vector<8x1xf32>
    %49 = tpu.reciprocal %48 {approx = true} : vector<8x1xf32> -> vector<8x1xf32>
    %50 = vector.broadcast %49 : vector<8x1xf32> to vector<8x8xf32>
    %51 = arith.mulf %46, %50 : vector<8x8xf32>
    %52 = vector.extract_strided_slice %37 {offsets = [0, 0], sizes = [8, 1], strides = [1, 1]} : vector<8x6xf32> to vector<8x1xf32>
    %53 = vector.broadcast %52 : vector<8x1xf32> to vector<8x8xf32>
    %54 = arith.mulf %51, %53 : vector<8x8xf32>
    %55 = arith.addf %38, %54 : vector<8x8xf32>
    %56 = vector.extract_strided_slice %26 {offsets = [0, 32], sizes = [8, 32], strides = [1, 1]} : vector<8x192xbf16> to vector<8x32xbf16>
    %cst_20 = arith.constant dense<0.000000e+00> : vector<8x8xf32>
    %57 = tpu.matmul %56, %18, %cst_20 {dimension_numbers = #tpu.dot_dimension_numbers<[1], [1], [0], [0], [0, 0, 1, 0], [], []>} : vector<8x32xbf16>, vector<8x32xbf16>, vector<8x8xf32> -> vector<8x8xf32>
    %58 = vector.extract_strided_slice %25 {offsets = [0, 32], sizes = [8, 32], strides = [1, 1]} : vector<8x192xf32> to vector<8x32xf32>
    %59 = arith.mulf %58, %58 : vector<8x32xf32>
    %cst_21 = arith.constant dense<0.000000e+00> : vector<8xf32>
    %60 = vector.multi_reduction <add>, %59, %cst_21 [1] : vector<8x32xf32> to vector<8xf32>
    %61 = vector.shape_cast %60 : vector<8xf32> to vector<8x1xf32>
    %62 = vector.broadcast %61 : vector<8x1xf32> to vector<8x8xf32>
    %63 = vector.broadcast %20 : vector<1x8xf32> to vector<8x8xf32>
    %64 = arith.addf %62, %63 : vector<8x8xf32>
    %cst_22 = arith.constant 2.000000e+00 : f32
    %65 = vector.broadcast %cst_22 : f32 to vector<8x8xf32>
    %66 = arith.mulf %65, %57 : vector<8x8xf32>
    %67 = arith.subf %64, %66 : vector<8x8xf32>
    %cst_23 = arith.constant 0.000000e+00 : f32
    %68 = vector.broadcast %cst_23 : f32 to vector<8x8xf32>
    %69 = arith.maximumf %67, %68 : vector<8x8xf32>
    %cst_24 = arith.constant 1.000000e+00 : f32
    %70 = vector.broadcast %cst_24 : f32 to vector<8x8xf32>
    %71 = arith.addf %70, %69 : vector<8x8xf32>
    %72 = math.log %71 : vector<8x8xf32>
    %cst_25 = arith.constant 0.000000e+00 : f32
    %73 = vector.broadcast %cst_25 : f32 to vector<8x8xf32>
    %74 = arith.subf %73, %72 : vector<8x8xf32>
    %75 = arith.addf %74, %13 : vector<8x8xf32>
    %cst_26 = arith.constant dense<0xFF800000> : vector<8xf32>
    %76 = vector.multi_reduction <maximumf>, %75, %cst_26 [1] : vector<8x8xf32> to vector<8xf32>
    %77 = vector.shape_cast %76 : vector<8xf32> to vector<8x1xf32>
    %78 = vector.broadcast %77 : vector<8x1xf32> to vector<8x8xf32>
    %79 = arith.subf %75, %78 : vector<8x8xf32>
    %80 = math.exp %79 : vector<8x8xf32>
    %cst_27 = arith.constant dense<0.000000e+00> : vector<8xf32>
    %81 = vector.multi_reduction <add>, %80, %cst_27 [1] : vector<8x8xf32> to vector<8xf32>
    %82 = vector.shape_cast %81 : vector<8xf32> to vector<8x1xf32>
    %83 = tpu.reciprocal %82 {approx = true} : vector<8x1xf32> -> vector<8x1xf32>
    %84 = vector.broadcast %83 : vector<8x1xf32> to vector<8x8xf32>
    %85 = arith.mulf %80, %84 : vector<8x8xf32>
    %86 = vector.extract_strided_slice %37 {offsets = [0, 1], sizes = [8, 1], strides = [1, 1]} : vector<8x6xf32> to vector<8x1xf32>
    %87 = vector.broadcast %86 : vector<8x1xf32> to vector<8x8xf32>
    %88 = arith.mulf %85, %87 : vector<8x8xf32>
    %89 = arith.addf %55, %88 : vector<8x8xf32>
    %90 = vector.extract_strided_slice %26 {offsets = [0, 64], sizes = [8, 32], strides = [1, 1]} : vector<8x192xbf16> to vector<8x32xbf16>
    %cst_28 = arith.constant dense<0.000000e+00> : vector<8x8xf32>
    %91 = tpu.matmul %90, %18, %cst_28 {dimension_numbers = #tpu.dot_dimension_numbers<[1], [1], [0], [0], [0, 0, 1, 0], [], []>} : vector<8x32xbf16>, vector<8x32xbf16>, vector<8x8xf32> -> vector<8x8xf32>
    %92 = vector.extract_strided_slice %25 {offsets = [0, 64], sizes = [8, 32], strides = [1, 1]} : vector<8x192xf32> to vector<8x32xf32>
    %93 = arith.mulf %92, %92 : vector<8x32xf32>
    %cst_29 = arith.constant dense<0.000000e+00> : vector<8xf32>
    %94 = vector.multi_reduction <add>, %93, %cst_29 [1] : vector<8x32xf32> to vector<8xf32>
    %95 = vector.shape_cast %94 : vector<8xf32> to vector<8x1xf32>
    %96 = vector.broadcast %95 : vector<8x1xf32> to vector<8x8xf32>
    %97 = vector.broadcast %20 : vector<1x8xf32> to vector<8x8xf32>
    %98 = arith.addf %96, %97 : vector<8x8xf32>
    %cst_30 = arith.constant 2.000000e+00 : f32
    %99 = vector.broadcast %cst_30 : f32 to vector<8x8xf32>
    %100 = arith.mulf %99, %91 : vector<8x8xf32>
    %101 = arith.subf %98, %100 : vector<8x8xf32>
    %cst_31 = arith.constant 0.000000e+00 : f32
    %102 = vector.broadcast %cst_31 : f32 to vector<8x8xf32>
    %103 = arith.maximumf %101, %102 : vector<8x8xf32>
    %cst_32 = arith.constant 0.000000e+00 : f32
    %104 = vector.broadcast %cst_32 : f32 to vector<8x8xf32>
    %105 = arith.subf %104, %103 : vector<8x8xf32>
    %106 = arith.addf %105, %13 : vector<8x8xf32>
    %cst_33 = arith.constant dense<0xFF800000> : vector<8xf32>
    %107 = vector.multi_reduction <maximumf>, %106, %cst_33 [1] : vector<8x8xf32> to vector<8xf32>
    %108 = vector.shape_cast %107 : vector<8xf32> to vector<8x1xf32>
    %109 = vector.broadcast %108 : vector<8x1xf32> to vector<8x8xf32>
    %110 = arith.subf %106, %109 : vector<8x8xf32>
    %111 = math.exp %110 : vector<8x8xf32>
    %cst_34 = arith.constant dense<0.000000e+00> : vector<8xf32>
    %112 = vector.multi_reduction <add>, %111, %cst_34 [1] : vector<8x8xf32> to vector<8xf32>
    %113 = vector.shape_cast %112 : vector<8xf32> to vector<8x1xf32>
    %114 = tpu.reciprocal %113 {approx = true} : vector<8x1xf32> -> vector<8x1xf32>
    %115 = vector.broadcast %114 : vector<8x1xf32> to vector<8x8xf32>
    %116 = arith.mulf %111, %115 : vector<8x8xf32>
    %117 = vector.extract_strided_slice %37 {offsets = [0, 2], sizes = [8, 1], strides = [1, 1]} : vector<8x6xf32> to vector<8x1xf32>
    %118 = vector.broadcast %117 : vector<8x1xf32> to vector<8x8xf32>
    %119 = arith.mulf %116, %118 : vector<8x8xf32>
    %120 = arith.addf %89, %119 : vector<8x8xf32>
    %121 = vector.extract_strided_slice %26 {offsets = [0, 96], sizes = [8, 32], strides = [1, 1]} : vector<8x192xbf16> to vector<8x32xbf16>
    %cst_35 = arith.constant dense<0.000000e+00> : vector<8x8xf32>
    %122 = tpu.matmul %121, %18, %cst_35 {dimension_numbers = #tpu.dot_dimension_numbers<[1], [1], [0], [0], [0, 0, 1, 0], [], []>} : vector<8x32xbf16>, vector<8x32xbf16>, vector<8x8xf32> -> vector<8x8xf32>
    %cst_36 = arith.constant 1.000000e+00 : f32
    %123 = vector.broadcast %cst_36 : f32 to vector<8x8xf32>
    %124 = arith.mulf %123, %122 : vector<8x8xf32>
    %cst_37 = arith.constant 1.000000e+00 : f32
    %125 = vector.broadcast %cst_37 : f32 to vector<8x8xf32>
    %126 = arith.addf %124, %125 : vector<8x8xf32>
    %127 = arith.mulf %126, %126 : vector<8x8xf32>
    %128 = arith.addf %127, %13 : vector<8x8xf32>
    %cst_38 = arith.constant dense<0xFF800000> : vector<8xf32>
    %129 = vector.multi_reduction <maximumf>, %128, %cst_38 [1] : vector<8x8xf32> to vector<8xf32>
    %130 = vector.shape_cast %129 : vector<8xf32> to vector<8x1xf32>
    %131 = vector.broadcast %130 : vector<8x1xf32> to vector<8x8xf32>
    %132 = arith.subf %128, %131 : vector<8x8xf32>
    %133 = math.exp %132 : vector<8x8xf32>
    %cst_39 = arith.constant dense<0.000000e+00> : vector<8xf32>
    %134 = vector.multi_reduction <add>, %133, %cst_39 [1] : vector<8x8xf32> to vector<8xf32>
    %135 = vector.shape_cast %134 : vector<8xf32> to vector<8x1xf32>
    %136 = tpu.reciprocal %135 {approx = true} : vector<8x1xf32> -> vector<8x1xf32>
    %137 = vector.broadcast %136 : vector<8x1xf32> to vector<8x8xf32>
    %138 = arith.mulf %133, %137 : vector<8x8xf32>
    %139 = vector.extract_strided_slice %37 {offsets = [0, 3], sizes = [8, 1], strides = [1, 1]} : vector<8x6xf32> to vector<8x1xf32>
    %140 = vector.broadcast %139 : vector<8x1xf32> to vector<8x8xf32>
    %141 = arith.mulf %138, %140 : vector<8x8xf32>
    %142 = arith.addf %120, %141 : vector<8x8xf32>
    %143 = vector.extract_strided_slice %26 {offsets = [0, 128], sizes = [8, 32], strides = [1, 1]} : vector<8x192xbf16> to vector<8x32xbf16>
    %cst_40 = arith.constant dense<0.000000e+00> : vector<8x8xf32>
    %144 = tpu.matmul %143, %18, %cst_40 {dimension_numbers = #tpu.dot_dimension_numbers<[1], [1], [0], [0], [0, 0, 1, 0], [], []>} : vector<8x32xbf16>, vector<8x32xbf16>, vector<8x8xf32> -> vector<8x8xf32>
    %145 = vector.extract_strided_slice %25 {offsets = [0, 128], sizes = [8, 32], strides = [1, 1]} : vector<8x192xf32> to vector<8x32xf32>
    %146 = arith.mulf %145, %145 : vector<8x32xf32>
    %cst_41 = arith.constant dense<0.000000e+00> : vector<8xf32>
    %147 = vector.multi_reduction <add>, %146, %cst_41 [1] : vector<8x32xf32> to vector<8xf32>
    %148 = vector.shape_cast %147 : vector<8xf32> to vector<8x1xf32>
    %149 = vector.broadcast %148 : vector<8x1xf32> to vector<8x8xf32>
    %150 = vector.broadcast %20 : vector<1x8xf32> to vector<8x8xf32>
    %151 = arith.addf %149, %150 : vector<8x8xf32>
    %cst_42 = arith.constant 2.000000e+00 : f32
    %152 = vector.broadcast %cst_42 : f32 to vector<8x8xf32>
    %153 = arith.mulf %152, %144 : vector<8x8xf32>
    %154 = arith.subf %151, %153 : vector<8x8xf32>
    %cst_43 = arith.constant 0.000000e+00 : f32
    %155 = vector.broadcast %cst_43 : f32 to vector<8x8xf32>
    %156 = arith.maximumf %154, %155 : vector<8x8xf32>
    %cst_44 = arith.constant -5.000000e-01 : f32
    %157 = vector.broadcast %cst_44 : f32 to vector<8x8xf32>
    %158 = arith.mulf %157, %156 : vector<8x8xf32>
    %159 = math.exp %158 : vector<8x8xf32>
    %160 = arith.addf %159, %13 : vector<8x8xf32>
    %cst_45 = arith.constant dense<0xFF800000> : vector<8xf32>
    %161 = vector.multi_reduction <maximumf>, %160, %cst_45 [1] : vector<8x8xf32> to vector<8xf32>
    %162 = vector.shape_cast %161 : vector<8xf32> to vector<8x1xf32>
    %163 = vector.broadcast %162 : vector<8x1xf32> to vector<8x8xf32>
    %164 = arith.subf %160, %163 : vector<8x8xf32>
    %165 = math.exp %164 : vector<8x8xf32>
    %cst_46 = arith.constant dense<0.000000e+00> : vector<8xf32>
    %166 = vector.multi_reduction <add>, %165, %cst_46 [1] : vector<8x8xf32> to vector<8xf32>
    %167 = vector.shape_cast %166 : vector<8xf32> to vector<8x1xf32>
    %168 = tpu.reciprocal %167 {approx = true} : vector<8x1xf32> -> vector<8x1xf32>
    %169 = vector.broadcast %168 : vector<8x1xf32> to vector<8x8xf32>
    %170 = arith.mulf %165, %169 : vector<8x8xf32>
    %171 = vector.extract_strided_slice %37 {offsets = [0, 4], sizes = [8, 1], strides = [1, 1]} : vector<8x6xf32> to vector<8x1xf32>
    %172 = vector.broadcast %171 : vector<8x1xf32> to vector<8x8xf32>
    %173 = arith.mulf %170, %172 : vector<8x8xf32>
    %174 = arith.addf %142, %173 : vector<8x8xf32>
    %175 = vector.extract_strided_slice %26 {offsets = [0, 160], sizes = [8, 32], strides = [1, 1]} : vector<8x192xbf16> to vector<8x32xbf16>
    %cst_47 = arith.constant dense<0.000000e+00> : vector<8x8xf32>
    %176 = tpu.matmul %175, %18, %cst_47 {dimension_numbers = #tpu.dot_dimension_numbers<[1], [1], [0], [0], [0, 0, 1, 0], [], []>} : vector<8x32xbf16>, vector<8x32xbf16>, vector<8x8xf32> -> vector<8x8xf32>
    %177 = vector.extract_strided_slice %25 {offsets = [0, 160], sizes = [8, 32], strides = [1, 1]} : vector<8x192xf32> to vector<8x32xf32>
    %178 = arith.mulf %177, %177 : vector<8x32xf32>
    %cst_48 = arith.constant dense<0.000000e+00> : vector<8xf32>
    %179 = vector.multi_reduction <add>, %178, %cst_48 [1] : vector<8x32xf32> to vector<8xf32>
    %180 = vector.shape_cast %179 : vector<8xf32> to vector<8x1xf32>
    %181 = vector.broadcast %180 : vector<8x1xf32> to vector<8x8xf32>
    %182 = vector.broadcast %20 : vector<1x8xf32> to vector<8x8xf32>
    %183 = arith.addf %181, %182 : vector<8x8xf32>
    %cst_49 = arith.constant 2.000000e+00 : f32
    %184 = vector.broadcast %cst_49 : f32 to vector<8x8xf32>
    %185 = arith.mulf %184, %176 : vector<8x8xf32>
    %186 = arith.subf %183, %185 : vector<8x8xf32>
    %cst_50 = arith.constant 0.000000e+00 : f32
    %187 = vector.broadcast %cst_50 : f32 to vector<8x8xf32>
    %188 = arith.maximumf %186, %187 : vector<8x8xf32>
    %cst_51 = arith.constant 1.000000e+00 : f32
    %189 = vector.broadcast %cst_51 : f32 to vector<8x8xf32>
    %190 = arith.divf %188, %189 : vector<8x8xf32>
    %191 = math.cos %190 : vector<8x8xf32>
    %cst_52 = arith.constant 0.000000e+00 : f32
    %192 = vector.broadcast %cst_52 : f32 to vector<8x8xf32>
    %193 = arith.subf %192, %188 : vector<8x8xf32>
    %cst_53 = arith.constant 1.000000e+00 : f32
    %194 = vector.broadcast %cst_53 : f32 to vector<8x8xf32>
    %195 = arith.divf %193, %194 : vector<8x8xf32>
    %196 = math.exp %195 : vector<8x8xf32>
    %197 = arith.mulf %191, %196 : vector<8x8xf32>
    %198 = arith.addf %197, %13 : vector<8x8xf32>
    %cst_54 = arith.constant dense<0xFF800000> : vector<8xf32>
    %199 = vector.multi_reduction <maximumf>, %198, %cst_54 [1] : vector<8x8xf32> to vector<8xf32>
    %200 = vector.shape_cast %199 : vector<8xf32> to vector<8x1xf32>
    %201 = vector.broadcast %200 : vector<8x1xf32> to vector<8x8xf32>
    %202 = arith.subf %198, %201 : vector<8x8xf32>
    %203 = math.exp %202 : vector<8x8xf32>
    %cst_55 = arith.constant dense<0.000000e+00> : vector<8xf32>
    %204 = vector.multi_reduction <add>, %203, %cst_55 [1] : vector<8x8xf32> to vector<8xf32>
    %205 = vector.shape_cast %204 : vector<8xf32> to vector<8x1xf32>
    %206 = tpu.reciprocal %205 {approx = true} : vector<8x1xf32> -> vector<8x1xf32>
    %207 = vector.broadcast %206 : vector<8x1xf32> to vector<8x8xf32>
    %208 = arith.mulf %203, %207 : vector<8x8xf32>
    %209 = vector.extract_strided_slice %37 {offsets = [0, 5], sizes = [8, 1], strides = [1, 1]} : vector<8x6xf32> to vector<8x1xf32>
    %210 = vector.broadcast %209 : vector<8x1xf32> to vector<8x8xf32>
    %211 = arith.mulf %208, %210 : vector<8x8xf32>
    %212 = arith.addf %174, %211 : vector<8x8xf32>
    %c0_56 = arith.constant 0 : index
    %c0_57 = arith.constant 0 : index
    %c0_58 = arith.constant 0 : index
    %c0_59 = arith.constant 0 : index
    %213 = vector.load %arg7[%c0_56, %c0_57, %c0_58, %c0_59] : memref<1x4x8x8xf32, #tpu.memory_space<vmem>>, vector<1x1x8x8xf32>
    %214 = vector.shape_cast %213 : vector<1x1x8x8xf32> to vector<8x8xf32>
    %215 = vector.shape_cast %212 : vector<8x8xf32> to vector<1x1x8x8xf32>
    tpu.vector_store %arg7[%c0_56, %c0_57, %c0_58, %c0_59], %215 {strides = array<i32>} : memref<1x4x8x8xf32, #tpu.memory_space<vmem>>, vector<1x1x8x8xf32>,
    %c0_60 = arith.constant 0 : index
    %c1 = arith.constant 1 : index
    %c0_61 = arith.constant 0 : index
    %c0_62 = arith.constant 0 : index
    %216 = vector.load %arg4[%c0_60, %c1, %c0_61, %c0_62] : memref<1x4x8x32xbf16, #tpu.memory_space<vmem>>, vector<1x1x8x32xbf16>
    %217 = vector.shape_cast %216 : vector<1x1x8x32xbf16> to vector<8x32xbf16>
    %c0_63 = arith.constant 0 : index
    %c1_64 = arith.constant 1 : index
    %c0_65 = arith.constant 0 : index
    %c0_66 = arith.constant 0 : index
    %218 = vector.load %arg5[%c0_63, %c1_64, %c0_65, %c0_66] : memref<1x4x8x32xbf16, #tpu.memory_space<vmem>>, vector<1x1x8x32xbf16>
    %219 = vector.shape_cast %218 : vector<1x1x8x32xbf16> to vector<8x32xbf16>
    %220 = arith.mulf %219, %219 : vector<8x32xbf16>
    %cst_67 = arith.constant dense<0.000000e+00> : vector<1x8xf32>
    %221 = tpu.matmul %14, %220, %cst_67 {dimension_numbers = #tpu.dot_dimension_numbers<[1], [1], [0], [0], [0, 0, 1, 0], [], []>} : vector<1x32xbf16>, vector<8x32xbf16>, vector<1x8xf32> -> vector<1x8xf32>
    %c1_68 = arith.constant 1 : index
    %c0_69 = arith.constant 0 : index
    %c0_70 = arith.constant 0 : index
    %222 = vector.load %arg6[%c1_68, %c0_69, %c0_70] : memref<4x32x198xbf16, #tpu.memory_space<vmem>>, vector<1x32x198xbf16>
    %223 = vector.shape_cast %222 : vector<1x32x198xbf16> to vector<32x198xbf16>
    %cst_71 = arith.constant dense<0.000000e+00> : vector<8x198xf32>
    %224 = tpu.matmul %217, %223, %cst_71 {dimension_numbers = #tpu.dot_dimension_numbers<[1], [0], [0], [1], [0, 0, 1, 1], [], []>} : vector<8x32xbf16>, vector<32x198xbf16>, vector<8x198xf32> -> vector<8x198xf32>
    %225 = vector.extract_strided_slice %224 {offsets = [0, 0], sizes = [8, 192], strides = [1, 1]} : vector<8x198xf32> to vector<8x192xf32>
    %226 = math.tanh %225 : vector<8x192xf32>
    %227 = arith.truncf %226 : vector<8x192xf32> to vector<8x192xbf16>
    %228 = vector.extract_strided_slice %224 {offsets = [0, 192], sizes = [8, 6], strides = [1, 1]} : vector<8x198xf32> to vector<8x6xf32>
    %cst_72 = arith.constant dense<0xFF800000> : vector<8xf32>
    %229 = vector.multi_reduction <maximumf>, %228, %cst_72 [1] : vector<8x6xf32> to vector<8xf32>
    %230 = vector.shape_cast %229 : vector<8xf32> to vector<8x1xf32>
    %231 = vector.broadcast %230 : vector<8x1xf32> to vector<8x6xf32>
    %232 = arith.subf %228, %231 : vector<8x6xf32>
    %233 = math.exp %232 : vector<8x6xf32>
    %cst_73 = arith.constant dense<0.000000e+00> : vector<8xf32>
    %234 = vector.multi_reduction <add>, %233, %cst_73 [1] : vector<8x6xf32> to vector<8xf32>
    %235 = vector.shape_cast %234 : vector<8xf32> to vector<8x1xf32>
    %236 = tpu.reciprocal %235 {approx = true} : vector<8x1xf32> -> vector<8x1xf32>
    %237 = vector.broadcast %236 : vector<8x1xf32> to vector<8x6xf32>
    %238 = arith.mulf %233, %237 : vector<8x6xf32>
    %cst_74 = arith.constant 0.000000e+00 : f32
    %239 = vector.broadcast %cst_74 : f32 to vector<8x8xf32>
    %240 = vector.extract_strided_slice %227 {offsets = [0, 0], sizes = [8, 32], strides = [1, 1]} : vector<8x192xbf16> to vector<8x32xbf16>
    %cst_75 = arith.constant dense<0.000000e+00> : vector<8x8xf32>
    %241 = tpu.matmul %240, %219, %cst_75 {dimension_numbers = #tpu.dot_dimension_numbers<[1], [1], [0], [0], [0, 0, 1, 0], [], []>} : vector<8x32xbf16>, vector<8x32xbf16>, vector<8x8xf32> -> vector<8x8xf32>
    %242 = arith.addf %241, %13 : vector<8x8xf32>
    %cst_76 = arith.constant dense<0xFF800000> : vector<8xf32>
    %243 = vector.multi_reduction <maximumf>, %242, %cst_76 [1] : vector<8x8xf32> to vector<8xf32>
    %244 = vector.shape_cast %243 : vector<8xf32> to vector<8x1xf32>
    %245 = vector.broadcast %244 : vector<8x1xf32> to vector<8x8xf32>
    %246 = arith.subf %242, %245 : vector<8x8xf32>
    %247 = math.exp %246 : vector<8x8xf32>
    %cst_77 = arith.constant dense<0.000000e+00> : vector<8xf32>
    %248 = vector.multi_reduction <add>, %247, %cst_77 [1] : vector<8x8xf32> to vector<8xf32>
    %249 = vector.shape_cast %248 : vector<8xf32> to vector<8x1xf32>
    %250 = tpu.reciprocal %249 {approx = true} : vector<8x1xf32> -> vector<8x1xf32>
    %251 = vector.broadcast %250 : vector<8x1xf32> to vector<8x8xf32>
    %252 = arith.mulf %247, %251 : vector<8x8xf32>
    %253 = vector.extract_strided_slice %238 {offsets = [0, 0], sizes = [8, 1], strides = [1, 1]} : vector<8x6xf32> to vector<8x1xf32>
    %254 = vector.broadcast %253 : vector<8x1xf32> to vector<8x8xf32>
    %255 = arith.mulf %252, %254 : vector<8x8xf32>
    %256 = arith.addf %239, %255 : vector<8x8xf32>
    %257 = vector.extract_strided_slice %227 {offsets = [0, 32], sizes = [8, 32], strides = [1, 1]} : vector<8x192xbf16> to vector<8x32xbf16>
    %cst_78 = arith.constant dense<0.000000e+00> : vector<8x8xf32>
    %258 = tpu.matmul %257, %219, %cst_78 {dimension_numbers = #tpu.dot_dimension_numbers<[1], [1], [0], [0], [0, 0, 1, 0], [], []>} : vector<8x32xbf16>, vector<8x32xbf16>, vector<8x8xf32> -> vector<8x8xf32>
    %259 = vector.extract_strided_slice %226 {offsets = [0, 32], sizes = [8, 32], strides = [1, 1]} : vector<8x192xf32> to vector<8x32xf32>
    %260 = arith.mulf %259, %259 : vector<8x32xf32>
    %cst_79 = arith.constant dense<0.000000e+00> : vector<8xf32>
    %261 = vector.multi_reduction <add>, %260, %cst_79 [1] : vector<8x32xf32> to vector<8xf32>
    %262 = vector.shape_cast %261 : vector<8xf32> to vector<8x1xf32>
    %263 = vector.broadcast %262 : vector<8x1xf32> to vector<8x8xf32>
    %264 = vector.broadcast %221 : vector<1x8xf32> to vector<8x8xf32>
    %265 = arith.addf %263, %264 : vector<8x8xf32>
    %cst_80 = arith.constant 2.000000e+00 : f32
    %266 = vector.broadcast %cst_80 : f32 to vector<8x8xf32>
    %267 = arith.mulf %266, %258 : vector<8x8xf32>
    %268 = arith.subf %265, %267 : vector<8x8xf32>
    %cst_81 = arith.constant 0.000000e+00 : f32
    %269 = vector.broadcast %cst_81 : f32 to vector<8x8xf32>
    %270 = arith.maximumf %268, %269 : vector<8x8xf32>
    %cst_82 = arith.constant 1.000000e+00 : f32
    %271 = vector.broadcast %cst_82 : f32 to vector<8x8xf32>
    %272 = arith.addf %271, %270 : vector<8x8xf32>
    %273 = math.log %272 : vector<8x8xf32>
    %cst_83 = arith.constant 0.000000e+00 : f32
    %274 = vector.broadcast %cst_83 : f32 to vector<8x8xf32>
    %275 = arith.subf %274, %273 : vector<8x8xf32>
    %276 = arith.addf %275, %13 : vector<8x8xf32>
    %cst_84 = arith.constant dense<0xFF800000> : vector<8xf32>
    %277 = vector.multi_reduction <maximumf>, %276, %cst_84 [1] : vector<8x8xf32> to vector<8xf32>
    %278 = vector.shape_cast %277 : vector<8xf32> to vector<8x1xf32>
    %279 = vector.broadcast %278 : vector<8x1xf32> to vector<8x8xf32>
    %280 = arith.subf %276, %279 : vector<8x8xf32>
    %281 = math.exp %280 : vector<8x8xf32>
    %cst_85 = arith.constant dense<0.000000e+00> : vector<8xf32>
    %282 = vector.multi_reduction <add>, %281, %cst_85 [1] : vector<8x8xf32> to vector<8xf32>
    %283 = vector.shape_cast %282 : vector<8xf32> to vector<8x1xf32>
    %284 = tpu.reciprocal %283 {approx = true} : vector<8x1xf32> -> vector<8x1xf32>
    %285 = vector.broadcast %284 : vector<8x1xf32> to vector<8x8xf32>
    %286 = arith.mulf %281, %285 : vector<8x8xf32>
    %287 = vector.extract_strided_slice %238 {offsets = [0, 1], sizes = [8, 1], strides = [1, 1]} : vector<8x6xf32> to vector<8x1xf32>
    %288 = vector.broadcast %287 : vector<8x1xf32> to vector<8x8xf32>
    %289 = arith.mulf %286, %288 : vector<8x8xf32>
    %290 = arith.addf %256, %289 : vector<8x8xf32>
    %291 = vector.extract_strided_slice %227 {offsets = [0, 64], sizes = [8, 32], strides = [1, 1]} : vector<8x192xbf16> to vector<8x32xbf16>
    %cst_86 = arith.constant dense<0.000000e+00> : vector<8x8xf32>
    %292 = tpu.matmul %291, %219, %cst_86 {dimension_numbers = #tpu.dot_dimension_numbers<[1], [1], [0], [0], [0, 0, 1, 0], [], []>} : vector<8x32xbf16>, vector<8x32xbf16>, vector<8x8xf32> -> vector<8x8xf32>
    %293 = vector.extract_strided_slice %226 {offsets = [0, 64], sizes = [8, 32], strides = [1, 1]} : vector<8x192xf32> to vector<8x32xf32>
    %294 = arith.mulf %293, %293 : vector<8x32xf32>
    %cst_87 = arith.constant dense<0.000000e+00> : vector<8xf32>
    %295 = vector.multi_reduction <add>, %294, %cst_87 [1] : vector<8x32xf32> to vector<8xf32>
    %296 = vector.shape_cast %295 : vector<8xf32> to vector<8x1xf32>
    %297 = vector.broadcast %296 : vector<8x1xf32> to vector<8x8xf32>
    %298 = vector.broadcast %221 : vector<1x8xf32> to vector<8x8xf32>
    %299 = arith.addf %297, %298 : vector<8x8xf32>
    %cst_88 = arith.constant 2.000000e+00 : f32
    %300 = vector.broadcast %cst_88 : f32 to vector<8x8xf32>
    %301 = arith.mulf %300, %292 : vector<8x8xf32>
    %302 = arith.subf %299, %301 : vector<8x8xf32>
    %cst_89 = arith.constant 0.000000e+00 : f32
    %303 = vector.broadcast %cst_89 : f32 to vector<8x8xf32>
    %304 = arith.maximumf %302, %303 : vector<8x8xf32>
    %cst_90 = arith.constant 0.000000e+00 : f32
    %305 = vector.broadcast %cst_90 : f32 to vector<8x8xf32>
    %306 = arith.subf %305, %304 : vector<8x8xf32>
    %307 = arith.addf %306, %13 : vector<8x8xf32>
    %cst_91 = arith.constant dense<0xFF800000> : vector<8xf32>
    %308 = vector.multi_reduction <maximumf>, %307, %cst_91 [1] : vector<8x8xf32> to vector<8xf32>
    %309 = vector.shape_cast %308 : vector<8xf32> to vector<8x1xf32>
    %310 = vector.broadcast %309 : vector<8x1xf32> to vector<8x8xf32>
    %311 = arith.subf %307, %310 : vector<8x8xf32>
    %312 = math.exp %311 : vector<8x8xf32>
    %cst_92 = arith.constant dense<0.000000e+00> : vector<8xf32>
    %313 = vector.multi_reduction <add>, %312, %cst_92 [1] : vector<8x8xf32> to vector<8xf32>
    %314 = vector.shape_cast %313 : vector<8xf32> to vector<8x1xf32>
    %315 = tpu.reciprocal %314 {approx = true} : vector<8x1xf32> -> vector<8x1xf32>
    %316 = vector.broadcast %315 : vector<8x1xf32> to vector<8x8xf32>
    %317 = arith.mulf %312, %316 : vector<8x8xf32>
    %318 = vector.extract_strided_slice %238 {offsets = [0, 2], sizes = [8, 1], strides = [1, 1]} : vector<8x6xf32> to vector<8x1xf32>
    %319 = vector.broadcast %318 : vector<8x1xf32> to vector<8x8xf32>
    %320 = arith.mulf %317, %319 : vector<8x8xf32>
    %321 = arith.addf %290, %320 : vector<8x8xf32>
    %322 = vector.extract_strided_slice %227 {offsets = [0, 96], sizes = [8, 32], strides = [1, 1]} : vector<8x192xbf16> to vector<8x32xbf16>
    %cst_93 = arith.constant dense<0.000000e+00> : vector<8x8xf32>
    %323 = tpu.matmul %322, %219, %cst_93 {dimension_numbers = #tpu.dot_dimension_numbers<[1], [1], [0], [0], [0, 0, 1, 0], [], []>} : vector<8x32xbf16>, vector<8x32xbf16>, vector<8x8xf32> -> vector<8x8xf32>
    %cst_94 = arith.constant 1.000000e+00 : f32
    %324 = vector.broadcast %cst_94 : f32 to vector<8x8xf32>
    %325 = arith.mulf %324, %323 : vector<8x8xf32>
    %cst_95 = arith.constant 1.000000e+00 : f32
    %326 = vector.broadcast %cst_95 : f32 to vector<8x8xf32>
    %327 = arith.addf %325, %326 : vector<8x8xf32>
    %328 = arith.mulf %327, %327 : vector<8x8xf32>
    %329 = arith.addf %328, %13 : vector<8x8xf32>
    %cst_96 = arith.constant dense<0xFF800000> : vector<8xf32>
    %330 = vector.multi_reduction <maximumf>, %329, %cst_96 [1] : vector<8x8xf32> to vector<8xf32>
    %331 = vector.shape_cast %330 : vector<8xf32> to vector<8x1xf32>
    %332 = vector.broadcast %331 : vector<8x1xf32> to vector<8x8xf32>
    %333 = arith.subf %329, %332 : vector<8x8xf32>
    %334 = math.exp %333 : vector<8x8xf32>
    %cst_97 = arith.constant dense<0.000000e+00> : vector<8xf32>
    %335 = vector.multi_reduction <add>, %334, %cst_97 [1] : vector<8x8xf32> to vector<8xf32>
    %336 = vector.shape_cast %335 : vector<8xf32> to vector<8x1xf32>
    %337 = tpu.reciprocal %336 {approx = true} : vector<8x1xf32> -> vector<8x1xf32>
    %338 = vector.broadcast %337 : vector<8x1xf32> to vector<8x8xf32>
    %339 = arith.mulf %334, %338 : vector<8x8xf32>
    %340 = vector.extract_strided_slice %238 {offsets = [0, 3], sizes = [8, 1], strides = [1, 1]} : vector<8x6xf32> to vector<8x1xf32>
    %341 = vector.broadcast %340 : vector<8x1xf32> to vector<8x8xf32>
    %342 = arith.mulf %339, %341 : vector<8x8xf32>
    %343 = arith.addf %321, %342 : vector<8x8xf32>
    %344 = vector.extract_strided_slice %227 {offsets = [0, 128], sizes = [8, 32], strides = [1, 1]} : vector<8x192xbf16> to vector<8x32xbf16>
    %cst_98 = arith.constant dense<0.000000e+00> : vector<8x8xf32>
    %345 = tpu.matmul %344, %219, %cst_98 {dimension_numbers = #tpu.dot_dimension_numbers<[1], [1], [0], [0], [0, 0, 1, 0], [], []>} : vector<8x32xbf16>, vector<8x32xbf16>, vector<8x8xf32> -> vector<8x8xf32>
    %346 = vector.extract_strided_slice %226 {offsets = [0, 128], sizes = [8, 32], strides = [1, 1]} : vector<8x192xf32> to vector<8x32xf32>
    %347 = arith.mulf %346, %346 : vector<8x32xf32>
    %cst_99 = arith.constant dense<0.000000e+00> : vector<8xf32>
    %348 = vector.multi_reduction <add>, %347, %cst_99 [1] : vector<8x32xf32> to vector<8xf32>
    %349 = vector.shape_cast %348 : vector<8xf32> to vector<8x1xf32>
    %350 = vector.broadcast %349 : vector<8x1xf32> to vector<8x8xf32>
    %351 = vector.broadcast %221 : vector<1x8xf32> to vector<8x8xf32>
    %352 = arith.addf %350, %351 : vector<8x8xf32>
    %cst_100 = arith.constant 2.000000e+00 : f32
    %353 = vector.broadcast %cst_100 : f32 to vector<8x8xf32>
    %354 = arith.mulf %353, %345 : vector<8x8xf32>
    %355 = arith.subf %352, %354 : vector<8x8xf32>
    %cst_101 = arith.constant 0.000000e+00 : f32
    %356 = vector.broadcast %cst_101 : f32 to vector<8x8xf32>
    %357 = arith.maximumf %355, %356 : vector<8x8xf32>
    %cst_102 = arith.constant -5.000000e-01 : f32
    %358 = vector.broadcast %cst_102 : f32 to vector<8x8xf32>
    %359 = arith.mulf %358, %357 : vector<8x8xf32>
    %360 = math.exp %359 : vector<8x8xf32>
    %361 = arith.addf %360, %13 : vector<8x8xf32>
    %cst_103 = arith.constant dense<0xFF800000> : vector<8xf32>
    %362 = vector.multi_reduction <maximumf>, %361, %cst_103 [1] : vector<8x8xf32> to vector<8xf32>
    %363 = vector.shape_cast %362 : vector<8xf32> to vector<8x1xf32>
    %364 = vector.broadcast %363 : vector<8x1xf32> to vector<8x8xf32>
    %365 = arith.subf %361, %364 : vector<8x8xf32>
    %366 = math.exp %365 : vector<8x8xf32>
    %cst_104 = arith.constant dense<0.000000e+00> : vector<8xf32>
    %367 = vector.multi_reduction <add>, %366, %cst_104 [1] : vector<8x8xf32> to vector<8xf32>
    %368 = vector.shape_cast %367 : vector<8xf32> to vector<8x1xf32>
    %369 = tpu.reciprocal %368 {approx = true} : vector<8x1xf32> -> vector<8x1xf32>
    %370 = vector.broadcast %369 : vector<8x1xf32> to vector<8x8xf32>
    %371 = arith.mulf %366, %370 : vector<8x8xf32>
    %372 = vector.extract_strided_slice %238 {offsets = [0, 4], sizes = [8, 1], strides = [1, 1]} : vector<8x6xf32> to vector<8x1xf32>
    %373 = vector.broadcast %372 : vector<8x1xf32> to vector<8x8xf32>
    %374 = arith.mulf %371, %373 : vector<8x8xf32>
    %375 = arith.addf %343, %374 : vector<8x8xf32>
    %376 = vector.extract_strided_slice %227 {offsets = [0, 160], sizes = [8, 32], strides = [1, 1]} : vector<8x192xbf16> to vector<8x32xbf16>
    %cst_105 = arith.constant dense<0.000000e+00> : vector<8x8xf32>
    %377 = tpu.matmul %376, %219, %cst_105 {dimension_numbers = #tpu.dot_dimension_numbers<[1], [1], [0], [0], [0, 0, 1, 0], [], []>} : vector<8x32xbf16>, vector<8x32xbf16>, vector<8x8xf32> -> vector<8x8xf32>
    %378 = vector.extract_strided_slice %226 {offsets = [0, 160], sizes = [8, 32], strides = [1, 1]} : vector<8x192xf32> to vector<8x32xf32>
    %379 = arith.mulf %378, %378 : vector<8x32xf32>
    %cst_106 = arith.constant dense<0.000000e+00> : vector<8xf32>
    %380 = vector.multi_reduction <add>, %379, %cst_106 [1] : vector<8x32xf32> to vector<8xf32>
    %381 = vector.shape_cast %380 : vector<8xf32> to vector<8x1xf32>
    %382 = vector.broadcast %381 : vector<8x1xf32> to vector<8x8xf32>
    %383 = vector.broadcast %221 : vector<1x8xf32> to vector<8x8xf32>
    %384 = arith.addf %382, %383 : vector<8x8xf32>
    %cst_107 = arith.constant 2.000000e+00 : f32
    %385 = vector.broadcast %cst_107 : f32 to vector<8x8xf32>
    %386 = arith.mulf %385, %377 : vector<8x8xf32>
    %387 = arith.subf %384, %386 : vector<8x8xf32>
    %cst_108 = arith.constant 0.000000e+00 : f32
    %388 = vector.broadcast %cst_108 : f32 to vector<8x8xf32>
    %389 = arith.maximumf %387, %388 : vector<8x8xf32>
    %cst_109 = arith.constant 1.000000e+00 : f32
    %390 = vector.broadcast %cst_109 : f32 to vector<8x8xf32>
    %391 = arith.divf %389, %390 : vector<8x8xf32>
    %392 = math.cos %391 : vector<8x8xf32>
    %cst_110 = arith.constant 0.000000e+00 : f32
    %393 = vector.broadcast %cst_110 : f32 to vector<8x8xf32>
    %394 = arith.subf %393, %389 : vector<8x8xf32>
    %cst_111 = arith.constant 1.000000e+00 : f32
    %395 = vector.broadcast %cst_111 : f32 to vector<8x8xf32>
    %396 = arith.divf %394, %395 : vector<8x8xf32>
    %397 = math.exp %396 : vector<8x8xf32>
    %398 = arith.mulf %392, %397 : vector<8x8xf32>
    %399 = arith.addf %398, %13 : vector<8x8xf32>
    %cst_112 = arith.constant dense<0xFF800000> : vector<8xf32>
    %400 = vector.multi_reduction <maximumf>, %399, %cst_112 [1] : vector<8x8xf32> to vector<8xf32>
    %401 = vector.shape_cast %400 : vector<8xf32> to vector<8x1xf32>
    %402 = vector.broadcast %401 : vector<8x1xf32> to vector<8x8xf32>
    %403 = arith.subf %399, %402 : vector<8x8xf32>
    %404 = math.exp %403 : vector<8x8xf32>
    %cst_113 = arith.constant dense<0.000000e+00> : vector<8xf32>
    %405 = vector.multi_reduction <add>, %404, %cst_113 [1] : vector<8x8xf32> to vector<8xf32>
    %406 = vector.shape_cast %405 : vector<8xf32> to vector<8x1xf32>
    %407 = tpu.reciprocal %406 {approx = true} : vector<8x1xf32> -> vector<8x1xf32>
    %408 = vector.broadcast %407 : vector<8x1xf32> to vector<8x8xf32>
    %409 = arith.mulf %404, %408 : vector<8x8xf32>
    %410 = vector.extract_strided_slice %238 {offsets = [0, 5], sizes = [8, 1], strides = [1, 1]} : vector<8x6xf32> to vector<8x1xf32>
    %411 = vector.broadcast %410 : vector<8x1xf32> to vector<8x8xf32>
    %412 = arith.mulf %409, %411 : vector<8x8xf32>
    %413 = arith.addf %375, %412 : vector<8x8xf32>
    %c0_114 = arith.constant 0 : index
    %c1_115 = arith.constant 1 : index
    %c0_116 = arith.constant 0 : index
    %c0_117 = arith.constant 0 : index
    %414 = vector.load %arg7[%c0_114, %c1_115, %c0_116, %c0_117] : memref<1x4x8x8xf32, #tpu.memory_space<vmem>>, vector<1x1x8x8xf32>
    %415 = vector.shape_cast %414 : vector<1x1x8x8xf32> to vector<8x8xf32>
    %416 = vector.shape_cast %413 : vector<8x8xf32> to vector<1x1x8x8xf32>
    tpu.vector_store %arg7[%c0_114, %c1_115, %c0_116, %c0_117], %416 {strides = array<i32>} : memref<1x4x8x8xf32, #tpu.memory_space<vmem>>, vector<1x1x8x8xf32>,
    %c0_118 = arith.constant 0 : index
    %c2 = arith.constant 2 : index
    %c0_119 = arith.constant 0 : index
    %c0_120 = arith.constant 0 : index
    %417 = vector.load %arg4[%c0_118, %c2, %c0_119, %c0_120] : memref<1x4x8x32xbf16, #tpu.memory_space<vmem>>, vector<1x1x8x32xbf16>
    %418 = vector.shape_cast %417 : vector<1x1x8x32xbf16> to vector<8x32xbf16>
    %c0_121 = arith.constant 0 : index
    %c2_122 = arith.constant 2 : index
    %c0_123 = arith.constant 0 : index
    %c0_124 = arith.constant 0 : index
    %419 = vector.load %arg5[%c0_121, %c2_122, %c0_123, %c0_124] : memref<1x4x8x32xbf16, #tpu.memory_space<vmem>>, vector<1x1x8x32xbf16>
    %420 = vector.shape_cast %419 : vector<1x1x8x32xbf16> to vector<8x32xbf16>
    %421 = arith.mulf %420, %420 : vector<8x32xbf16>
    %cst_125 = arith.constant dense<0.000000e+00> : vector<1x8xf32>
    %422 = tpu.matmul %14, %421, %cst_125 {dimension_numbers = #tpu.dot_dimension_numbers<[1], [1], [0], [0], [0, 0, 1, 0], [], []>} : vector<1x32xbf16>, vector<8x32xbf16>, vector<1x8xf32> -> vector<1x8xf32>
    %c2_126 = arith.constant 2 : index
    %c0_127 = arith.constant 0 : index
    %c0_128 = arith.constant 0 : index
    %423 = vector.load %arg6[%c2_126, %c0_127, %c0_128] : memref<4x32x198xbf16, #tpu.memory_space<vmem>>, vector<1x32x198xbf16>
    %424 = vector.shape_cast %423 : vector<1x32x198xbf16> to vector<32x198xbf16>
    %cst_129 = arith.constant dense<0.000000e+00> : vector<8x198xf32>
    %425 = tpu.matmul %418, %424, %cst_129 {dimension_numbers = #tpu.dot_dimension_numbers<[1], [0], [0], [1], [0, 0, 1, 1], [], []>} : vector<8x32xbf16>, vector<32x198xbf16>, vector<8x198xf32> -> vector<8x198xf32>
    %426 = vector.extract_strided_slice %425 {offsets = [0, 0], sizes = [8, 192], strides = [1, 1]} : vector<8x198xf32> to vector<8x192xf32>
    %427 = math.tanh %426 : vector<8x192xf32>
    %428 = arith.truncf %427 : vector<8x192xf32> to vector<8x192xbf16>
    %429 = vector.extract_strided_slice %425 {offsets = [0, 192], sizes = [8, 6], strides = [1, 1]} : vector<8x198xf32> to vector<8x6xf32>
    %cst_130 = arith.constant dense<0xFF800000> : vector<8xf32>
    %430 = vector.multi_reduction <maximumf>, %429, %cst_130 [1] : vector<8x6xf32> to vector<8xf32>
    %431 = vector.shape_cast %430 : vector<8xf32> to vector<8x1xf32>
    %432 = vector.broadcast %431 : vector<8x1xf32> to vector<8x6xf32>
    %433 = arith.subf %429, %432 : vector<8x6xf32>
    %434 = math.exp %433 : vector<8x6xf32>
    %cst_131 = arith.constant dense<0.000000e+00> : vector<8xf32>
    %435 = vector.multi_reduction <add>, %434, %cst_131 [1] : vector<8x6xf32> to vector<8xf32>
    %436 = vector.shape_cast %435 : vector<8xf32> to vector<8x1xf32>
    %437 = tpu.reciprocal %436 {approx = true} : vector<8x1xf32> -> vector<8x1xf32>
    %438 = vector.broadcast %437 : vector<8x1xf32> to vector<8x6xf32>
    %439 = arith.mulf %434, %438 : vector<8x6xf32>
    %cst_132 = arith.constant 0.000000e+00 : f32
    %440 = vector.broadcast %cst_132 : f32 to vector<8x8xf32>
    %441 = vector.extract_strided_slice %428 {offsets = [0, 0], sizes = [8, 32], strides = [1, 1]} : vector<8x192xbf16> to vector<8x32xbf16>
    %cst_133 = arith.constant dense<0.000000e+00> : vector<8x8xf32>
    %442 = tpu.matmul %441, %420, %cst_133 {dimension_numbers = #tpu.dot_dimension_numbers<[1], [1], [0], [0], [0, 0, 1, 0], [], []>} : vector<8x32xbf16>, vector<8x32xbf16>, vector<8x8xf32> -> vector<8x8xf32>
    %443 = arith.addf %442, %13 : vector<8x8xf32>
    %cst_134 = arith.constant dense<0xFF800000> : vector<8xf32>
    %444 = vector.multi_reduction <maximumf>, %443, %cst_134 [1] : vector<8x8xf32> to vector<8xf32>
    %445 = vector.shape_cast %444 : vector<8xf32> to vector<8x1xf32>
    %446 = vector.broadcast %445 : vector<8x1xf32> to vector<8x8xf32>
    %447 = arith.subf %443, %446 : vector<8x8xf32>
    %448 = math.exp %447 : vector<8x8xf32>
    %cst_135 = arith.constant dense<0.000000e+00> : vector<8xf32>
    %449 = vector.multi_reduction <add>, %448, %cst_135 [1] : vector<8x8xf32> to vector<8xf32>
    %450 = vector.shape_cast %449 : vector<8xf32> to vector<8x1xf32>
    %451 = tpu.reciprocal %450 {approx = true} : vector<8x1xf32> -> vector<8x1xf32>
    %452 = vector.broadcast %451 : vector<8x1xf32> to vector<8x8xf32>
    %453 = arith.mulf %448, %452 : vector<8x8xf32>
    %454 = vector.extract_strided_slice %439 {offsets = [0, 0], sizes = [8, 1], strides = [1, 1]} : vector<8x6xf32> to vector<8x1xf32>
    %455 = vector.broadcast %454 : vector<8x1xf32> to vector<8x8xf32>
    %456 = arith.mulf %453, %455 : vector<8x8xf32>
    %457 = arith.addf %440, %456 : vector<8x8xf32>
    %458 = vector.extract_strided_slice %428 {offsets = [0, 32], sizes = [8, 32], strides = [1, 1]} : vector<8x192xbf16> to vector<8x32xbf16>
    %cst_136 = arith.constant dense<0.000000e+00> : vector<8x8xf32>
    %459 = tpu.matmul %458, %420, %cst_136 {dimension_numbers = #tpu.dot_dimension_numbers<[1], [1], [0], [0], [0, 0, 1, 0], [], []>} : vector<8x32xbf16>, vector<8x32xbf16>, vector<8x8xf32> -> vector<8x8xf32>
    %460 = vector.extract_strided_slice %427 {offsets = [0, 32], sizes = [8, 32], strides = [1, 1]} : vector<8x192xf32> to vector<8x32xf32>
    %461 = arith.mulf %460, %460 : vector<8x32xf32>
    %cst_137 = arith.constant dense<0.000000e+00> : vector<8xf32>
    %462 = vector.multi_reduction <add>, %461, %cst_137 [1] : vector<8x32xf32> to vector<8xf32>
    %463 = vector.shape_cast %462 : vector<8xf32> to vector<8x1xf32>
    %464 = vector.broadcast %463 : vector<8x1xf32> to vector<8x8xf32>
    %465 = vector.broadcast %422 : vector<1x8xf32> to vector<8x8xf32>
    %466 = arith.addf %464, %465 : vector<8x8xf32>
    %cst_138 = arith.constant 2.000000e+00 : f32
    %467 = vector.broadcast %cst_138 : f32 to vector<8x8xf32>
    %468 = arith.mulf %467, %459 : vector<8x8xf32>
    %469 = arith.subf %466, %468 : vector<8x8xf32>
    %cst_139 = arith.constant 0.000000e+00 : f32
    %470 = vector.broadcast %cst_139 : f32 to vector<8x8xf32>
    %471 = arith.maximumf %469, %470 : vector<8x8xf32>
    %cst_140 = arith.constant 1.000000e+00 : f32
    %472 = vector.broadcast %cst_140 : f32 to vector<8x8xf32>
    %473 = arith.addf %472, %471 : vector<8x8xf32>
    %474 = math.log %473 : vector<8x8xf32>
    %cst_141 = arith.constant 0.000000e+00 : f32
    %475 = vector.broadcast %cst_141 : f32 to vector<8x8xf32>
    %476 = arith.subf %475, %474 : vector<8x8xf32>
    %477 = arith.addf %476, %13 : vector<8x8xf32>
    %cst_142 = arith.constant dense<0xFF800000> : vector<8xf32>
    %478 = vector.multi_reduction <maximumf>, %477, %cst_142 [1] : vector<8x8xf32> to vector<8xf32>
    %479 = vector.shape_cast %478 : vector<8xf32> to vector<8x1xf32>
    %480 = vector.broadcast %479 : vector<8x1xf32> to vector<8x8xf32>
    %481 = arith.subf %477, %480 : vector<8x8xf32>
    %482 = math.exp %481 : vector<8x8xf32>
    %cst_143 = arith.constant dense<0.000000e+00> : vector<8xf32>
    %483 = vector.multi_reduction <add>, %482, %cst_143 [1] : vector<8x8xf32> to vector<8xf32>
    %484 = vector.shape_cast %483 : vector<8xf32> to vector<8x1xf32>
    %485 = tpu.reciprocal %484 {approx = true} : vector<8x1xf32> -> vector<8x1xf32>
    %486 = vector.broadcast %485 : vector<8x1xf32> to vector<8x8xf32>
    %487 = arith.mulf %482, %486 : vector<8x8xf32>
    %488 = vector.extract_strided_slice %439 {offsets = [0, 1], sizes = [8, 1], strides = [1, 1]} : vector<8x6xf32> to vector<8x1xf32>
    %489 = vector.broadcast %488 : vector<8x1xf32> to vector<8x8xf32>
    %490 = arith.mulf %487, %489 : vector<8x8xf32>
    %491 = arith.addf %457, %490 : vector<8x8xf32>
    %492 = vector.extract_strided_slice %428 {offsets = [0, 64], sizes = [8, 32], strides = [1, 1]} : vector<8x192xbf16> to vector<8x32xbf16>
    %cst_144 = arith.constant dense<0.000000e+00> : vector<8x8xf32>
    %493 = tpu.matmul %492, %420, %cst_144 {dimension_numbers = #tpu.dot_dimension_numbers<[1], [1], [0], [0], [0, 0, 1, 0], [], []>} : vector<8x32xbf16>, vector<8x32xbf16>, vector<8x8xf32> -> vector<8x8xf32>
    %494 = vector.extract_strided_slice %427 {offsets = [0, 64], sizes = [8, 32], strides = [1, 1]} : vector<8x192xf32> to vector<8x32xf32>
    %495 = arith.mulf %494, %494 : vector<8x32xf32>
    %cst_145 = arith.constant dense<0.000000e+00> : vector<8xf32>
    %496 = vector.multi_reduction <add>, %495, %cst_145 [1] : vector<8x32xf32> to vector<8xf32>
    %497 = vector.shape_cast %496 : vector<8xf32> to vector<8x1xf32>
    %498 = vector.broadcast %497 : vector<8x1xf32> to vector<8x8xf32>
    %499 = vector.broadcast %422 : vector<1x8xf32> to vector<8x8xf32>
    %500 = arith.addf %498, %499 : vector<8x8xf32>
    %cst_146 = arith.constant 2.000000e+00 : f32
    %501 = vector.broadcast %cst_146 : f32 to vector<8x8xf32>
    %502 = arith.mulf %501, %493 : vector<8x8xf32>
    %503 = arith.subf %500, %502 : vector<8x8xf32>
    %cst_147 = arith.constant 0.000000e+00 : f32
    %504 = vector.broadcast %cst_147 : f32 to vector<8x8xf32>
    %505 = arith.maximumf %503, %504 : vector<8x8xf32>
    %cst_148 = arith.constant 0.000000e+00 : f32
    %506 = vector.broadcast %cst_148 : f32 to vector<8x8xf32>
    %507 = arith.subf %506, %505 : vector<8x8xf32>
    %508 = arith.addf %507, %13 : vector<8x8xf32>
    %cst_149 = arith.constant dense<0xFF800000> : vector<8xf32>
    %509 = vector.multi_reduction <maximumf>, %508, %cst_149 [1] : vector<8x8xf32> to vector<8xf32>
    %510 = vector.shape_cast %509 : vector<8xf32> to vector<8x1xf32>
    %511 = vector.broadcast %510 : vector<8x1xf32> to vector<8x8xf32>
    %512 = arith.subf %508, %511 : vector<8x8xf32>
    %513 = math.exp %512 : vector<8x8xf32>
    %cst_150 = arith.constant dense<0.000000e+00> : vector<8xf32>
    %514 = vector.multi_reduction <add>, %513, %cst_150 [1] : vector<8x8xf32> to vector<8xf32>
    %515 = vector.shape_cast %514 : vector<8xf32> to vector<8x1xf32>
    %516 = tpu.reciprocal %515 {approx = true} : vector<8x1xf32> -> vector<8x1xf32>
    %517 = vector.broadcast %516 : vector<8x1xf32> to vector<8x8xf32>
    %518 = arith.mulf %513, %517 : vector<8x8xf32>
    %519 = vector.extract_strided_slice %439 {offsets = [0, 2], sizes = [8, 1], strides = [1, 1]} : vector<8x6xf32> to vector<8x1xf32>
    %520 = vector.broadcast %519 : vector<8x1xf32> to vector<8x8xf32>
    %521 = arith.mulf %518, %520 : vector<8x8xf32>
    %522 = arith.addf %491, %521 : vector<8x8xf32>
    %523 = vector.extract_strided_slice %428 {offsets = [0, 96], sizes = [8, 32], strides = [1, 1]} : vector<8x192xbf16> to vector<8x32xbf16>
    %cst_151 = arith.constant dense<0.000000e+00> : vector<8x8xf32>
    %524 = tpu.matmul %523, %420, %cst_151 {dimension_numbers = #tpu.dot_dimension_numbers<[1], [1], [0], [0], [0, 0, 1, 0], [], []>} : vector<8x32xbf16>, vector<8x32xbf16>, vector<8x8xf32> -> vector<8x8xf32>
    %cst_152 = arith.constant 1.000000e+00 : f32
    %525 = vector.broadcast %cst_152 : f32 to vector<8x8xf32>
    %526 = arith.mulf %525, %524 : vector<8x8xf32>
    %cst_153 = arith.constant 1.000000e+00 : f32
    %527 = vector.broadcast %cst_153 : f32 to vector<8x8xf32>
    %528 = arith.addf %526, %527 : vector<8x8xf32>
    %529 = arith.mulf %528, %528 : vector<8x8xf32>
    %530 = arith.addf %529, %13 : vector<8x8xf32>
    %cst_154 = arith.constant dense<0xFF800000> : vector<8xf32>
    %531 = vector.multi_reduction <maximumf>, %530, %cst_154 [1] : vector<8x8xf32> to vector<8xf32>
    %532 = vector.shape_cast %531 : vector<8xf32> to vector<8x1xf32>
    %533 = vector.broadcast %532 : vector<8x1xf32> to vector<8x8xf32>
    %534 = arith.subf %530, %533 : vector<8x8xf32>
    %535 = math.exp %534 : vector<8x8xf32>
    %cst_155 = arith.constant dense<0.000000e+00> : vector<8xf32>
    %536 = vector.multi_reduction <add>, %535, %cst_155 [1] : vector<8x8xf32> to vector<8xf32>
    %537 = vector.shape_cast %536 : vector<8xf32> to vector<8x1xf32>
    %538 = tpu.reciprocal %537 {approx = true} : vector<8x1xf32> -> vector<8x1xf32>
    %539 = vector.broadcast %538 : vector<8x1xf32> to vector<8x8xf32>
    %540 = arith.mulf %535, %539 : vector<8x8xf32>
    %541 = vector.extract_strided_slice %439 {offsets = [0, 3], sizes = [8, 1], strides = [1, 1]} : vector<8x6xf32> to vector<8x1xf32>
    %542 = vector.broadcast %541 : vector<8x1xf32> to vector<8x8xf32>
    %543 = arith.mulf %540, %542 : vector<8x8xf32>
    %544 = arith.addf %522, %543 : vector<8x8xf32>
    %545 = vector.extract_strided_slice %428 {offsets = [0, 128], sizes = [8, 32], strides = [1, 1]} : vector<8x192xbf16> to vector<8x32xbf16>
    %cst_156 = arith.constant dense<0.000000e+00> : vector<8x8xf32>
    %546 = tpu.matmul %545, %420, %cst_156 {dimension_numbers = #tpu.dot_dimension_numbers<[1], [1], [0], [0], [0, 0, 1, 0], [], []>} : vector<8x32xbf16>, vector<8x32xbf16>, vector<8x8xf32> -> vector<8x8xf32>
    %547 = vector.extract_strided_slice %427 {offsets = [0, 128], sizes = [8, 32], strides = [1, 1]} : vector<8x192xf32> to vector<8x32xf32>
    %548 = arith.mulf %547, %547 : vector<8x32xf32>
    %cst_157 = arith.constant dense<0.000000e+00> : vector<8xf32>
    %549 = vector.multi_reduction <add>, %548, %cst_157 [1] : vector<8x32xf32> to vector<8xf32>
    %550 = vector.shape_cast %549 : vector<8xf32> to vector<8x1xf32>
    %551 = vector.broadcast %550 : vector<8x1xf32> to vector<8x8xf32>
    %552 = vector.broadcast %422 : vector<1x8xf32> to vector<8x8xf32>
    %553 = arith.addf %551, %552 : vector<8x8xf32>
    %cst_158 = arith.constant 2.000000e+00 : f32
    %554 = vector.broadcast %cst_158 : f32 to vector<8x8xf32>
    %555 = arith.mulf %554, %546 : vector<8x8xf32>
    %556 = arith.subf %553, %555 : vector<8x8xf32>
    %cst_159 = arith.constant 0.000000e+00 : f32
    %557 = vector.broadcast %cst_159 : f32 to vector<8x8xf32>
    %558 = arith.maximumf %556, %557 : vector<8x8xf32>
    %cst_160 = arith.constant -5.000000e-01 : f32
    %559 = vector.broadcast %cst_160 : f32 to vector<8x8xf32>
    %560 = arith.mulf %559, %558 : vector<8x8xf32>
    %561 = math.exp %560 : vector<8x8xf32>
    %562 = arith.addf %561, %13 : vector<8x8xf32>
    %cst_161 = arith.constant dense<0xFF800000> : vector<8xf32>
    %563 = vector.multi_reduction <maximumf>, %562, %cst_161 [1] : vector<8x8xf32> to vector<8xf32>
    %564 = vector.shape_cast %563 : vector<8xf32> to vector<8x1xf32>
    %565 = vector.broadcast %564 : vector<8x1xf32> to vector<8x8xf32>
    %566 = arith.subf %562, %565 : vector<8x8xf32>
    %567 = math.exp %566 : vector<8x8xf32>
    %cst_162 = arith.constant dense<0.000000e+00> : vector<8xf32>
    %568 = vector.multi_reduction <add>, %567, %cst_162 [1] : vector<8x8xf32> to vector<8xf32>
    %569 = vector.shape_cast %568 : vector<8xf32> to vector<8x1xf32>
    %570 = tpu.reciprocal %569 {approx = true} : vector<8x1xf32> -> vector<8x1xf32>
    %571 = vector.broadcast %570 : vector<8x1xf32> to vector<8x8xf32>
    %572 = arith.mulf %567, %571 : vector<8x8xf32>
    %573 = vector.extract_strided_slice %439 {offsets = [0, 4], sizes = [8, 1], strides = [1, 1]} : vector<8x6xf32> to vector<8x1xf32>
    %574 = vector.broadcast %573 : vector<8x1xf32> to vector<8x8xf32>
    %575 = arith.mulf %572, %574 : vector<8x8xf32>
    %576 = arith.addf %544, %575 : vector<8x8xf32>
    %577 = vector.extract_strided_slice %428 {offsets = [0, 160], sizes = [8, 32], strides = [1, 1]} : vector<8x192xbf16> to vector<8x32xbf16>
    %cst_163 = arith.constant dense<0.000000e+00> : vector<8x8xf32>
    %578 = tpu.matmul %577, %420, %cst_163 {dimension_numbers = #tpu.dot_dimension_numbers<[1], [1], [0], [0], [0, 0, 1, 0], [], []>} : vector<8x32xbf16>, vector<8x32xbf16>, vector<8x8xf32> -> vector<8x8xf32>
    %579 = vector.extract_strided_slice %427 {offsets = [0, 160], sizes = [8, 32], strides = [1, 1]} : vector<8x192xf32> to vector<8x32xf32>
    %580 = arith.mulf %579, %579 : vector<8x32xf32>
    %cst_164 = arith.constant dense<0.000000e+00> : vector<8xf32>
    %581 = vector.multi_reduction <add>, %580, %cst_164 [1] : vector<8x32xf32> to vector<8xf32>
    %582 = vector.shape_cast %581 : vector<8xf32> to vector<8x1xf32>
    %583 = vector.broadcast %582 : vector<8x1xf32> to vector<8x8xf32>
    %584 = vector.broadcast %422 : vector<1x8xf32> to vector<8x8xf32>
    %585 = arith.addf %583, %584 : vector<8x8xf32>
    %cst_165 = arith.constant 2.000000e+00 : f32
    %586 = vector.broadcast %cst_165 : f32 to vector<8x8xf32>
    %587 = arith.mulf %586, %578 : vector<8x8xf32>
    %588 = arith.subf %585, %587 : vector<8x8xf32>
    %cst_166 = arith.constant 0.000000e+00 : f32
    %589 = vector.broadcast %cst_166 : f32 to vector<8x8xf32>
    %590 = arith.maximumf %588, %589 : vector<8x8xf32>
    %cst_167 = arith.constant 1.000000e+00 : f32
    %591 = vector.broadcast %cst_167 : f32 to vector<8x8xf32>
    %592 = arith.divf %590, %591 : vector<8x8xf32>
    %593 = math.cos %592 : vector<8x8xf32>
    %cst_168 = arith.constant 0.000000e+00 : f32
    %594 = vector.broadcast %cst_168 : f32 to vector<8x8xf32>
    %595 = arith.subf %594, %590 : vector<8x8xf32>
    %cst_169 = arith.constant 1.000000e+00 : f32
    %596 = vector.broadcast %cst_169 : f32 to vector<8x8xf32>
    %597 = arith.divf %595, %596 : vector<8x8xf32>
    %598 = math.exp %597 : vector<8x8xf32>
    %599 = arith.mulf %593, %598 : vector<8x8xf32>
    %600 = arith.addf %599, %13 : vector<8x8xf32>
    %cst_170 = arith.constant dense<0xFF800000> : vector<8xf32>
    %601 = vector.multi_reduction <maximumf>, %600, %cst_170 [1] : vector<8x8xf32> to vector<8xf32>
    %602 = vector.shape_cast %601 : vector<8xf32> to vector<8x1xf32>
    %603 = vector.broadcast %602 : vector<8x1xf32> to vector<8x8xf32>
    %604 = arith.subf %600, %603 : vector<8x8xf32>
    %605 = math.exp %604 : vector<8x8xf32>
    %cst_171 = arith.constant dense<0.000000e+00> : vector<8xf32>
    %606 = vector.multi_reduction <add>, %605, %cst_171 [1] : vector<8x8xf32> to vector<8xf32>
    %607 = vector.shape_cast %606 : vector<8xf32> to vector<8x1xf32>
    %608 = tpu.reciprocal %607 {approx = true} : vector<8x1xf32> -> vector<8x1xf32>
    %609 = vector.broadcast %608 : vector<8x1xf32> to vector<8x8xf32>
    %610 = arith.mulf %605, %609 : vector<8x8xf32>
    %611 = vector.extract_strided_slice %439 {offsets = [0, 5], sizes = [8, 1], strides = [1, 1]} : vector<8x6xf32> to vector<8x1xf32>
    %612 = vector.broadcast %611 : vector<8x1xf32> to vector<8x8xf32>
    %613 = arith.mulf %610, %612 : vector<8x8xf32>
    %614 = arith.addf %576, %613 : vector<8x8xf32>
    %c0_172 = arith.constant 0 : index
    %c2_173 = arith.constant 2 : index
    %c0_174 = arith.constant 0 : index
    %c0_175 = arith.constant 0 : index
    %615 = vector.load %arg7[%c0_172, %c2_173, %c0_174, %c0_175] : memref<1x4x8x8xf32, #tpu.memory_space<vmem>>, vector<1x1x8x8xf32>
    %616 = vector.shape_cast %615 : vector<1x1x8x8xf32> to vector<8x8xf32>
    %617 = vector.shape_cast %614 : vector<8x8xf32> to vector<1x1x8x8xf32>
    tpu.vector_store %arg7[%c0_172, %c2_173, %c0_174, %c0_175], %617 {strides = array<i32>} : memref<1x4x8x8xf32, #tpu.memory_space<vmem>>, vector<1x1x8x8xf32>,
    %c0_176 = arith.constant 0 : index
    %c3 = arith.constant 3 : index
    %c0_177 = arith.constant 0 : index
    %c0_178 = arith.constant 0 : index
    %618 = vector.load %arg4[%c0_176, %c3, %c0_177, %c0_178] : memref<1x4x8x32xbf16, #tpu.memory_space<vmem>>, vector<1x1x8x32xbf16>
    %619 = vector.shape_cast %618 : vector<1x1x8x32xbf16> to vector<8x32xbf16>
    %c0_179 = arith.constant 0 : index
    %c3_180 = arith.constant 3 : index
    %c0_181 = arith.constant 0 : index
    %c0_182 = arith.constant 0 : index
    %620 = vector.load %arg5[%c0_179, %c3_180, %c0_181, %c0_182] : memref<1x4x8x32xbf16, #tpu.memory_space<vmem>>, vector<1x1x8x32xbf16>
    %621 = vector.shape_cast %620 : vector<1x1x8x32xbf16> to vector<8x32xbf16>
    %622 = arith.mulf %621, %621 : vector<8x32xbf16>
    %cst_183 = arith.constant dense<0.000000e+00> : vector<1x8xf32>
    %623 = tpu.matmul %14, %622, %cst_183 {dimension_numbers = #tpu.dot_dimension_numbers<[1], [1], [0], [0], [0, 0, 1, 0], [], []>} : vector<1x32xbf16>, vector<8x32xbf16>, vector<1x8xf32> -> vector<1x8xf32>
    %c3_184 = arith.constant 3 : index
    %c0_185 = arith.constant 0 : index
    %c0_186 = arith.constant 0 : index
    %624 = vector.load %arg6[%c3_184, %c0_185, %c0_186] : memref<4x32x198xbf16, #tpu.memory_space<vmem>>, vector<1x32x198xbf16>
    %625 = vector.shape_cast %624 : vector<1x32x198xbf16> to vector<32x198xbf16>
    %cst_187 = arith.constant dense<0.000000e+00> : vector<8x198xf32>
    %626 = tpu.matmul %619, %625, %cst_187 {dimension_numbers = #tpu.dot_dimension_numbers<[1], [0], [0], [1], [0, 0, 1, 1], [], []>} : vector<8x32xbf16>, vector<32x198xbf16>, vector<8x198xf32> -> vector<8x198xf32>
    %627 = vector.extract_strided_slice %626 {offsets = [0, 0], sizes = [8, 192], strides = [1, 1]} : vector<8x198xf32> to vector<8x192xf32>
    %628 = math.tanh %627 : vector<8x192xf32>
    %629 = arith.truncf %628 : vector<8x192xf32> to vector<8x192xbf16>
    %630 = vector.extract_strided_slice %626 {offsets = [0, 192], sizes = [8, 6], strides = [1, 1]} : vector<8x198xf32> to vector<8x6xf32>
    %cst_188 = arith.constant dense<0xFF800000> : vector<8xf32>
    %631 = vector.multi_reduction <maximumf>, %630, %cst_188 [1] : vector<8x6xf32> to vector<8xf32>
    %632 = vector.shape_cast %631 : vector<8xf32> to vector<8x1xf32>
    %633 = vector.broadcast %632 : vector<8x1xf32> to vector<8x6xf32>
    %634 = arith.subf %630, %633 : vector<8x6xf32>
    %635 = math.exp %634 : vector<8x6xf32>
    %cst_189 = arith.constant dense<0.000000e+00> : vector<8xf32>
    %636 = vector.multi_reduction <add>, %635, %cst_189 [1] : vector<8x6xf32> to vector<8xf32>
    %637 = vector.shape_cast %636 : vector<8xf32> to vector<8x1xf32>
    %638 = tpu.reciprocal %637 {approx = true} : vector<8x1xf32> -> vector<8x1xf32>
    %639 = vector.broadcast %638 : vector<8x1xf32> to vector<8x6xf32>
    %640 = arith.mulf %635, %639 : vector<8x6xf32>
    %cst_190 = arith.constant 0.000000e+00 : f32
    %641 = vector.broadcast %cst_190 : f32 to vector<8x8xf32>
    %642 = vector.extract_strided_slice %629 {offsets = [0, 0], sizes = [8, 32], strides = [1, 1]} : vector<8x192xbf16> to vector<8x32xbf16>
    %cst_191 = arith.constant dense<0.000000e+00> : vector<8x8xf32>
    %643 = tpu.matmul %642, %621, %cst_191 {dimension_numbers = #tpu.dot_dimension_numbers<[1], [1], [0], [0], [0, 0, 1, 0], [], []>} : vector<8x32xbf16>, vector<8x32xbf16>, vector<8x8xf32> -> vector<8x8xf32>
    %644 = arith.addf %643, %13 : vector<8x8xf32>
    %cst_192 = arith.constant dense<0xFF800000> : vector<8xf32>
    %645 = vector.multi_reduction <maximumf>, %644, %cst_192 [1] : vector<8x8xf32> to vector<8xf32>
    %646 = vector.shape_cast %645 : vector<8xf32> to vector<8x1xf32>
    %647 = vector.broadcast %646 : vector<8x1xf32> to vector<8x8xf32>
    %648 = arith.subf %644, %647 : vector<8x8xf32>
    %649 = math.exp %648 : vector<8x8xf32>
    %cst_193 = arith.constant dense<0.000000e+00> : vector<8xf32>
    %650 = vector.multi_reduction <add>, %649, %cst_193 [1] : vector<8x8xf32> to vector<8xf32>
    %651 = vector.shape_cast %650 : vector<8xf32> to vector<8x1xf32>
    %652 = tpu.reciprocal %651 {approx = true} : vector<8x1xf32> -> vector<8x1xf32>
    %653 = vector.broadcast %652 : vector<8x1xf32> to vector<8x8xf32>
    %654 = arith.mulf %649, %653 : vector<8x8xf32>
    %655 = vector.extract_strided_slice %640 {offsets = [0, 0], sizes = [8, 1], strides = [1, 1]} : vector<8x6xf32> to vector<8x1xf32>
    %656 = vector.broadcast %655 : vector<8x1xf32> to vector<8x8xf32>
    %657 = arith.mulf %654, %656 : vector<8x8xf32>
    %658 = arith.addf %641, %657 : vector<8x8xf32>
    %659 = vector.extract_strided_slice %629 {offsets = [0, 32], sizes = [8, 32], strides = [1, 1]} : vector<8x192xbf16> to vector<8x32xbf16>
    %cst_194 = arith.constant dense<0.000000e+00> : vector<8x8xf32>
    %660 = tpu.matmul %659, %621, %cst_194 {dimension_numbers = #tpu.dot_dimension_numbers<[1], [1], [0], [0], [0, 0, 1, 0], [], []>} : vector<8x32xbf16>, vector<8x32xbf16>, vector<8x8xf32> -> vector<8x8xf32>
    %661 = vector.extract_strided_slice %628 {offsets = [0, 32], sizes = [8, 32], strides = [1, 1]} : vector<8x192xf32> to vector<8x32xf32>
    %662 = arith.mulf %661, %661 : vector<8x32xf32>
    %cst_195 = arith.constant dense<0.000000e+00> : vector<8xf32>
    %663 = vector.multi_reduction <add>, %662, %cst_195 [1] : vector<8x32xf32> to vector<8xf32>
    %664 = vector.shape_cast %663 : vector<8xf32> to vector<8x1xf32>
    %665 = vector.broadcast %664 : vector<8x1xf32> to vector<8x8xf32>
    %666 = vector.broadcast %623 : vector<1x8xf32> to vector<8x8xf32>
    %667 = arith.addf %665, %666 : vector<8x8xf32>
    %cst_196 = arith.constant 2.000000e+00 : f32
    %668 = vector.broadcast %cst_196 : f32 to vector<8x8xf32>
    %669 = arith.mulf %668, %660 : vector<8x8xf32>
    %670 = arith.subf %667, %669 : vector<8x8xf32>
    %cst_197 = arith.constant 0.000000e+00 : f32
    %671 = vector.broadcast %cst_197 : f32 to vector<8x8xf32>
    %672 = arith.maximumf %670, %671 : vector<8x8xf32>
    %cst_198 = arith.constant 1.000000e+00 : f32
    %673 = vector.broadcast %cst_198 : f32 to vector<8x8xf32>
    %674 = arith.addf %673, %672 : vector<8x8xf32>
    %675 = math.log %674 : vector<8x8xf32>
    %cst_199 = arith.constant 0.000000e+00 : f32
    %676 = vector.broadcast %cst_199 : f32 to vector<8x8xf32>
    %677 = arith.subf %676, %675 : vector<8x8xf32>
    %678 = arith.addf %677, %13 : vector<8x8xf32>
    %cst_200 = arith.constant dense<0xFF800000> : vector<8xf32>
    %679 = vector.multi_reduction <maximumf>, %678, %cst_200 [1] : vector<8x8xf32> to vector<8xf32>
    %680 = vector.shape_cast %679 : vector<8xf32> to vector<8x1xf32>
    %681 = vector.broadcast %680 : vector<8x1xf32> to vector<8x8xf32>
    %682 = arith.subf %678, %681 : vector<8x8xf32>
    %683 = math.exp %682 : vector<8x8xf32>
    %cst_201 = arith.constant dense<0.000000e+00> : vector<8xf32>
    %684 = vector.multi_reduction <add>, %683, %cst_201 [1] : vector<8x8xf32> to vector<8xf32>
    %685 = vector.shape_cast %684 : vector<8xf32> to vector<8x1xf32>
    %686 = tpu.reciprocal %685 {approx = true} : vector<8x1xf32> -> vector<8x1xf32>
    %687 = vector.broadcast %686 : vector<8x1xf32> to vector<8x8xf32>
    %688 = arith.mulf %683, %687 : vector<8x8xf32>
    %689 = vector.extract_strided_slice %640 {offsets = [0, 1], sizes = [8, 1], strides = [1, 1]} : vector<8x6xf32> to vector<8x1xf32>
    %690 = vector.broadcast %689 : vector<8x1xf32> to vector<8x8xf32>
    %691 = arith.mulf %688, %690 : vector<8x8xf32>
    %692 = arith.addf %658, %691 : vector<8x8xf32>
    %693 = vector.extract_strided_slice %629 {offsets = [0, 64], sizes = [8, 32], strides = [1, 1]} : vector<8x192xbf16> to vector<8x32xbf16>
    %cst_202 = arith.constant dense<0.000000e+00> : vector<8x8xf32>
    %694 = tpu.matmul %693, %621, %cst_202 {dimension_numbers = #tpu.dot_dimension_numbers<[1], [1], [0], [0], [0, 0, 1, 0], [], []>} : vector<8x32xbf16>, vector<8x32xbf16>, vector<8x8xf32> -> vector<8x8xf32>
    %695 = vector.extract_strided_slice %628 {offsets = [0, 64], sizes = [8, 32], strides = [1, 1]} : vector<8x192xf32> to vector<8x32xf32>
    %696 = arith.mulf %695, %695 : vector<8x32xf32>
    %cst_203 = arith.constant dense<0.000000e+00> : vector<8xf32>
    %697 = vector.multi_reduction <add>, %696, %cst_203 [1] : vector<8x32xf32> to vector<8xf32>
    %698 = vector.shape_cast %697 : vector<8xf32> to vector<8x1xf32>
    %699 = vector.broadcast %698 : vector<8x1xf32> to vector<8x8xf32>
    %700 = vector.broadcast %623 : vector<1x8xf32> to vector<8x8xf32>
    %701 = arith.addf %699, %700 : vector<8x8xf32>
    %cst_204 = arith.constant 2.000000e+00 : f32
    %702 = vector.broadcast %cst_204 : f32 to vector<8x8xf32>
    %703 = arith.mulf %702, %694 : vector<8x8xf32>
    %704 = arith.subf %701, %703 : vector<8x8xf32>
    %cst_205 = arith.constant 0.000000e+00 : f32
    %705 = vector.broadcast %cst_205 : f32 to vector<8x8xf32>
    %706 = arith.maximumf %704, %705 : vector<8x8xf32>
    %cst_206 = arith.constant 0.000000e+00 : f32
    %707 = vector.broadcast %cst_206 : f32 to vector<8x8xf32>
    %708 = arith.subf %707, %706 : vector<8x8xf32>
    %709 = arith.addf %708, %13 : vector<8x8xf32>
    %cst_207 = arith.constant dense<0xFF800000> : vector<8xf32>
    %710 = vector.multi_reduction <maximumf>, %709, %cst_207 [1] : vector<8x8xf32> to vector<8xf32>
    %711 = vector.shape_cast %710 : vector<8xf32> to vector<8x1xf32>
    %712 = vector.broadcast %711 : vector<8x1xf32> to vector<8x8xf32>
    %713 = arith.subf %709, %712 : vector<8x8xf32>
    %714 = math.exp %713 : vector<8x8xf32>
    %cst_208 = arith.constant dense<0.000000e+00> : vector<8xf32>
    %715 = vector.multi_reduction <add>, %714, %cst_208 [1] : vector<8x8xf32> to vector<8xf32>
    %716 = vector.shape_cast %715 : vector<8xf32> to vector<8x1xf32>
    %717 = tpu.reciprocal %716 {approx = true} : vector<8x1xf32> -> vector<8x1xf32>
    %718 = vector.broadcast %717 : vector<8x1xf32> to vector<8x8xf32>
    %719 = arith.mulf %714, %718 : vector<8x8xf32>
    %720 = vector.extract_strided_slice %640 {offsets = [0, 2], sizes = [8, 1], strides = [1, 1]} : vector<8x6xf32> to vector<8x1xf32>
    %721 = vector.broadcast %720 : vector<8x1xf32> to vector<8x8xf32>
    %722 = arith.mulf %719, %721 : vector<8x8xf32>
    %723 = arith.addf %692, %722 : vector<8x8xf32>
    %724 = vector.extract_strided_slice %629 {offsets = [0, 96], sizes = [8, 32], strides = [1, 1]} : vector<8x192xbf16> to vector<8x32xbf16>
    %cst_209 = arith.constant dense<0.000000e+00> : vector<8x8xf32>
    %725 = tpu.matmul %724, %621, %cst_209 {dimension_numbers = #tpu.dot_dimension_numbers<[1], [1], [0], [0], [0, 0, 1, 0], [], []>} : vector<8x32xbf16>, vector<8x32xbf16>, vector<8x8xf32> -> vector<8x8xf32>
    %cst_210 = arith.constant 1.000000e+00 : f32
    %726 = vector.broadcast %cst_210 : f32 to vector<8x8xf32>
    %727 = arith.mulf %726, %725 : vector<8x8xf32>
    %cst_211 = arith.constant 1.000000e+00 : f32
    %728 = vector.broadcast %cst_211 : f32 to vector<8x8xf32>
    %729 = arith.addf %727, %728 : vector<8x8xf32>
    %730 = arith.mulf %729, %729 : vector<8x8xf32>
    %731 = arith.addf %730, %13 : vector<8x8xf32>
    %cst_212 = arith.constant dense<0xFF800000> : vector<8xf32>
    %732 = vector.multi_reduction <maximumf>, %731, %cst_212 [1] : vector<8x8xf32> to vector<8xf32>
    %733 = vector.shape_cast %732 : vector<8xf32> to vector<8x1xf32>
    %734 = vector.broadcast %733 : vector<8x1xf32> to vector<8x8xf32>
    %735 = arith.subf %731, %734 : vector<8x8xf32>
    %736 = math.exp %735 : vector<8x8xf32>
    %cst_213 = arith.constant dense<0.000000e+00> : vector<8xf32>
    %737 = vector.multi_reduction <add>, %736, %cst_213 [1] : vector<8x8xf32> to vector<8xf32>
    %738 = vector.shape_cast %737 : vector<8xf32> to vector<8x1xf32>
    %739 = tpu.reciprocal %738 {approx = true} : vector<8x1xf32> -> vector<8x1xf32>
    %740 = vector.broadcast %739 : vector<8x1xf32> to vector<8x8xf32>
    %741 = arith.mulf %736, %740 : vector<8x8xf32>
    %742 = vector.extract_strided_slice %640 {offsets = [0, 3], sizes = [8, 1], strides = [1, 1]} : vector<8x6xf32> to vector<8x1xf32>
    %743 = vector.broadcast %742 : vector<8x1xf32> to vector<8x8xf32>
    %744 = arith.mulf %741, %743 : vector<8x8xf32>
    %745 = arith.addf %723, %744 : vector<8x8xf32>
    %746 = vector.extract_strided_slice %629 {offsets = [0, 128], sizes = [8, 32], strides = [1, 1]} : vector<8x192xbf16> to vector<8x32xbf16>
    %cst_214 = arith.constant dense<0.000000e+00> : vector<8x8xf32>
    %747 = tpu.matmul %746, %621, %cst_214 {dimension_numbers = #tpu.dot_dimension_numbers<[1], [1], [0], [0], [0, 0, 1, 0], [], []>} : vector<8x32xbf16>, vector<8x32xbf16>, vector<8x8xf32> -> vector<8x8xf32>
    %748 = vector.extract_strided_slice %628 {offsets = [0, 128], sizes = [8, 32], strides = [1, 1]} : vector<8x192xf32> to vector<8x32xf32>
    %749 = arith.mulf %748, %748 : vector<8x32xf32>
    %cst_215 = arith.constant dense<0.000000e+00> : vector<8xf32>
    %750 = vector.multi_reduction <add>, %749, %cst_215 [1] : vector<8x32xf32> to vector<8xf32>
    %751 = vector.shape_cast %750 : vector<8xf32> to vector<8x1xf32>
    %752 = vector.broadcast %751 : vector<8x1xf32> to vector<8x8xf32>
    %753 = vector.broadcast %623 : vector<1x8xf32> to vector<8x8xf32>
    %754 = arith.addf %752, %753 : vector<8x8xf32>
    %cst_216 = arith.constant 2.000000e+00 : f32
    %755 = vector.broadcast %cst_216 : f32 to vector<8x8xf32>
    %756 = arith.mulf %755, %747 : vector<8x8xf32>
    %757 = arith.subf %754, %756 : vector<8x8xf32>
    %cst_217 = arith.constant 0.000000e+00 : f32
    %758 = vector.broadcast %cst_217 : f32 to vector<8x8xf32>
    %759 = arith.maximumf %757, %758 : vector<8x8xf32>
    %cst_218 = arith.constant -5.000000e-01 : f32
    %760 = vector.broadcast %cst_218 : f32 to vector<8x8xf32>
    %761 = arith.mulf %760, %759 : vector<8x8xf32>
    %762 = math.exp %761 : vector<8x8xf32>
    %763 = arith.addf %762, %13 : vector<8x8xf32>
    %cst_219 = arith.constant dense<0xFF800000> : vector<8xf32>
    %764 = vector.multi_reduction <maximumf>, %763, %cst_219 [1] : vector<8x8xf32> to vector<8xf32>
    %765 = vector.shape_cast %764 : vector<8xf32> to vector<8x1xf32>
    %766 = vector.broadcast %765 : vector<8x1xf32> to vector<8x8xf32>
    %767 = arith.subf %763, %766 : vector<8x8xf32>
    %768 = math.exp %767 : vector<8x8xf32>
    %cst_220 = arith.constant dense<0.000000e+00> : vector<8xf32>
    %769 = vector.multi_reduction <add>, %768, %cst_220 [1] : vector<8x8xf32> to vector<8xf32>
    %770 = vector.shape_cast %769 : vector<8xf32> to vector<8x1xf32>
    %771 = tpu.reciprocal %770 {approx = true} : vector<8x1xf32> -> vector<8x1xf32>
    %772 = vector.broadcast %771 : vector<8x1xf32> to vector<8x8xf32>
    %773 = arith.mulf %768, %772 : vector<8x8xf32>
    %774 = vector.extract_strided_slice %640 {offsets = [0, 4], sizes = [8, 1], strides = [1, 1]} : vector<8x6xf32> to vector<8x1xf32>
    %775 = vector.broadcast %774 : vector<8x1xf32> to vector<8x8xf32>
    %776 = arith.mulf %773, %775 : vector<8x8xf32>
    %777 = arith.addf %745, %776 : vector<8x8xf32>
    %778 = vector.extract_strided_slice %629 {offsets = [0, 160], sizes = [8, 32], strides = [1, 1]} : vector<8x192xbf16> to vector<8x32xbf16>
    %cst_221 = arith.constant dense<0.000000e+00> : vector<8x8xf32>
    %779 = tpu.matmul %778, %621, %cst_221 {dimension_numbers = #tpu.dot_dimension_numbers<[1], [1], [0], [0], [0, 0, 1, 0], [], []>} : vector<8x32xbf16>, vector<8x32xbf16>, vector<8x8xf32> -> vector<8x8xf32>
    %780 = vector.extract_strided_slice %628 {offsets = [0, 160], sizes = [8, 32], strides = [1, 1]} : vector<8x192xf32> to vector<8x32xf32>
    %781 = arith.mulf %780, %780 : vector<8x32xf32>
    %cst_222 = arith.constant dense<0.000000e+00> : vector<8xf32>
    %782 = vector.multi_reduction <add>, %781, %cst_222 [1] : vector<8x32xf32> to vector<8xf32>
    %783 = vector.shape_cast %782 : vector<8xf32> to vector<8x1xf32>
    %784 = vector.broadcast %783 : vector<8x1xf32> to vector<8x8xf32>
    %785 = vector.broadcast %623 : vector<1x8xf32> to vector<8x8xf32>
    %786 = arith.addf %784, %785 : vector<8x8xf32>
    %cst_223 = arith.constant 2.000000e+00 : f32
    %787 = vector.broadcast %cst_223 : f32 to vector<8x8xf32>
    %788 = arith.mulf %787, %779 : vector<8x8xf32>
    %789 = arith.subf %786, %788 : vector<8x8xf32>
    %cst_224 = arith.constant 0.000000e+00 : f32
    %790 = vector.broadcast %cst_224 : f32 to vector<8x8xf32>
    %791 = arith.maximumf %789, %790 : vector<8x8xf32>
    %cst_225 = arith.constant 1.000000e+00 : f32
    %792 = vector.broadcast %cst_225 : f32 to vector<8x8xf32>
    %793 = arith.divf %791, %792 : vector<8x8xf32>
    %794 = math.cos %793 : vector<8x8xf32>
    %cst_226 = arith.constant 0.000000e+00 : f32
    %795 = vector.broadcast %cst_226 : f32 to vector<8x8xf32>
    %796 = arith.subf %795, %791 : vector<8x8xf32>
    %cst_227 = arith.constant 1.000000e+00 : f32
    %797 = vector.broadcast %cst_227 : f32 to vector<8x8xf32>
    %798 = arith.divf %796, %797 : vector<8x8xf32>
    %799 = math.exp %798 : vector<8x8xf32>
    %800 = arith.mulf %794, %799 : vector<8x8xf32>
    %801 = arith.addf %800, %13 : vector<8x8xf32>
    %cst_228 = arith.constant dense<0xFF800000> : vector<8xf32>
    %802 = vector.multi_reduction <maximumf>, %801, %cst_228 [1] : vector<8x8xf32> to vector<8xf32>
    %803 = vector.shape_cast %802 : vector<8xf32> to vector<8x1xf32>
    %804 = vector.broadcast %803 : vector<8x1xf32> to vector<8x8xf32>
    %805 = arith.subf %801, %804 : vector<8x8xf32>
    %806 = math.exp %805 : vector<8x8xf32>
    %cst_229 = arith.constant dense<0.000000e+00> : vector<8xf32>
    %807 = vector.multi_reduction <add>, %806, %cst_229 [1] : vector<8x8xf32> to vector<8xf32>
    %808 = vector.shape_cast %807 : vector<8xf32> to vector<8x1xf32>
    %809 = tpu.reciprocal %808 {approx = true} : vector<8x1xf32> -> vector<8x1xf32>
    %810 = vector.broadcast %809 : vector<8x1xf32> to vector<8x8xf32>
    %811 = arith.mulf %806, %810 : vector<8x8xf32>
    %812 = vector.extract_strided_slice %640 {offsets = [0, 5], sizes = [8, 1], strides = [1, 1]} : vector<8x6xf32> to vector<8x1xf32>
    %813 = vector.broadcast %812 : vector<8x1xf32> to vector<8x8xf32>
    %814 = arith.mulf %811, %813 : vector<8x8xf32>
    %815 = arith.addf %777, %814 : vector<8x8xf32>
    %c0_230 = arith.constant 0 : index
    %c3_231 = arith.constant 3 : index
    %c0_232 = arith.constant 0 : index
    %c0_233 = arith.constant 0 : index
    %816 = vector.load %arg7[%c0_230, %c3_231, %c0_232, %c0_233] : memref<1x4x8x8xf32, #tpu.memory_space<vmem>>, vector<1x1x8x8xf32>
    %817 = vector.shape_cast %816 : vector<1x1x8x8xf32> to vector<8x8xf32>
    %818 = vector.shape_cast %815 : vector<8x8xf32> to vector<1x1x8x8xf32>
    tpu.vector_store %arg7[%c0_230, %c3_231, %c0_232, %c0_233], %818 {strides = array<i32>} : memref<1x4x8x8xf32, #tpu.memory_space<vmem>>, vector<1x1x8x8xf32>,
    return
  }
  func.func @transform_0(%arg0: i32, %arg1: i32, %arg2: i32, %arg3: memref<2xi32, #tpu.memory_space<smem>>) -> (i32, i32, i32, i32) {
    %c0_i32 = arith.constant 0 : i32
    %c0_i32_0 = arith.constant 0 : i32
    return %arg0, %arg1, %arg2, %c0_i32 : i32, i32, i32, i32
  }
  func.func @transform_1(%arg0: i32, %arg1: i32, %arg2: i32, %arg3: memref<2xi32, #tpu.memory_space<smem>>) -> (i32, i32, i32, i32) {
    %c0_i32 = arith.constant 0 : i32
    %c0_i32_0 = arith.constant 0 : i32
    %c0_i32_1 = arith.constant 0 : i32
    return %arg0, %arg1, %c0_i32, %c0_i32_0 : i32, i32, i32, i32
  }
  func.func @transform_2(%arg0: i32, %arg1: i32, %arg2: i32, %arg3: memref<2xi32, #tpu.memory_space<smem>>) -> (i32, i32, i32) {
    %c0_i32 = arith.constant 0 : i32
    %c0_i32_0 = arith.constant 0 : i32
    %c0_i32_1 = arith.constant 0 : i32
    return %arg1, %c0_i32, %c0_i32_0 : i32, i32, i32
  }
  func.func @transform_3(%arg0: i32, %arg1: i32, %arg2: i32, %arg3: memref<2xi32, #tpu.memory_space<smem>>) -> (i32, i32, i32, i32) {
    %c0_i32 = arith.constant 0 : i32
    %c0_i32_0 = arith.constant 0 : i32
    return %arg0, %arg1, %arg2, %c0_i32 : i32, i32, i32, i32
  }
}

</mosaic_0001>

<bundles_post_ra>
// kernel: generalised_softmax.1
= control target key start
LH: loop header
LB: loop body
LE: loop exit
PB: predicated region body
PF: predicated region fallthrough
CT: control target
= control target key end

     0   :  { %s5098_s0 = inlined_call_operand.vmem [shape: s32[2], index: 0, kind: input, shape index: {}]   ;;  %s5099_s1 = inlined_call_operand.vmem [shape: bf16[2,4,8,32], index: 1, kind: input, shape index: {}]   ;;  %s5100_s2 = inlined_call_operand.vmem [shape: bf16[2,4,8,32], index: 2, kind: input, shape index: {}]   ;;  %s5101_s3 = inlined_call_operand.vmem [shape: bf16[4,32,198], index: 3, kind: input, shape index: {}]   ;;  %s5102_s4 = inlined_call_operand.hbm [shape: f32[2,4,8,8], index: 4, kind: output, shape index: {}]  }
   0x1   :  { %s9_s17 = sshll.u32 %s5098_s0, 4  ;;  %s10_s17 = int_to_ptr.vmem [resolvable:$true] %s9_s17 }
   0x2   :  { %s3784_s18 = scalar_lea.vmem %s10_s17, 16  ;;  %p3789_p1 = scmp.lt.s32.totalorder %s10_s17, %s10_s17 }
   0x3   :  { %p3785_p0 = scmp.ne.s32.totalorder %s10_s17, %s3784_s18  ;;  %p3790_p2 = scmp.lt.s32.totalorder %s3784_s18, %s3784_s18 }
   0x5   :  { %p3791_p3 = por %p3790_p2, %p3789_p1 }
   0x7   :  { %p3792_p4 = pnand %p3791_p3, %p3785_p0 }
   0x9   :  { %3795 = shalt.err (!%p3792_p4)  }
   0xa   :  { %s3876_s19 = smov [#allocation3]  }
   0xb   :  { %12 = dma.vmem_to_smem %s10_s17, 16, %s3876_s19, [#allocation2] }
   0xc   :  { %3846 = dma.done.wait [#allocation2], 16 }
   0xd   :  { %3847 = vsyncadd [#allocation2], 4294967280 }
   0xe   :  { %14 = sfence }
   0xf   :  { %15 = vsyncpa [#allocation5], 0 }
  0x10   :  { %17 = vsyncpa [#allocation5 + $0x1], 0  ;;  %s3928_s20 = smov 0   ;;  %s3930_s21 = smov 0  }
  0x11   :  { %s3932_s0 = smov 0   ;;  %s3934_s22 = smov 0  }
  0x12   :  { %s3936_s23 = smov 0   ;;  %s3938_s24 = smov 0  }
  0x13 LB: > { %s3154_s25 = sadd.s32 4294967295, %s3874_s24   ;;  %s3155_s26 = sadd.s32 4294967294, %s3874_s24   ;;  %s3874_s24 = sphi %s3938_s24, %s23_s24   ;;  %s3870_s23 = sphi %s3936_s23, %s5174_s23   ;;  %s3866_s22 = sphi %s3934_s22, %s5173_s22   ;;  %s3862_s0 = sphi %s3932_s0, %s5172_s0   ;;  %s3858_s21 = sphi %s3930_s21, %s5171_s21   ;;  %s3854_s20 = sphi %s3928_s20, %s5170_s20  }
  0x14   : > { %s42_s27 = sadd.s32 1, %s3870_s23  ;;  %s137_s28 = sadd.s32 1, %s3862_s0 }
  0x15   : > { %p44_p5 = scmp.ge.s32.totalorder %s42_s27, 2  ;;  %p147_p6 = scmp.ne.s32.totalorder %s3862_s0, %s3858_s21 }
  0x16   : > { %p148_p7 = scmp.eq.s32.totalorder %s3154_s25, 1  ;;  %p153_p8 = scmp.ne.s32.totalorder %s3858_s21, %s3854_s20 }
  0x17   : > { %s5176_s27 = smov (%p44_p5, %s42_s27), 0  ;;  %p154_p10 = scmp.eq.s32.totalorder %s3155_s26, 1 }
  0x18   : > { %p3968_p9 = por %p148_p7, %p147_p6  ;;  %s130_s30 = ssub.s32 %s3870_s23, %s5176_s27 }
  0x19   : > { %p3159_p11 = scmp.ge.s32.totalorder %s3874_s24, 1  ;;  %p135_p12 = scmp.eq.s32.totalorder %s130_s30, 0 }
  0x1a   : > { %p3975_p13 = por %p154_p10, %p153_p8  ;;  %p211_p0 = scmp.lt.s32.totalorder %s3874_s24, 3 }
  0x1b   : > { %s3981_s6 = scalar_select %p135_p12, %s3862_s0, %s137_s28  }
  0x1c   : > { %p212_p1 = pnand %p3159_p11, %p211_p0 }
  0x1e   : > { %215 = sbr.rel (%p212_p1) target bundleno = 4664 (0x1238), region = 32 }
  0x23   : > { %v3592_v0 = vld [vmem:[%s5101_s3 + $0x14] ss:$8 sps:$4 sm:$0xff]   ;;  %p258_p2 = scmp.lt.s32.totalorder %s3866_s22, 1  ;;  %v3594_v1 = vld [vmem:[%s5101_s3 + $0x10] ss:$8 sps:$4 sm:$0xff]   ;;  %v3877_v2 = vmov 0   ;;  %v291_v63 = vlaneseq }
  0x24   : > { %412 = vmatprep.mubr.bf16.mxu1 %v3877_v2  ;;  %392 = vmatprep.subr.bf16.mxu1 %v3592_v0  ;;  %v3595_v3 = vld [vmem:[%s5101_s3 + $0x4] ss:$8 sps:$4 sm:$0xff]   ;;  %v3597_v4 = vld [vmem:[%s5101_s3] ss:$8 sps:$4 sm:$0xff]   ;;  %vm306_vm0 = vcmask 261120   ;;  %v5121_v8 = vmov 0.0  }
  0x25   : > { %s259_s15 = scalar_select %p258_p2, %s3866_s22, 1  ;;  %393 = vmatpush1.bf16.msra.mxu1 %v3594_v1  ;;  %3314 = vmatprep.subr.bf16.mxu0 %v5121_v8  ;;  %vm3879_vm1 = vmmov 0   ;;  %v3880_v11 = vmov 1065369472   ;;  %vm425_vm2 = vcmask 572928   ;;  %v292_v0 = vand.u32 127, %v291_v63 }
  0x26   : > { %394 = vmatprep.subr.bf16.mxu1 %v3595_v3  ;;  %3316 = vmatprep.mubr.msk.bf16.mxu0 %vm3879_vm1, %v5121_v8  ;;  %s3881_s30 = smov 96   ;;  %s3882_s7 = smov 32   ;;  %v3600_v26 = vld [vmem:[%s5101_s3 + $0x34] ss:$8 sps:$4 sm:$0xff]   ;;  %v3598_v28 = vld [vmem:[%s5101_s3 + $0x30] ss:$8 sps:$4 sm:$0xff]  }
  0x27   : > { %s3255_s16 = sshll.u32 %s259_s15, 4  ;;  %v3603_v29 = vld [vmem:[%s5101_s3 + $0x24] ss:$8 sps:$4 sm:$0xff]   ;;  %v3601_v31 = vld [vmem:[%s5101_s3 + $0x20] ss:$8 sps:$4 sm:$0xff]   ;;  %s290_s17 = sld [smem:[#allocation3 + %s3866_s22]] }
  0x28   : > { %s4001_s19 = scalar_lea.vmem %s5099_s1, %s3255_s16  ;;  %s4008_s28 = scalar_lea.vmem %s5100_s2, %s3255_s16  ;;  %v296_v1 = vshrl.u32 %v291_v63, 7  ;;  %vm436_vm6 = vcmask 48128   ;;  %vm488_vm7 = vcmask 64512  }
  0x29   : > { %395 = vmatpush1.bf16.msra.mxu1 %v3597_v4  ;;  %v303_v5 = vld [vmem:[%s4001_s19] sm:$0xf]  ;;  %v3181_v32 = vld [vmem:[%s4001_s19 + $0x4] sm:$0xf]  ;;  %s3883_s16 = smov 64   ;;  %v3884_v4 = vmov -inf  }
  0x2a   : > { %v304_v6 = vld [vmem:[%s4008_s28] sm:$0xf]  ;;  %3326 = vmatprep.subr.bf16.mxu1 %v5121_v8  ;;  %v4090_v41 = vld [vmem:[%s4008_s28 + $0x4] sm:$0xf]  ;;  %vm300_vm4 = vcmp.le.s32.totalorder %v292_v0, %v296_v1  ;;  %s3897_s13 = smov [#allocation4]  }
  0x2b   : > { %v305_v7 = vmul.bf16 %v304_v6, %v304_v6  ;;  %v4014_v10 = vsel %vm306_vm0, %v304_v6, 0  ;;  %v4094_v42 = vsel %vm306_vm0, %v4090_v41, 0  ;;  %s3800_s14 = sshll.u32 %s3897_s13, 4  ;;  %s3801_s14 = int_to_ptr.vmem [resolvable:$false] %s3800_s14 }
  0x2c   : > { %3170 = vmatmul.mubr.msk.bf16.vlgmr.msra.gmra.mxu1 %vm306_vm0, %v303_v5  ;;  %s3802_s15 = scalar_lea.vmem %s3801_s14, 1024 }
  0x2d   : > { %v311_v9 = vsel %vm306_vm0, %v305_v7, 0  ;;  %3327 = vmatpush3.bf16.xpose.msra.mxu1 %v4014_v10  ;;  %3328 = vmatprep.mubr.msk.bf16.mxu1 %vm3879_vm1, %v5121_v8  ;;  %v293_v3 = vstv %s290_s17 }
  0x2e   : > { %3315 = vmatpush3.bf16.xpose.msra.mxu0 %v311_v9  ;;  %3338 = vmatprep.subr.bf16.mxu1 %v5121_v8  ;;  %vm294_vm3 = vcmp.lt.s32.totalorder %v292_v0, %v293_v3  ;;  %v988_v0 = vmul.bf16 %v4090_v41, %v4090_v41  ;;  %v3609_v41 = vld [vmem:[%s5101_s3 + $0x44] ss:$8 sps:$4 sm:$0xff]   ;;  %v3204_v3 = vld [vmem:[%s4001_s19 + $0x8] sm:$0xf] }
  0x2f   : > { %3320 = vmatprep.subr.bf16.mxu0 %v5121_v8  ;;  %vm301_vm5 = vmand %vm294_vm3, %vm300_vm4 }
  0x30   : > { %v4126_v5 = vsel %vm301_vm5, 0.0, %v3884_v4 }
  0x35   : > { %3317 = vmatmul.mubr.msk.bf16.vlgmr.msra.gmra.mxu0 %vm306_vm0, %v3880_v11 }
  0x36   : > { %3321 = vmatpush3.bf16.xpose.msra.mxu0 %v4014_v10  ;;  %3322 = vmatprep.mubr.msk.bf16.mxu0 %vm3879_vm1, %v5121_v8 }
  0x37   : > { %3332 = vmatprep.subr.bf16.mxu0 %v5121_v8 }
  0xec   : > { %v414_v12 = vpop.f32.mrf.mxu1 }
  0xed   : > { %3616 = vtanh.f32 %v414_v12 }
  0xee   : > { %v416_v13 = vpop.f32.mrf.mxu1 }
  0xef   : > { %3618 = vtanh.f32 %v416_v13  ;;  %v426_v20 = vsel %vm425_vm2, %v416_v13, -inf }
  0xf0   : > { %v418_v14 = vpop.f32.mrf.mxu1 }
  0xf2   : > { %v419_v15 = vpop.f32.mrf.mxu1 }
  0xf5   : > { %v4055_v21 = vpop.f32.mrf.mxu0 }
  0xf7   : > { %v3318_v22 = vpop.f32.mrf.mxu0 }
  0xf9   : > { %v350_v23 = vpop.f32.mrf.mxu0 }
  0xfa   : > { %v4030_v16 = vpop.eup %3616 }
  0xfb   : > { %v4034_v17 = vpack.c.bf16 %v4030_v16, %v4030_v16  ;;  %v3319_v24 = vpop.f32.mrf.mxu0 }
  0xfc   : > { %v4036_v18 = vpop.eup %3618 }
  0xfd   : > { %508 = vrot.lane.b32.xlu0 %v4034_v17, %s3881_s30  ;;  %3323 = vmatmul.mubr.msk.bf16.vlgmr.msra.gmra.mxu0 %vm306_vm0, %v4034_v17  ;;  %v4044_v19 = vpack.c.bf16 %v4036_v18, %v4036_v18 }
  0xfe   : > { %3333 = vmatpush3.bf16.xpose.msra.mxu0 %v4014_v10  ;;  %3334 = vmatprep.mubr.msk.bf16.mxu0 %vm3879_vm1, %v5121_v8 }
  0xff   : > { %802 = vrot.lane.b32.xlu1 %v4044_v19, %s3881_s30  ;;  %3344 = vmatprep.subr.bf16.mxu0 %v5121_v8 }
 0x101   : > { %665 = vrot.lane.b32.xlu0 %v4034_v17, %s3882_s7 }
 0x123   : > { %427 = vmax.xlane.f32.xlu1 %v426_v20 }
 0x16f   : > { %v509_v25 = vpop.permute.xlu0 %508 }
 0x170   : > { %3329 = vmatmul.mubr.msk.bf16.vlgmr.msra.gmra.mxu1 %vm306_vm0, %v509_v25 }
 0x171   : > { %3339 = vmatpush3.bf16.xpose.msra.mxu1 %v4014_v10  ;;  %3340 = vmatprep.mubr.msk.bf16.mxu1 %vm3879_vm1, %v5121_v8  ;;  %v803_v30 = vpop.permute.xlu1 %802 }
 0x172   : > { %3350 = vmatprep.subr.bf16.mxu1 %v5121_v8 }
 0x173   : > { %v666_v27 = vpop.permute.xlu0 %665 }
 0x178   : > { %3341 = vmatmul.mubr.msk.bf16.vlgmr.msra.gmra.mxu1 %vm306_vm0, %v666_v27 }
 0x179   : > { %3351 = vmatpush3.bf16.xpose.msra.mxu1 %v4014_v10  ;;  %3352 = vmatprep.mubr.msk.bf16.mxu1 %vm3879_vm1, %v5121_v8 }
 0x17a   : > { %1072 = vmatprep.subr.bf16.mxu1 %v3600_v26 }
 0x180   : > { %3353 = vmatmul.mubr.msk.bf16.vlgmr.msra.gmra.mxu1 %vm306_vm0, %v803_v30 }
 0x181   : > { %1073 = vmatpush1.bf16.msra.mxu1 %v3598_v28  ;;  %1092 = vmatprep.mubr.bf16.mxu1 %v3877_v2 }
 0x182   : > { %1074 = vmatprep.subr.bf16.mxu1 %v3603_v29  ;;  %v4156_v29 = vsub.s32 0, %v296_v1  ;;  %v990_v1 = vsel %vm306_vm0, %v988_v0, 0 }
 0x185   : > { %1075 = vmatpush1.bf16.msra.mxu1 %v3601_v31 }
 0x186   : > { %3368 = vmatprep.subr.bf16.mxu1 %v5121_v8 }
 0x188   : > { %3192 = vmatmul.mubr.msk.bf16.vlgmr.msra.gmra.mxu1 %vm306_vm0, %v3181_v32  ;;  %v4162_v32 = vrot.slane %v4055_v21, %v4156_v29 }
 0x189   : > { %3370 = vmatprep.mubr.msk.bf16.mxu1 %vm3879_vm1, %v5121_v8  ;;  %3369 = vmatpush3.bf16.xpose.msra.mxu1 %v4094_v42 }
 0x18a   : > { %3380 = vmatprep.subr.bf16.mxu1 %v5121_v8 }
 0x1ac   : > { %v428_v33 = vpop.xlane.xlu1 %427 }
 0x1ad   : > { %v429_v34 = vsub.f32 %v416_v13, %v428_v33  ;;  %v553_v13 = vmul.f32 %v4030_v16, %v4030_v16 }
 0x1af   : > { %v430_v35 = vmul.f32 1.442695, %v429_v34 }
 0x1b1   : > { %3620 = vpow2.f32 %v430_v35 }
 0x1bd   : > { %v482_v36 = vpop.f32.mrf.mxu0 }
 0x1be   : > { %v4085_v37 = vpop.eup %3620  ;;  %v4129_v7 = vadd.f32 %v482_v36, %v4126_v5 }
 0x1bf   : > { %v3324_v38 = vpop.f32.mrf.mxu0  ;;  %433 = vrot.lane.b32.xlu0 %v4085_v37, %s3883_s16 }
 0x1c0   : > { %v489_v12 = vsel %vm488_vm7, %v4129_v7, -inf }
 0x1c1   : > { %v485_v39 = vpop.f32.mrf.mxu0 }
 0x1c3   : > { %v3325_v40 = vpop.f32.mrf.mxu0 }
 0x230   : > { %v4098_v43 = vpop.f32.mrf.mxu1 }
 0x231   : > { %v434_v6 = vpop.permute.xlu0 %433  ;;  %v566_v35 = vmul.f32 2.0, %v4098_v43 }
 0x232   : > { %v3330_v44 = vpop.f32.mrf.mxu1  ;;  %v437_v9 = vsel %vm436_vm6, %v434_v6, 0.0 }
 0x234   : > { %v550_v45 = vpop.f32.mrf.mxu1 }
 0x236   : > { %v3331_v46 = vpop.f32.mrf.mxu1 }
 0x238   : > { %v4100_v47 = vpop.f32.mrf.mxu1 }
 0x23a   : > { %v3342_v48 = vpop.f32.mrf.mxu1 }
 0x23b   : > { %v4171_v48 = vmul.f32 %v4036_v18, %v4036_v18 }
 0x23c   : > { %v707_v49 = vpop.f32.mrf.mxu1 }
 0x23d   : > { %v773_v43 = vsel %vm306_vm0, %v4171_v48, 0.0 }
 0x23e   : > { %v3343_v50 = vpop.f32.mrf.mxu1 }
 0x240   : > { %v4102_v51 = vpop.f32.mrf.mxu1 }
 0x242   : > { %v3354_v52 = vpop.f32.mrf.mxu1 }
 0x244   : > { %v844_v53 = vpop.f32.mrf.mxu1 }
 0x246   : > { %v3355_v54 = vpop.f32.mrf.mxu1 }
 0x248   : > { %v1094_v55 = vpop.f32.mrf.mxu1 }
 0x249   : > { %3622 = vtanh.f32 %v1094_v55 }
 0x24a   : > { %v4104_v56 = vpop.f32.mrf.mxu1 }
 0x24b   : > { %3624 = vtanh.f32 %v4104_v56 }
 0x24c   : > { %v1098_v57 = vpop.f32.mrf.mxu1 }
 0x24e   : > { %v1099_v58 = vpop.f32.mrf.mxu1 }
 0x256   : > { %v4107_v59 = vpop.eup %3622 }
 0x257   : > { %v4111_v60 = vpack.c.bf16 %v4107_v59, %v4107_v59 }
 0x258   : > { %v4113_v61 = vpop.eup %3624 }
 0x259   : > { %1185 = vrot.lane.b32.xlu0 %v4111_v60, %s3881_s30  ;;  %v4119_v62 = vpack.c.bf16 %v4113_v61, %v4113_v61 }
 0x25b   : > { %1479 = vrot.lane.b32.xlu1 %v4119_v62, %s3881_s30 }
 0x25d   : > { %1342 = vrot.lane.b32.xlu0 %v4111_v60, %s3882_s7 }
 0x27c   : > { %438 = vadd.xlane.f32.xlu0 %v437_v9 }
 0x280   : > { %490 = vmax.xlane.f32.xlu0 %v489_v12 }
 0x296   : > { %555 = vrot.lane.b32.xlu0 %v553_v13, %s3881_s30 }
 0x2cb   : > { %v1186_v14 = vpop.permute.xlu0 %1185 }
 0x2cc   : > { %3371 = vmatmul.mubr.msk.bf16.vlgmr.msra.gmra.mxu1 %vm306_vm0, %v1186_v14 }
 0x2cd   : > { %3381 = vmatpush3.bf16.xpose.msra.mxu1 %v4094_v42  ;;  %3382 = vmatprep.mubr.msk.bf16.mxu1 %vm3879_vm1, %v5121_v8  ;;  %v1480_v16 = vpop.permute.xlu1 %1479 }
 0x2ce   : > { %3392 = vmatprep.subr.bf16.mxu1 %v5121_v8 }
 0x2cf   : > { %v1343_v15 = vpop.permute.xlu0 %1342 }
 0x2d4   : > { %3383 = vmatmul.mubr.msk.bf16.vlgmr.msra.gmra.mxu1 %vm306_vm0, %v1343_v15 }
 0x2d5   : > { %3393 = vmatpush3.bf16.xpose.msra.mxu1 %v4094_v42  ;;  %3394 = vmatprep.mubr.msk.bf16.mxu1 %vm3879_vm1, %v5121_v8 }
 0x2dc   : > { %3395 = vmatmul.mubr.msk.bf16.vlgmr.msra.gmra.mxu1 %vm306_vm0, %v1480_v16  ;;  %v705_v16 = vadd.f32 1.0, %v4100_v47 }
 0x2dd   : > { %1770 = vmatprep.mubr.bf16.mxu1 %v3877_v2 }
 0x305   : > { %v4148_v20 = vpop.xlane.xlu0 %438 }
 0x309   : > { %v4150_v22 = vpop.xlane.xlu0 %490 }
 0x30a   : > { %v492_v4 = vsub.f32 %v4129_v7, %v4150_v22 }
 0x30c   : > { %v493_v9 = vmul.f32 1.442695, %v492_v4 }
 0x30d   : > { %v556_v23 = vpop.permute.xlu0 %555 }
 0x30e   : > { %v558_v24 = vsel %vm306_vm0, %v556_v23, 0.0 }
 0x30f   : > { %559 = vadd.xlane.f32.xlu1 %v558_v24 }
 0x320   : > { %636 = vrot.lane.b32.xlu1 %v553_v13, %s3883_s16 }
 0x38c   : > { %v4154_v25 = vpop.f32.mrf.mxu1 }
 0x38e   : > { %v3372_v26 = vpop.f32.mrf.mxu1 }
 0x390   : > { %v1227_v27 = vpop.f32.mrf.mxu1 }
 0x392   : > { %v3373_v28 = vpop.f32.mrf.mxu1 }
 0x394   : > { %v4158_v30 = vpop.f32.mrf.mxu1 }
 0x396   : > { %v3384_v31 = vpop.f32.mrf.mxu1 }
 0x397   : > { %v710_v31 = vmul.f32 %v705_v16, %v705_v16 }
 0x398   : > { %v560_v33 = vpop.xlane.xlu1 %559  ;;  %v1384_v34 = vpop.f32.mrf.mxu1 }
 0x399   : > { %v565_v36 = vadd.f32 %v4162_v32, %v560_v33  ;;  %v4234_v47 = vadd.f32 %v710_v31, %v4126_v5 }
 0x39a   : > { %v3385_v38 = vpop.f32.mrf.mxu1 }
 0x39b   : > { %v567_v39 = vsub.f32 %v565_v36, %v566_v35 }
 0x39c   : > { %v637_v40 = vpop.permute.xlu1 %636  ;;  %v4166_v44 = vpop.f32.mrf.mxu1 }
 0x39d   : > { %v568_v45 = vmax.f32 %v567_v39, 0.0  ;;  %v639_v46 = vsel %vm306_vm0, %v637_v40, 0.0 }
 0x39e   : > { %640 = vadd.xlane.f32.xlu1 %v639_v46  ;;  %v3396_v21 = vpop.f32.mrf.mxu1 }
 0x39f   : > { %v569_v49 = vadd.f32 1.0, %v568_v45 }
 0x3a0   : > { %v1521_v50 = vpop.f32.mrf.mxu1 }
 0x3a1   : > { %3626 = vlog2.f32 %v569_v49  ;;  %v712_v49 = vsel %vm488_vm7, %v4234_v47, -inf }
 0x3a2   : > { %774 = vadd.xlane.f32.xlu1 %v773_v43  ;;  %v3397_v52 = vpop.f32.mrf.mxu1  ;;  %3628 = vpow2.f32 %v493_v9 }
 0x3ae   : > { %v3627_v53 = vpop.eup %3626 }
 0x3af   : > { %v571_v54 = vmul.f32 0.6931472, %v3627_v53  ;;  %v4238_v50 = vpop.eup %3628 }
 0x3b1   : > { %v572_v55 = vsub.f32 0.0, %v571_v54  ;;  %v495_v54 = vsel %vm488_vm7, %v4238_v50, 0.0 }
 0x3b3   : > { %v4176_v57 = vadd.f32 %v572_v55, %v4126_v5 }
 0x3b5   : > { %v574_v18 = vsel %vm488_vm7, %v4176_v57, -inf }
 0x3b6   : > { %575 = vmax.xlane.f32.xlu0 %v574_v18 }
 0x3cc   : > { %591 = vrot.lane.b32.xlu0 %v4034_v17, %s3883_s16  ;;  %v3606_v17 = vld [vmem:[%s5101_s3 + $0x54] ss:$8 sps:$4 sm:$0xff]  }
 0x3cd   : > { %1750 = vmatprep.subr.bf16.mxu1 %v3606_v17 }
 0x427   : > { %v641_v6 = vpop.xlane.xlu1 %640 }
 0x428   : > { %v642_v13 = vadd.f32 %v641_v6, %v4162_v32 }
 0x42b   : > { %v775_v27 = vpop.xlane.xlu1 %774 }
 0x42c   : > { %v776_v7 = vadd.f32 %v775_v27, %v4162_v32 }
 0x43f   : > { %v4182_v58 = vpop.xlane.xlu0 %575 }
 0x440   : > { %v577_v16 = vsub.f32 %v4176_v57, %v4182_v58 }
 0x443   : > { %v592_v63 = vpop.permute.xlu0 %591 }
 0x444   : > { %3335 = vmatmul.mubr.msk.bf16.vlgmr.msra.gmra.mxu0 %vm306_vm0, %v592_v63 }
 0x445   : > { %3345 = vmatpush3.bf16.xpose.msra.mxu0 %v4014_v10  ;;  %3346 = vmatprep.mubr.msk.bf16.mxu0 %vm3879_vm1, %v5121_v8  ;;  %v3604_v10 = vld [vmem:[%s5101_s3 + $0x50] ss:$8 sps:$4 sm:$0xff]  }
 0x446   : > { %3356 = vmatprep.subr.bf16.mxu0 %v5121_v8  ;;  %1751 = vmatpush1.bf16.msra.mxu1 %v3604_v10 }
 0x447   : > { %1752 = vmatprep.subr.bf16.mxu1 %v3609_v41 }
 0x44c   : > { %3347 = vmatmul.mubr.msk.bf16.vlgmr.msra.gmra.mxu0 %vm306_vm0, %v4044_v19  ;;  %v3607_v19 = vld [vmem:[%s5101_s3 + $0x40] ss:$8 sps:$4 sm:$0xff]  }
 0x44d   : > { %3357 = vmatpush3.bf16.xpose.msra.mxu0 %v990_v1  ;;  %3358 = vmatprep.mubr.msk.bf16.mxu0 %vm3879_vm1, %v5121_v8 }
 0x44e   : > { %3362 = vmatprep.subr.bf16.mxu0 %v5121_v8  ;;  %1753 = vmatpush1.bf16.msra.mxu1 %v3607_v19 }
 0x44f   : > { %3410 = vmatprep.subr.bf16.mxu1 %v5121_v8 }
 0x451   : > { %3215 = vmatmul.mubr.msk.bf16.vlgmr.msra.gmra.mxu1 %vm306_vm0, %v3204_v3  ;;  %v5105_v3 = vmov 66  }
 0x452   : > { %3412 = vmatprep.mubr.msk.bf16.mxu1 %vm3879_vm1, %v5121_v8  ;;  %3576 = vset.pattern.permute.xlu1 %v5105_v3 }
 0x454   : > { %3359 = vmatmul.mubr.msk.bf16.vlgmr.msra.gmra.mxu0 %vm306_vm0, %v3880_v11 }
 0x455   : > { %3363 = vmatpush3.bf16.xpose.msra.mxu0 %v4094_v42  ;;  %3364 = vmatprep.mubr.msk.bf16.mxu0 %vm3879_vm1, %v5121_v8 }
 0x456   : > { %3374 = vmatprep.subr.bf16.mxu0 %v5121_v8 }
 0x45c   : > { %3365 = vmatmul.mubr.msk.bf16.vlgmr.msra.gmra.mxu0 %vm306_vm0, %v4111_v60 }
 0x45d   : > { %3375 = vmatpush3.bf16.xpose.msra.mxu0 %v4094_v42  ;;  %3376 = vmatprep.mubr.msk.bf16.mxu0 %vm3879_vm1, %v5121_v8 }
 0x45e   : > { %3386 = vmatprep.subr.bf16.mxu0 %v5121_v8 }
 0x504   : > { %v630_v12 = vpop.f32.mrf.mxu0 }
 0x505   : > { %v643_v14 = vmul.f32 2.0, %v630_v12 }
 0x506   : > { %v3336_v15 = vpop.f32.mrf.mxu0 }
 0x507   : > { %v644_v23 = vsub.f32 %v642_v13, %v643_v14 }
 0x508   : > { %v633_v24 = vpop.f32.mrf.mxu0 }
 0x509   : > { %v645_v26 = vmax.f32 %v644_v23, 0.0  ;;  %v578_v23 = vmul.f32 1.442695, %v577_v16 }
 0x50a   : > { %v3337_v28 = vpop.f32.mrf.mxu0 }
 0x50b   : > { %v646_v33 = vsub.f32 0.0, %v645_v26 }
 0x50c   : > { %v766_v34 = vpop.f32.mrf.mxu0 }
 0x50d   : > { %v777_v22 = vmul.f32 2.0, %v766_v34  ;;  %v647_v35 = vadd.f32 %v646_v33, %v4126_v5 }
 0x50e   : > { %v3348_v36 = vpop.f32.mrf.mxu0 }
 0x50f   : > { %v778_v38 = vsub.f32 %v776_v7, %v777_v22  ;;  %v648_v39 = vsel %vm488_vm7, %v647_v35, -inf  ;;  %v1105_v7 = vsel %vm425_vm2, %v4104_v56, -inf }
 0x510   : > { %v769_v40 = vpop.f32.mrf.mxu0  ;;  %649 = vmax.xlane.f32.xlu0 %v648_v39  ;;  %v855_v39 = vmul.f32 2.0, %v4102_v51 }
 0x511   : > { %v779_v45 = vmax.f32 %v778_v38, 0.0 }
 0x512   : > { %v3349_v46 = vpop.f32.mrf.mxu0 }
 0x513   : > { %v780_v21 = vmul.f32 -0.5, %v779_v45 }
 0x514   : > { %v4240_v43 = vpop.f32.mrf.mxu0  ;;  %713 = vmax.xlane.f32.xlu0 %v712_v49 }
 0x515   : > { %v781_v52 = vmul.f32 1.442695, %v780_v21 }
 0x516   : > { %v3360_v53 = vpop.f32.mrf.mxu0 }
 0x517   : > { %3630 = vpow2.f32 %v781_v52 }
 0x518   : > { %v1029_v55 = vpop.f32.mrf.mxu0  ;;  %496 = vadd.xlane.f32.xlu0 %v495_v54  ;;  %3632 = vrcp.f32 %v4148_v20  ;;  %v1772_v20 = vpop.f32.mrf.mxu1 }
 0x51a   : > { %v3361_v18 = vpop.f32.mrf.mxu0  ;;  %v4272_v58 = vpop.f32.mrf.mxu1 }
 0x51c   : > { %v1160_v63 = vpop.f32.mrf.mxu0  ;;  %v1776_v28 = vpop.f32.mrf.mxu1 }
 0x51d   : > { %v4281_v34 = vadd.f32 %v1160_v63, %v4126_v5 }
 0x51e   : > { %v3366_v0 = vpop.f32.mrf.mxu0  ;;  %v1777_v33 = vpop.f32.mrf.mxu1 }
 0x51f   : > { %v1166_v22 = vsel %vm488_vm7, %v4281_v34, -inf }
 0x520   : > { %v1163_v1 = vpop.f32.mrf.mxu0 }
 0x521   : > { %v5116_v1 = vmov 683565275  }
 0x522   : > { %v3367_v10 = vpop.f32.mrf.mxu0 }
 0x523   : > { %v5110_v10 = vmov 2475754826  }
 0x524   : > { %v3631_v17 = vpop.eup %3630 }
 0x525   : > { %v4245_v19 = vadd.f32 %v3631_v17, %v4126_v5  ;;  %v3633_v12 = vpop.eup %3632 }
 0x526   : > { %v4257_v13 = vmul.f32 %v3633_v12, %v4085_v37 }
 0x527   : > { %v784_v41 = vsel %vm488_vm7, %v4245_v19, -inf }
 0x528   : > { %785 = vmax.xlane.f32.xlu1 %v784_v41 }
 0x539   : > { %848 = vrot.lane.b32.xlu1 %v4171_v48, %s3881_s30 }
 0x599   : > { %v650_v14 = vpop.xlane.xlu0 %649 }
 0x59a   : > { %v651_v15 = vsub.f32 %v647_v35, %v650_v14  ;;  %v4288_v35 = vld [vmem:[%s4008_s28 + $0x8] sm:$0xf]  ;;  %v5114_v14 = vmov 2102212464  }
 0x59b   : > { %v4292_v36 = vsel %vm306_vm0, %v4288_v35, 0 }
 0x59c   : > { %v652_v48 = vmul.f32 1.442695, %v651_v15  ;;  %3411 = vmatpush3.bf16.xpose.msra.mxu1 %v4292_v36 }
 0x59d   : > { %3422 = vmatprep.subr.bf16.mxu1 %v5121_v8 }
 0x59e   : > { %3634 = vpow2.f32 %v652_v48  ;;  %v5118_v48 = vmov 920167782  }
 0x59f   : > { %3636 = vpow2.f32 %v578_v23 }
 0x5a0   : > { %3638 = vtanh.f32 %v1772_v20 }
 0x5ab   : > { %v4262_v24 = vpop.eup %3634 }
 0x5ac   : > { %v654_v26 = vsel %vm488_vm7, %v4262_v24, 0.0  ;;  %v4266_v27 = vpop.eup %3636 }
 0x5ad   : > { %v580_v37 = vsel %vm488_vm7, %v4266_v27, 0.0  ;;  %v4270_v57 = vpop.eup %3638 }
 0x5ae   : > { %v4276_v31 = vpack.c.bf16 %v4270_v57, %v4270_v57 }
 0x5b1   : > { %v4252_v4 = vpop.xlane.xlu1 %785 }
 0x5b5   : > { %v849_v6 = vpop.permute.xlu1 %848 }
 0x5b6   : > { %v851_v9 = vsel %vm306_vm0, %v849_v6, 0.0  ;;  %v5112_v6 = vmov 2131351028  }
 0x5b7   : > { %852 = vadd.xlane.f32.xlu1 %v851_v9 }
 0x5c8   : > { %660 = vperm.xlu1 %3576, %v4257_v13  }
 0x5ec   : > { %655 = vadd.xlane.f32.xlu1 %v654_v26  ;;  %v5103_v26 = vmov 1326507024  }
 0x5f0   : > { %581 = vadd.xlane.f32.xlu1 %v580_v37 }
 0x601   : > { %1863 = vrot.lane.b32.xlu1 %v4276_v31, %s3881_s30 }
 0x625   : > { %1106 = vmax.xlane.f32.xlu1 %v1105_v7 }
 0x629   : > { %1167 = vmax.xlane.f32.xlu1 %v1166_v22 }
 0x640   : > { %v853_v38 = vpop.xlane.xlu1 %852 }
 0x641   : > { %v854_v40 = vadd.f32 %v853_v38, %v4162_v32 }
 0x643   : > { %v856_v45 = vsub.f32 %v854_v40, %v855_v39 }
 0x645   : > { %v4298_v46 = vmax.f32 %v856_v45, 0.0 }
 0x647   : > { %v861_v21 = vand.u32 2139095040, %v4298_v46  ;;  %v858_v54 = vand.u32 2147483647, %v4298_v46  ;;  %vm860_vm15 = vcmp.lt.s32.totalorder %v4298_v46, 0 }
 0x649   : > { %v862_v49 = vshrl.u32 %v861_v21, 23  ;;  %v865_v0 = vand.u32 8388607, %v858_v54  ;;  %vm859_vm3 = vcmp.le.f32.partialorder %v858_v54, 0.7853982 }
 0x64b   : > { %v3177_v52 = vadd.s32 4294967169, %v862_v49  ;;  %v866_v28 = vor.u32 8388608, %v865_v0 }
 0x64d   : > { %v868_v53 = vadd.s32 1, %v3177_v52 }
 0x64f   : > { %vm869_vm8 = vcmp.gt.s32.totalorder %v868_v53, 0 }
 0x650   : > { %v870_v55 = vsel %vm869_vm8, %v868_v53, 0 }
 0x651   : > { %v872_v18 = vand.u32 31, %v870_v55  ;;  %v871_v51 = vshrl.u32 %v870_v55, 5 }
 0x653   : > { %v873_v63 = vsub.s32 32, %v872_v18  ;;  %v875_v32 = vshll.u32 %v5116_v1, %v872_v18  ;;  %v878_v17 = vshll.u32 %v5110_v10, %v872_v18  ;;  %v881_v12 = vshll.u32 %v5112_v6, %v872_v18 }
 0x654   : > { %v884_v16 = vshll.u32 %v5114_v14, %v872_v18  ;;  %v887_v20 = vshll.u32 %v5118_v48, %v872_v18  ;;  %vm890_vm9 = vcmp.lt.s32.totalorder %v871_v51, 1  ;;  %vm893_vm10 = vcmp.lt.s32.totalorder %v871_v51, 4 }
 0x655   : > { %v876_v41 = vshrl.u32 %v5110_v10, %v873_v63  ;;  %v879_v9 = vshrl.u32 %v5112_v6, %v873_v63  ;;  %v882_v15 = vshrl.u32 %v5114_v14, %v873_v63  ;;  %v885_v23 = vshrl.u32 %v5118_v48, %v873_v63 }
 0x656   : > { %v888_v37 = vshrl.u32 %v5103_v26, %v873_v63  ;;  %v874_v49 = vshrl.u32 %v5116_v1, %v873_v63  ;;  %vm892_vm11 = vcmp.lt.s32.totalorder %v871_v51, 3  ;;  %vm891_vm12 = vcmp.lt.s32.totalorder %v871_v51, 2 }
 0x657   : > { %v877_v33 = vor.u32 %v876_v41, %v875_v32  ;;  %v880_v7 = vor.u32 %v879_v9, %v878_v17  ;;  %v883_v22 = vor.u32 %v882_v15, %v881_v12  ;;  %v886_v38 = vor.u32 %v885_v23, %v884_v16 }
 0x658   : > { %v889_v39 = vor.u32 %v888_v37, %v887_v20  ;;  %v906_v26 = vshll.u32 %v866_v28, 8 }
 0x659   : > { %v895_v40 = vsel %vm893_vm10, %v883_v22, 2102212464  ;;  %v898_v45 = vsel %vm890_vm9, %v877_v33, %v880_v7  ;;  %v902_v21 = vsel %vm890_vm9, %v880_v7, %v883_v22  ;;  %v899_v52 = vsel %vm893_vm10, %v886_v38, 920167782 }
 0x65a   : > { %v903_v53 = vsel %vm893_vm10, %v889_v39, 1326507024  ;;  %v900_v55 = vsel %vm892_vm11, %v883_v22, %v899_v52  ;;  %v894_v0 = vsel %vm890_vm9, %v874_v49, %v877_v33  ;;  %v896_v32 = vsel %vm892_vm11, %v880_v7, %v895_v40  ;;  %v4324_v40 = vpop.permute.xlu1 %660 }
 0x65b   : > { %v904_v18 = vsel %vm892_vm11, %v886_v38, %v903_v53  ;;  %v901_v17 = vsel %vm891_vm12, %v898_v45, %v900_v55  ;;  %v897_v23 = vsel %vm891_vm12, %v894_v0, %v896_v32  ;;  %vm950_vm9 = vweird.f32 %v4298_v46 }
 0x65c   : > { %v905_v41 = vsel %vm891_vm12, %v902_v21, %v904_v18  ;;  %v4318_v15 = vmul.u32.u64.low %v906_v26, %v901_v17  ;;  %v4319_v16 = vmul.u32.u64.high %v906_v26, %v901_v17, %v4318_v15  ;;  %v913_v20 = vmul.u32 %v906_v26, %v897_v23 }
 0x65d   : > { %v4315_v9 = vmul.u32.u64.low %v906_v26, %v905_v41  ;;  %v4316_v12 = vmul.u32.u64.high %v906_v26, %v905_v41, %v4315_v9 }
 0x65e   : > { %v916_v63 = vadd.s32 1, %v4319_v16 }
 0x65f   : > { %vm915_vm13 = vc.u32 %v4316_v12, %v4318_v15  ;;  %v914_v53 = vadd.s32 %v4318_v15, %v4316_v12 }
 0x660   : > { %v917_v51 = vsel %vm915_vm13, %v916_v63, %v4319_v16 }
 0x661   : > { %v918_v37 = vadd.s32 %v917_v51, %v913_v20 }
 0x663   : > { %v919_v28 = vadd.s32 536870912, %v918_v37 }
 0x665   : > { %v920_v33 = vshrl.u32 %v919_v28, 30 }
 0x667   : > { %v921_v7 = vshll.u32 %v920_v33, 30 }
 0x669   : > { %v922_v22 = vsub.s32 %v918_v37, %v921_v7  ;;  %v961_v37 = vsub.f32 0.0, %v4298_v46  ;;  %v714_v7 = vpop.xlane.xlu0 %713 }
 0x66b   : > { %v924_v38 = vsub.s32 0, %v922_v22 }
 0x66d   : > { %v3178_v39 = vmin.u32 %v924_v38, %v922_v22  ;;  %v962_v38 = vmul.f32 1.442695, %v961_v37 }
 0x66f   : > { %v926_v45 = vclz %v3178_v39  ;;  %v715_v39 = vsub.f32 %v4234_v47, %v714_v7 }
 0x671   : > { %v3179_v21 = vadd.s32 4294967294, %v926_v45 }
 0x673   : > { %vm3180_vm14 = vcmp.lt.s32.totalorder %v3179_v21, 0 }
 0x674   : > { %v929_v52 = vsel %vm3180_vm14, 0, %v3179_v21  ;;  %v716_v21 = vmul.f32 1.442695, %v715_v39 }
 0x675   : > { %v4326_v49 = vpop.xlane.xlu1 %655  ;;  %v930_v26 = vsub.s32 32, %v929_v52  ;;  %v934_v55 = vsub.s32 4294967266, %v929_v52  ;;  %v931_v0 = vshll.u32 %v922_v22, %v929_v52  ;;  %v944_v22 = vsub.s32 4, %v920_v33 }
 0x676   : > { %v787_v52 = vsub.f32 %v4245_v19, %v4252_v4 }
 0x677   : > { %v932_v32 = vshrl.u32 %v914_v53, %v930_v26  ;;  %v935_v17 = vadd.s32 127, %v934_v55  ;;  %v945_v45 = vsel %vm860_vm15, %v944_v22, %v920_v33 }
 0x678   : > { %v947_v53 = vsel %vm859_vm3, 0, %v945_v45  ;;  %v788_v26 = vmul.f32 1.442695, %v787_v52 }
 0x679   : > { %v4329_v18 = vpop.xlane.xlu1 %581  ;;  %v933_v41 = vor.u32 %v932_v32, %v931_v0  ;;  %v936_v9 = vshll.u32 %v935_v17, 23  ;;  %v951_v54 = vand.u32 3, %v947_v53 }
 0x67b   : > { %v937_v23 = vor.u32 4788187, %v936_v9  ;;  %v940_v12 = vcvt.s32.f32 %v933_v41  ;;  %vm956_vm4 = vcmp.eq.s32.totalorder %v951_v54, 2  ;;  %vm953_vm5 = vcmp.eq.s32.totalorder %v951_v54, 0 }
 0x67c   : > { %vm952_vm8 = vcmp.lt.s32.totalorder %v951_v54, 2 }
 0x67d   : > { %v1864_v16 = vpop.permute.xlu1 %1863  ;;  %v938_v63 = vand.u32 2147483647, %v937_v23 }
 0x67e   : > { %3413 = vmatmul.mubr.msk.bf16.vlgmr.msra.gmra.mxu1 %vm306_vm0, %v1864_v16 }
 0x67f   : > { %3423 = vmatpush3.bf16.xpose.msra.mxu1 %v4292_v36  ;;  %3424 = vmatprep.mubr.msk.bf16.mxu1 %vm3879_vm1, %v5121_v8  ;;  %v941_v15 = vmul.f32 %v940_v12, %v938_v63 }
 0x680   : > { %3434 = vmatprep.subr.bf16.mxu1 %v5121_v8 }
 0x681   : > { %v942_v20 = vxor.u32 2147483648, %v941_v15 }
 0x683   : > { %v943_v51 = vsel %vm860_vm15, %v942_v20, %v941_v15  ;;  %v4355_v20 = vpop.xlane.xlu0 %496 }
 0x684   : > { %v946_v28 = vsel %vm859_vm3, %v4298_v46, %v943_v51 }
 0x685   : > { %3640 = vcosq.f32 %v946_v28 }
 0x686   : > { %3642 = vsinq.f32 %v946_v28 }
 0x687   : > { %3644 = vpow2.f32 %v962_v38 }
 0x688   : > { %3646 = vpow2.f32 %v716_v21 }
 0x689   : > { %3648 = vpow2.f32 %v788_v26 }
 0x692   : > { %v3641_v55 = vpop.eup %3640 }
 0x693   : > { %v3643_v0 = vpop.eup %3642  ;;  %v957_v32 = vxor.u32 2147483648, %v3641_v55 }
 0x694   : > { %v954_v17 = vxor.u32 2147483648, %v3643_v0  ;;  %v3645_v9 = vpop.eup %3644 }
 0x695   : > { %v958_v41 = vsel %vm956_vm4, %v957_v32, %v3643_v0  ;;  %v4347_v63 = vpop.eup %3646 }
 0x696   : > { %v955_v47 = vsel %vm953_vm5, %v3641_v55, %v954_v17  ;;  %v718_v12 = vsel %vm488_vm7, %v4347_v63, 0.0  ;;  %v4351_v15 = vpop.eup %3648 }
 0x697   : > { %v959_v33 = vsel %vm952_vm8, %v955_v47, %v958_v41  ;;  %5130 = vst [vmem:[#allocation8_spill] sm:$0xff] %v4351_v15  ;;  %v790_v46 = vsel %vm488_vm7, %v4351_v15, 0.0 }
 0x698   : > { %v960_v16 = vsel %vm950_vm9, nan, %v959_v33 }
 0x699   : > { %v964_v19 = vmul.f32 %v3645_v9, %v960_v16  ;;  %v1230_v16 = vmul.f32 %v4107_v59, %v4107_v59 }
 0x69b   : > { %v965_v4 = vadd.f32 %v964_v19, %v4126_v5 }
 0x69d   : > { %v966_v23 = vsel %vm488_vm7, %v965_v4, -inf }
 0x69e   : > { %967 = vmax.xlane.f32.xlu0 %v966_v23 }
 0x6a2   : > { %719 = vadd.xlane.f32.xlu0 %v718_v12 }
 0x6a6   : > { %791 = vadd.xlane.f32.xlu0 %v790_v46 }
 0x6ae   : > { %v1107_v38 = vpop.xlane.xlu1 %1106 }
 0x6af   : > { %v1108_v39 = vsub.f32 %v4104_v56, %v1107_v38 }
 0x6b1   : > { %v1109_v45 = vmul.f32 1.442695, %v1108_v39  ;;  %v4407_v39 = vrot.slane %v4240_v43, %v4156_v29 }
 0x6b2   : > { %v4403_v38 = vpop.xlane.xlu1 %1167 }
 0x727   : > { %v968_v51 = vpop.xlane.xlu0 %967 }
 0x728   : > { %v969_v37 = vsub.f32 %v965_v4, %v968_v51 }
 0x72a   : > { %v970_v28 = vmul.f32 1.442695, %v969_v37 }
 0x72b   : > { %v4379_v0 = vpop.xlane.xlu0 %719 }
 0x72c   : > { %3650 = vpow2.f32 %v970_v28 }
 0x72d   : > { %3652 = vtanh.f32 %v4272_v58 }
 0x72e   : > { %3654 = vpow2.f32 %v1109_v45 }
 0x72f   : > { %v4381_v32 = vpop.xlane.xlu0 %791 }
 0x730   : > { %5132 = vst [vmem:[#allocation10_spill] sm:$0xff] %v4381_v32 }
 0x739   : > { %v4357_v7 = vpop.eup %3650 }
 0x73a   : > { %5131 = vst [vmem:[#allocation9_spill] sm:$0xff] %v4357_v7  ;;  %v972_v22 = vsel %vm488_vm7, %v4357_v7, 0.0  ;;  %v4365_v54 = vpop.eup %3652 }
 0x73b   : > { %973 = vadd.xlane.f32.xlu0 %v972_v22  ;;  %v4371_v55 = vpack.c.bf16 %v4365_v54, %v4365_v54  ;;  %v4375_v56 = vpop.eup %3654 }
 0x73e   : > { %v4363_v21 = vpop.f32.mrf.mxu1 }
 0x740   : > { %v3414_v52 = vpop.f32.mrf.mxu1 }
 0x741   : > { %v1243_v52 = vmul.f32 2.0, %v4154_v25 }
 0x742   : > { %v1905_v53 = vpop.f32.mrf.mxu1 }
 0x744   : > { %v3415_v26 = vpop.f32.mrf.mxu1 }
 0x751   : > { %2020 = vrot.lane.b32.xlu0 %v4276_v31, %s3882_s7 }
 0x755   : > { %2157 = vrot.lane.b32.xlu0 %v4371_v55, %s3881_s30 }
 0x759   : > { %1112 = vrot.lane.b32.xlu0 %v4375_v56, %s3883_s16 }
 0x7c4   : > { %v4383_v17 = vpop.xlane.xlu0 %973 }
 0x7c5   : > { %5133 = vst [vmem:[#allocation11_spill] sm:$0xff] %v4383_v17 }
 0x7c8   : > { %v2021_v41 = vpop.permute.xlu0 %2020 }
 0x7c9   : > { %3425 = vmatmul.mubr.msk.bf16.vlgmr.msra.gmra.mxu1 %vm306_vm0, %v2021_v41 }
 0x7ca   : > { %3435 = vmatpush3.bf16.xpose.msra.mxu1 %v4292_v36  ;;  %3436 = vmatprep.mubr.msk.bf16.mxu1 %vm3879_vm1, %v5121_v8 }
 0x7cc   : > { %v2158_v47 = vpop.permute.xlu0 %2157 }
 0x7d0   : > { %v1113_v33 = vpop.permute.xlu0 %1112 }
 0x7d1   : > { %3437 = vmatmul.mubr.msk.bf16.vlgmr.msra.gmra.mxu1 %vm306_vm0, %v2158_v47  ;;  %v1115_v9 = vsel %vm436_vm6, %v1113_v33, 0.0 }
 0x7d2   : > { %1116 = vadd.xlane.f32.xlu0 %v1115_v9  ;;  %2448 = vmatprep.mubr.bf16.mxu1 %v3877_v2  ;;  %v4414_v9 = vmul.f32 %v4113_v61, %v4113_v61 }
 0x7d4   : > { %v1450_v43 = vsel %vm306_vm0, %v4414_v9, 0.0 }
 0x7e8   : > { %1232 = vrot.lane.b32.xlu0 %v1230_v16, %s3881_s30 }
 0x85b   : > { %v4395_v19 = vpop.xlane.xlu0 %1116 }
 0x85f   : > { %v1233_v4 = vpop.permute.xlu0 %1232 }
 0x860   : > { %v1235_v23 = vsel %vm306_vm0, %v1233_v4, 0.0 }
 0x861   : > { %1236 = vadd.xlane.f32.xlu1 %v1235_v23 }
 0x872   : > { %1313 = vrot.lane.b32.xlu1 %v1230_v16, %s3883_s16 }
 0x889   : > { %v4399_v12 = vpop.f32.mrf.mxu1 }
 0x88b   : > { %v3426_v46 = vpop.f32.mrf.mxu1 }
 0x88d   : > { %v2062_v51 = vpop.f32.mrf.mxu1 }
 0x88f   : > { %v3427_v37 = vpop.f32.mrf.mxu1 }
 0x891   : > { %v4401_v28 = vpop.f32.mrf.mxu1 }
 0x893   : > { %v3438_v2 = vpop.f32.mrf.mxu1 }
 0x894   : > { %v1666_v2 = vmul.bf16 %v4288_v35, %v4288_v35  ;;  %v3613_v35 = vld [vmem:[%s5101_s3 + $0x60] ss:$8 sps:$4 sm:$0xff]  }
 0x895   : > { %v2199_v22 = vpop.f32.mrf.mxu1 }
 0x896   : > { %v1668_v22 = vsel %vm306_vm0, %v1666_v2, 0 }
 0x897   : > { %v3439_v59 = vpop.f32.mrf.mxu1 }
 0x898   : > { %v3227_v59 = vld [vmem:[%s4001_s19 + $0xc] sm:$0xf]  ;;  %s254_s19 = sand.u32 1, %s3858_s21  }
 0x899   : > { %s5053_s12 = scalar_lea.sflag [#allocation5], %s254_s19 }
 0x8ea   : > { %v1237_v45 = vpop.xlane.xlu1 %1236 }
 0x8eb   : > { %v1242_v53 = vadd.f32 %v4407_v39, %v1237_v45 }
 0x8ed   : > { %v1244_v26 = vsub.f32 %v1242_v53, %v1243_v52 }
 0x8ee   : > { %v1314_v41 = vpop.permute.xlu1 %1313 }
 0x8ef   : > { %v1245_v47 = vmax.f32 %v1244_v26, 0.0  ;;  %v1316_v33 = vsel %vm306_vm0, %v1314_v41, 0.0 }
 0x8f0   : > { %1317 = vadd.xlane.f32.xlu1 %v1316_v33 }
 0x8f1   : > { %v1246_v16 = vadd.f32 1.0, %v1245_v47  ;;  %v1382_v47 = vadd.f32 1.0, %v4158_v30 }
 0x8f3   : > { %3656 = vlog2.f32 %v1246_v16 }
 0x8f4   : > { %1451 = vadd.xlane.f32.xlu1 %v1450_v43 }
 0x900   : > { %v3657_v4 = vpop.eup %3656 }
 0x901   : > { %v1248_v25 = vmul.f32 0.6931472, %v3657_v4 }
 0x903   : > { %v1249_v23 = vsub.f32 0.0, %v1248_v25 }
 0x905   : > { %v4419_v46 = vadd.f32 %v1249_v23, %v4126_v5  ;;  %v1387_v23 = vmul.f32 %v1382_v47, %v1382_v47 }
 0x907   : > { %v1251_v51 = vsel %vm488_vm7, %v4419_v46, -inf  ;;  %v4478_v30 = vadd.f32 %v1387_v23, %v4126_v5 }
 0x908   : > { %1252 = vmax.xlane.f32.xlu0 %v1251_v51 }
 0x91e   : > { %1268 = vrot.lane.b32.xlu0 %v4111_v60, %s3883_s16  ;;  %v3612_v60 = vld [vmem:[%s5101_s3 + $0x74] ss:$8 sps:$4 sm:$0xff]  }
 0x91f   : > { %2428 = vmatprep.subr.bf16.mxu1 %v3612_v60 }
 0x979   : > { %v1318_v45 = vpop.xlane.xlu1 %1317 }
 0x97a   : > { %v1319_v53 = vadd.f32 %v1318_v45, %v4407_v39 }
 0x97d   : > { %v1452_v4 = vpop.xlane.xlu1 %1451 }
 0x97e   : > { %v1453_v2 = vadd.f32 %v1452_v4, %v4407_v39 }
 0x991   : > { %v4425_v61 = vpop.xlane.xlu0 %1252 }
 0x995   : > { %v1269_v37 = vpop.permute.xlu0 %1268 }
 0x996   : > { %3377 = vmatmul.mubr.msk.bf16.vlgmr.msra.gmra.mxu0 %vm306_vm0, %v1269_v37 }
 0x997   : > { %3387 = vmatpush3.bf16.xpose.msra.mxu0 %v4094_v42  ;;  %3388 = vmatprep.mubr.msk.bf16.mxu0 %vm3879_vm1, %v5121_v8  ;;  %v3610_v42 = vld [vmem:[%s5101_s3 + $0x70] ss:$8 sps:$4 sm:$0xff]  }
 0x998   : > { %3398 = vmatprep.subr.bf16.mxu0 %v5121_v8  ;;  %2429 = vmatpush1.bf16.msra.mxu1 %v3610_v42 }
 0x99e   : > { %3389 = vmatmul.mubr.msk.bf16.vlgmr.msra.gmra.mxu0 %vm306_vm0, %v4119_v62  ;;  %v3615_v62 = vld [vmem:[%s5101_s3 + $0x64] ss:$8 sps:$4 sm:$0xff]  }
 0x99f   : > { %3399 = vmatpush3.bf16.xpose.msra.mxu0 %v1668_v22  ;;  %3400 = vmatprep.mubr.msk.bf16.mxu0 %vm3879_vm1, %v5121_v8 }
 0x9a0   : > { %3404 = vmatprep.subr.bf16.mxu0 %v5121_v8  ;;  %2430 = vmatprep.subr.bf16.mxu1 %v3615_v62 }
 0x9a1   : > { %2431 = vmatpush1.bf16.msra.mxu1 %v3613_v35 }
 0x9a2   : > { %3452 = vmatprep.subr.bf16.mxu1 %v5121_v8 }
 0x9a4   : > { %3238 = vmatmul.mubr.msk.bf16.vlgmr.msra.gmra.mxu1 %vm306_vm0, %v3227_v59 }
 0x9a5   : > { %3454 = vmatprep.mubr.msk.bf16.mxu1 %vm3879_vm1, %v5121_v8 }
 0x9a6   : > { %3401 = vmatmul.mubr.msk.bf16.vlgmr.msra.gmra.mxu0 %vm306_vm0, %v3880_v11 }
 0x9a7   : > { %3405 = vmatpush3.bf16.xpose.msra.mxu0 %v4292_v36  ;;  %3406 = vmatprep.mubr.msk.bf16.mxu0 %vm3879_vm1, %v5121_v8 }
 0x9a8   : > { %3416 = vmatprep.subr.bf16.mxu0 %v5121_v8 }
 0x9ae   : > { %3407 = vmatmul.mubr.msk.bf16.vlgmr.msra.gmra.mxu0 %vm306_vm0, %v4276_v31 }
 0x9af   : > { %3417 = vmatpush3.bf16.xpose.msra.mxu0 %v4292_v36  ;;  %3418 = vmatprep.mubr.msk.bf16.mxu0 %vm3879_vm1, %v5121_v8 }
 0x9b0   : > { %3428 = vmatprep.subr.bf16.mxu0 %v5121_v8 }
 0xa56   : > { %v1307_v52 = vpop.f32.mrf.mxu0 }
 0xa57   : > { %v1320_v26 = vmul.f32 2.0, %v1307_v52 }
 0xa58   : > { %v3378_v41 = vpop.f32.mrf.mxu0 }
 0xa59   : > { %v1321_v33 = vsub.f32 %v1319_v53, %v1320_v26  ;;  %v1389_v26 = vsel %vm488_vm7, %v4478_v30, -inf }
 0xa5a   : > { %v1310_v16 = vpop.f32.mrf.mxu0 }
 0xa5b   : > { %v1322_v43 = vmax.f32 %v1321_v33, 0.0 }
 0xa5c   : > { %v3379_v25 = vpop.f32.mrf.mxu0 }
 0xa5d   : > { %v1323_v51 = vsub.f32 0.0, %v1322_v43 }
 0xa5e   : > { %v1443_v37 = vpop.f32.mrf.mxu0 }
 0xa5f   : > { %v1454_v22 = vmul.f32 2.0, %v1443_v37  ;;  %v4473_v42 = vadd.f32 %v1323_v51, %v4126_v5 }
 0xa60   : > { %v3390_v60 = vpop.f32.mrf.mxu0 }
 0xa61   : > { %v1455_v62 = vsub.f32 %v1453_v2, %v1454_v22  ;;  %v1325_v35 = vsel %vm488_vm7, %v4473_v42, -inf  ;;  %v5107_v60 = vmov 65  }
 0xa62   : > { %v1446_v59 = vpop.f32.mrf.mxu0  ;;  %1326 = vmax.xlane.f32.xlu0 %v1325_v35  ;;  %3577 = vset.pattern.permute.xlu1 %v5107_v60 }
 0xa63   : > { %v1456_v45 = vmax.f32 %v1455_v62, 0.0 }
 0xa64   : > { %v3391_v52 = vpop.f32.mrf.mxu0 }
 0xa65   : > { %v1457_v53 = vmul.f32 -0.5, %v1456_v45  ;;  %v1169_v45 = vsub.f32 %v4281_v34, %v4403_v38 }
 0xa66   : > { %v4482_v41 = vpop.f32.mrf.mxu0  ;;  %1390 = vmax.xlane.f32.xlu0 %v1389_v26 }
 0xa67   : > { %v1458_v47 = vmul.f32 1.442695, %v1457_v53  ;;  %v1170_v52 = vmul.f32 1.442695, %v1169_v45 }
 0xa68   : > { %v3402_v33 = vpop.f32.mrf.mxu0 }
 0xa69   : > { %3658 = vpow2.f32 %v1458_v47  ;;  %v2450_v33 = vpop.f32.mrf.mxu1 }
 0xa6a   : > { %v1707_v16 = vpop.f32.mrf.mxu0  ;;  %3660 = vpow2.f32 %v1170_v52 }
 0xa6b   : > { %3662 = vrcp.f32 %v4395_v19  ;;  %v3228_v16 = vld [vmem:[%s4008_s28 + $0xc] sm:$0xf]  ;;  %v4515_v34 = vpop.f32.mrf.mxu1  ;;  %s3160_s28 = sshll.u32 %s254_s19, 5 }
 0xa6c   : > { %v3403_v43 = vpop.f32.mrf.mxu0 }
 0xa6d   : > { %v2454_v19 = vpop.f32.mrf.mxu1 }
 0xa6e   : > { %v4484_v4 = vpop.f32.mrf.mxu0 }
 0xa6f   : > { %v2455_v38 = vpop.f32.mrf.mxu1 }
 0xa70   : > { %v3408_v25 = vpop.f32.mrf.mxu0 }
 0xa72   : > { %v1841_v23 = vpop.f32.mrf.mxu0 }
 0xa74   : > { %v3409_v51 = vpop.f32.mrf.mxu0 }
 0xa76   : > { %v3659_v37 = vpop.eup %3658 }
 0xa77   : > { %v4487_v2 = vadd.f32 %v3659_v37, %v4126_v5  ;;  %v4502_v53 = vpop.eup %3660 }
 0xa78   : > { %v3663_v26 = vpop.eup %3662 }
 0xa79   : > { %v1461_v22 = vsel %vm488_vm7, %v4487_v2, -inf  ;;  %v4508_v47 = vmul.f32 %v3663_v26, %v4375_v56  ;;  %v1254_v56 = vsub.f32 %v4419_v46, %v4425_v61  ;;  %v1532_v46 = vmul.f32 2.0, %v4166_v44 }
 0xa7a   : > { %1462 = vmax.xlane.f32.xlu1 %v1461_v22  ;;  %v2344_v44 = vmul.bf16 %v3228_v16, %v3228_v16 }
 0xa7b   : > { %v1255_v43 = vmul.f32 1.442695, %v1254_v56 }
 0xa7c   : > { %v2346_v19 = vsel %vm306_vm0, %v2344_v44, 0  ;;  %v5134_v44 = vmov 1326507024  }
 0xa7d   : > { %3664 = vpow2.f32 %v1255_v43 }
 0xa7e   : > { %3666 = vtanh.f32 %v2450_v33 }
 0xa8a   : > { %v4523_v25 = vpop.eup %3664 }
 0xa8b   : > { %1525 = vrot.lane.b32.xlu1 %v4414_v9, %s3881_s30  ;;  %v1172_v9 = vsel %vm488_vm7, %v4502_v53, 0.0  ;;  %v1257_v23 = vsel %vm488_vm7, %v4523_v25, 0.0  ;;  %v4527_v51 = vpop.eup %3666 }
 0xa8c   : > { %v4531_v37 = vpack.c.bf16 %v4527_v51, %v4527_v51 }
 0xb03   : > { %v4494_v62 = vpop.xlane.xlu1 %1462 }
 0xb07   : > { %v1526_v35 = vpop.permute.xlu1 %1525 }
 0xb08   : > { %v1528_v59 = vsel %vm306_vm0, %v1526_v35, 0.0 }
 0xb09   : > { %1529 = vadd.xlane.f32.xlu1 %v1528_v59 }
 0xb1a   : > { %586 = vperm.xlu1 %3577, %v4257_v13  }
 0xb1e   : > { %1946 = vrot.lane.b32.xlu1 %v4276_v31, %s3883_s16  ;;  %v4513_v31 = vsel %vm306_vm0, %v3228_v16, 0 }
 0xb1f   : > { %3453 = vmatpush3.bf16.xpose.msra.mxu1 %v4513_v31 }
 0xb20   : > { %3464 = vmatprep.subr.bf16.mxu1 %v5121_v8 }
 0xb42   : > { %1173 = vadd.xlane.f32.xlu1 %v1172_v9 }
 0xb53   : > { %1263 = vperm.xlu1 %3577, %v4508_v47  }
 0xb57   : > { %3578 = vset.pattern.permute.xlu1 %v5105_v3 }
 0xb58   : > { %1337 = vperm.xlu1 %3578, %v4508_v47  }
 0xb7c   : > { %1258 = vadd.xlane.f32.xlu1 %v1257_v23 }
 0xb8d   : > { %2541 = vrot.lane.b32.xlu1 %v4531_v37, %s3881_s30 }
 0xb92   : > { %v1530_v22 = vpop.xlane.xlu1 %1529 }
 0xb93   : > { %v1531_v61 = vadd.f32 %v1530_v22, %v4407_v39 }
 0xb95   : > { %v1533_v35 = vsub.f32 %v1531_v61, %v1532_v46 }
 0xb96   : > { %v4537_v59 = vpop.permute.xlu1 %586 }
 0xb97   : > { %v4539_v45 = vmax.f32 %v1533_v35, 0.0 }
 0xb99   : > { %v1538_v52 = vand.u32 2139095040, %v4539_v45  ;;  %v5109_v38 = vand.u32 2147483647, %v4539_v45  ;;  %vm1537_vm4 = vcmp.lt.s32.totalorder %v4539_v45, 0 }
 0xb9a   : > { %v1947_v9 = vpop.permute.xlu1 %1946 }
 0xb9b   : > { %v1539_v26 = vshrl.u32 %v1538_v52, 23  ;;  %3419 = vmatmul.mubr.msk.bf16.vlgmr.msra.gmra.mxu0 %vm306_vm0, %v1947_v9  ;;  %v1542_v16 = vand.u32 8388607, %v5109_v38 }
 0xb9c   : > { %3429 = vmatpush3.bf16.xpose.msra.mxu0 %v4292_v36  ;;  %3430 = vmatprep.mubr.msk.bf16.mxu0 %vm3879_vm1, %v5121_v8 }
 0xb9d   : > { %v3199_v33 = vadd.s32 4294967169, %v1539_v26  ;;  %3440 = vmatprep.subr.bf16.mxu0 %v5121_v8 }
 0xb9f   : > { %v1545_v39 = vadd.s32 1, %v3199_v33 }
 0xba1   : > { %vm1546_vm10 = vcmp.gt.s32.totalorder %v1545_v39, 0 }
 0xba2   : > { %v1547_v56 = vsel %vm1546_vm10, %v1545_v39, 0 }
 0xba3   : > { %v1549_v43 = vand.u32 31, %v1547_v56  ;;  %3431 = vmatmul.mubr.msk.bf16.vlgmr.msra.gmra.mxu0 %vm306_vm0, %v4371_v55  ;;  %v1548_v23 = vshrl.u32 %v1547_v56, 5 }
 0xba4   : > { %3441 = vmatpush3.bf16.xpose.msra.mxu0 %v2346_v19  ;;  %3442 = vmatprep.mubr.msk.bf16.mxu0 %vm3879_vm1, %v5121_v8  ;;  %v1543_v19 = vor.u32 8388608, %v1542_v16 }
 0xba5   : > { %v1550_v36 = vsub.s32 32, %v1549_v43  ;;  %3446 = vmatprep.subr.bf16.mxu0 %v5121_v8  ;;  %v1552_v22 = vshll.u32 %v5116_v1, %v1549_v43  ;;  %v1555_v46 = vshll.u32 %v5110_v10, %v1549_v43  ;;  %v1558_v55 = vshll.u32 %v5112_v6, %v1549_v43 }
 0xba6   : > { %v1561_v9 = vshll.u32 %v5114_v14, %v1549_v43  ;;  %v1564_v33 = vshll.u32 %v5118_v48, %v1549_v43  ;;  %vm1567_vm11 = vcmp.lt.s32.totalorder %v1548_v23, 1  ;;  %vm1570_vm12 = vcmp.lt.s32.totalorder %v1548_v23, 4 }
 0xba7   : > { %v1553_v61 = vshrl.u32 %v5110_v10, %v1550_v36  ;;  %v1556_v35 = vshrl.u32 %v5112_v6, %v1550_v36  ;;  %v1559_v52 = vshrl.u32 %v5114_v14, %v1550_v36  ;;  %v1562_v26 = vshrl.u32 %v5118_v48, %v1550_v36 }
 0xba8   : > { %v1565_v39 = vshrl.u32 %v5134_v44, %v1550_v36  ;;  %v5135_v43 = vmov 683565275   ;;  %vm1569_vm13 = vcmp.lt.s32.totalorder %v1548_v23, 3  ;;  %vm1568_vm14 = vcmp.lt.s32.totalorder %v1548_v23, 2 }
 0xba9   : > { %v1554_v56 = vor.u32 %v1553_v61, %v1552_v22  ;;  %v1557_v3 = vor.u32 %v1556_v35, %v1555_v46  ;;  %v1560_v60 = vor.u32 %v1559_v52, %v1558_v55  ;;  %v1563_v38 = vor.u32 %v1562_v26, %v1561_v9 }
 0xbaa   : > { %v1566_v10 = vor.u32 %v1565_v39, %v1564_v33  ;;  %v1551_v16 = vshrl.u32 %v5135_v43, %v1550_v36  ;;  %v1583_v55 = vshll.u32 %v1543_v19, 8 }
 0xbab   : > { %3443 = vmatmul.mubr.msk.bf16.vlgmr.msra.gmra.mxu0 %vm306_vm0, %v3880_v11  ;;  %v1572_v6 = vsel %vm1570_vm12, %v1560_v60, 2102212464  ;;  %v1575_v14 = vsel %vm1567_vm11, %v1554_v56, %v1557_v3  ;;  %v1579_v1 = vsel %vm1567_vm11, %v1557_v3, %v1560_v60  ;;  %v1576_v22 = vsel %vm1570_vm12, %v1563_v38, 920167782 }
 0xbac   : > { %3447 = vmatpush3.bf16.xpose.msra.mxu0 %v4513_v31  ;;  %3448 = vmatprep.mubr.msk.bf16.mxu0 %vm3879_vm1, %v5121_v8  ;;  %v1580_v46 = vsel %vm1570_vm12, %v1566_v10, 1326507024  ;;  %v1577_v61 = vsel %vm1569_vm13, %v1560_v60, %v1576_v22  ;;  %v1571_v11 = vsel %vm1567_vm11, %v1551_v16, %v1554_v56  ;;  %v1573_v52 = vsel %vm1569_vm13, %v1557_v3, %v1572_v6 }
 0xbad   : > { %v1581_v35 = vsel %vm1569_vm13, %v1563_v38, %v1580_v46  ;;  %3458 = vmatprep.subr.bf16.mxu0 %v5121_v8  ;;  %v1578_v9 = vsel %vm1568_vm14, %v1575_v14, %v1577_v61  ;;  %v4584_v10 = vadd.f32 %v4484_v4, %v4126_v5  ;;  %v1783_v60 = vsel %vm425_vm2, %v4272_v58, -inf }
 0xbae   : > { %v1582_v26 = vsel %vm1568_vm14, %v1579_v1, %v1581_v35  ;;  %v4579_v48 = vmul.u32.u64.low %v1583_v55, %v1578_v9  ;;  %v4580_v7 = vmul.u32.u64.high %v1583_v55, %v1578_v9, %v4579_v48  ;;  %v1574_v38 = vsel %vm1568_vm14, %v1571_v11, %v1573_v52 }
 0xbaf   : > { %v4576_v33 = vmul.u32.u64.low %v1583_v55, %v1582_v26  ;;  %v4577_v39 = vmul.u32.u64.high %v1583_v55, %v1582_v26, %v4576_v33  ;;  %v1844_v1 = vsel %vm488_vm7, %v4584_v10, -inf  ;;  %v1590_v6 = vmul.u32 %v1583_v55, %v1574_v38 }
 0xbb0   : > { %v1593_v3 = vadd.s32 1, %v4580_v7  ;;  %v4601_v46 = vmul.f32 %v4270_v57, %v4270_v57  ;;  %vm1627_vm11 = vweird.f32 %v4539_v45 }
 0xbb1   : > { %1784 = vmax.xlane.f32.xlu1 %v1783_v60  ;;  %vm1592_vm15 = vc.u32 %v4577_v39, %v4579_v48  ;;  %v1591_v55 = vadd.s32 %v4579_v48, %v4577_v39  ;;  %v1638_v39 = vsub.f32 0.0, %v4539_v45 }
 0xbb2   : > { %v1594_v14 = vsel %vm1592_vm15, %v1593_v3, %v4580_v7 }
 0xbb3   : > { %3449 = vmatmul.mubr.msk.bf16.vlgmr.msra.gmra.mxu0 %vm306_vm0, %v4531_v37  ;;  %v1595_v4 = vadd.s32 %v1594_v14, %v1590_v6 }
 0xbb4   : > { %3459 = vmatpush3.bf16.xpose.msra.mxu0 %v4513_v31  ;;  %3460 = vmatprep.mubr.msk.bf16.mxu0 %vm3879_vm1, %v5121_v8 }
 0xbb5   : > { %1845 = vmax.xlane.f32.xlu1 %v1844_v1  ;;  %3470 = vmatprep.subr.bf16.mxu0 %v5121_v8  ;;  %v1596_v36 = vadd.s32 536870912, %v1595_v4 }
 0xbb7   : > { %v1597_v23 = vshrl.u32 %v1596_v36, 30 }
 0xbb9   : > { %v1598_v19 = vshll.u32 %v1597_v23, 30 }
 0xbbb   : > { %v1599_v56 = vsub.s32 %v1595_v4, %v1598_v19  ;;  %v5136_v4 = vand.u32 2147483647, %v4539_v45  ;;  %v1327_v19 = vpop.xlane.xlu0 %1326 }
 0xbbd   : > { %v1601_v16 = vsub.s32 0, %v1599_v56  ;;  %vm4609_vm5 = vcmp.le.f32.partialorder %v5136_v4, 0.7853982 }
 0xbbf   : > { %v3200_v22 = vmin.u32 %v1601_v16, %v1599_v56  ;;  %v1621_v16 = vsub.s32 4, %v1597_v23 }
 0xbc1   : > { %v1603_v61 = vclz %v3200_v22  ;;  %v1639_v22 = vmul.f32 1.442695, %v1638_v39 }
 0xbc3   : > { %v3201_v35 = vadd.s32 4294967294, %v1603_v61  ;;  %v1328_v61 = vsub.f32 %v4473_v42, %v1327_v19 }
 0xbc5   : > { %vm3202_vm3 = vcmp.lt.s32.totalorder %v3201_v35, 0 }
 0xbc6   : > { %1910 = vrot.lane.b32.xlu1 %v4601_v46, %s3881_s30  ;;  %v1606_v7 = vsel %vm3202_vm3, 0, %v3201_v35  ;;  %v1391_v35 = vpop.xlane.xlu0 %1390 }
 0xbc7   : > { %v1607_v11 = vsub.s32 32, %v1606_v7  ;;  %v1611_v52 = vsub.s32 4294967266, %v1606_v7  ;;  %v1608_v9 = vshll.u32 %v1599_v56, %v1606_v7  ;;  %v1622_v7 = vsel %vm1537_vm4, %v1621_v16, %v1597_v23 }
 0xbc9   : > { %v1609_v26 = vshrl.u32 %v1591_v55, %v1607_v11  ;;  %v1612_v33 = vadd.s32 127, %v1611_v52  ;;  %v1329_v55 = vmul.f32 1.442695, %v1328_v61  ;;  %v1392_v11 = vsub.f32 %v4478_v30, %v1391_v35 }
 0xbca   : > { %v1624_v52 = vsel %vm4609_vm5, 0, %v1622_v7 }
 0xbcb   : > { %v1610_v60 = vor.u32 %v1609_v26, %v1608_v9  ;;  %v1613_v38 = vshll.u32 %v1612_v33, 23  ;;  %v1628_v9 = vand.u32 3, %v1624_v52  ;;  %v1393_v26 = vmul.f32 1.442695, %v1392_v11 }
 0xbcc   : > { %v1464_v33 = vsub.f32 %v4487_v2, %v4494_v62 }
 0xbcd   : > { %v1614_v3 = vor.u32 4788187, %v1613_v38  ;;  %v1617_v57 = vcvt.s32.f32 %v1610_v60  ;;  %vm1633_vm8 = vcmp.eq.s32.totalorder %v1628_v9, 2  ;;  %vm1630_vm9 = vcmp.eq.s32.totalorder %v1628_v9, 0 }
 0xbce   : > { %v1465_v42 = vmul.f32 1.442695, %v1464_v33  ;;  %vm1629_vm10 = vcmp.lt.s32.totalorder %v1628_v9, 2 }
 0xbcf   : > { %v1615_v1 = vand.u32 2147483647, %v1614_v3 }
 0xbd1   : > { %v1618_v6 = vmul.f32 %v1617_v57, %v1615_v1 }
 0xbd3   : > { %v1619_v14 = vxor.u32 2147483648, %v1618_v6 }
 0xbd5   : > { %v1620_v48 = vsel %vm1537_vm4, %v1619_v14, %v1618_v6 }
 0xbd6   : > { %v1623_v56 = vsel %vm4609_vm5, %v4539_v45, %v1620_v48  ;;  %v4628_v48 = vpop.xlane.xlu1 %1173 }
 0xbd7   : > { %3668 = vcosq.f32 %v1623_v56 }
 0xbd8   : > { %3670 = vsinq.f32 %v1623_v56 }
 0xbd9   : > { %3672 = vpow2.f32 %v1639_v22 }
 0xbda   : > { %3674 = vpow2.f32 %v1329_v55  ;;  %v4638_v16 = vpop.permute.xlu1 %1263 }
 0xbdb   : > { %3676 = vpow2.f32 %v1393_v26 }
 0xbdc   : > { %3678 = vpow2.f32 %v1465_v42 }
 0xbde   : > { %v4642_v61 = vpop.permute.xlu1 %1337 }
 0xbe4   : > { %v3669_v60 = vpop.eup %3668 }
 0xbe5   : > { %v3671_v38 = vpop.eup %3670  ;;  %v1634_v3 = vxor.u32 2147483648, %v3669_v60 }
 0xbe6   : > { %v1631_v1 = vxor.u32 2147483648, %v3671_v38  ;;  %v3673_v6 = vpop.eup %3672 }
 0xbe7   : > { %v1635_v23 = vsel %vm1633_vm8, %v1634_v3, %v3671_v38  ;;  %v4626_v36 = vpop.eup %3674 }
 0xbe8   : > { %v1632_v30 = vsel %vm1630_vm9, %v3669_v60, %v1631_v1  ;;  %v1331_v39 = vsel %vm488_vm7, %v4626_v36, 0.0  ;;  %v4632_v19 = vpop.eup %3676 }
 0xbe9   : > { %v1636_v57 = vsel %vm1629_vm10, %v1632_v30, %v1635_v23  ;;  %v1395_v45 = vsel %vm488_vm7, %v4632_v19, 0.0  ;;  %v4636_v56 = vpop.eup %3678 }
 0xbea   : > { %v1637_v14 = vsel %vm1627_vm11, nan, %v1636_v57  ;;  %5139 = vst [vmem:[#allocation12_spill] sm:$0xff] %v4636_v56  ;;  %v1467_v22 = vsel %vm488_vm7, %v4636_v56, 0.0 }
 0xbeb   : > { %v1641_v4 = vmul.f32 %v3673_v6, %v1637_v14 }
 0xbed   : > { %v1642_v2 = vadd.f32 %v1641_v4, %v4126_v5 }
 0xbef   : > { %v1643_v62 = vsel %vm488_vm7, %v1642_v2, -inf }
 0xbf0   : > { %1644 = vmax.xlane.f32.xlu0 %v1643_v62 }
 0xbf4   : > { %1332 = vadd.xlane.f32.xlu0 %v1331_v39 }
 0xbf8   : > { %1396 = vadd.xlane.f32.xlu0 %v1395_v45 }
 0xbfc   : > { %1468 = vadd.xlane.f32.xlu0 %v1467_v22 }
 0xc05   : > { %v4644_v35 = vpop.xlane.xlu1 %1258 }
 0xc09   : > { %v2542_v7 = vpop.permute.xlu1 %2541 }
 0xc0a   : > { %3455 = vmatmul.mubr.msk.bf16.vlgmr.msra.gmra.mxu1 %vm306_vm0, %v2542_v7 }
 0xc0b   : > { %3465 = vmatpush3.bf16.xpose.msra.mxu1 %v4513_v31  ;;  %3466 = vmatprep.mubr.msk.bf16.mxu1 %vm3879_vm1, %v5121_v8 }
 0xc0c   : > { %3476 = vmatprep.subr.bf16.mxu1 %v5121_v8 }
 0xc3a   : > { %v1785_v55 = vpop.xlane.xlu1 %1784 }
 0xc3e   : > { %v4651_v11 = vpop.xlane.xlu1 %1845 }
 0xc42   : > { %v1911_v52 = vpop.permute.xlu1 %1910 }
 0xc43   : > { %v1913_v9 = vsel %vm306_vm0, %v1911_v52, 0.0 }
 0xc44   : > { %1914 = vadd.xlane.f32.xlu1 %v1913_v9 }
 0xc5b   : > { %v4654_v26 = vpop.f32.mrf.mxu0 }
 0xc5d   : > { %v3420_v33 = vpop.f32.mrf.mxu0 }
 0xc5f   : > { %v1988_v60 = vpop.f32.mrf.mxu0 }
 0xc60   : > { %v1786_v60 = vsub.f32 %v4272_v58, %v1785_v55 }
 0xc61   : > { %v3421_v38 = vpop.f32.mrf.mxu0 }
 0xc62   : > { %v1787_v38 = vmul.f32 1.442695, %v1786_v60 }
 0xc63   : > { %v4656_v3 = vpop.f32.mrf.mxu0 }
 0xc65   : > { %v3432_v1 = vpop.f32.mrf.mxu0 }
 0xc67   : > { %v2124_v42 = vpop.f32.mrf.mxu0 }
 0xc69   : > { %v3433_v23 = vpop.f32.mrf.mxu0 }
 0xc6b   : > { %v4658_v30 = vpop.f32.mrf.mxu0 }
 0xc6d   : > { %v3444_v57 = vpop.f32.mrf.mxu0 }
 0xc6f   : > { %v2385_v6 = vpop.f32.mrf.mxu0 }
 0xc71   : > { %v3445_v14 = vpop.f32.mrf.mxu0 }
 0xc73   : > { %v4660_v4 = vpop.f32.mrf.mxu0 }
 0xc74   : > { %5140 = vst [vmem:[#allocation13_spill] sm:$0xff] %v4660_v4 }
 0xc75   : > { %v3450_v62 = vpop.f32.mrf.mxu0 }
 0xc77   : > { %v2519_v39 = vpop.f32.mrf.mxu0 }
 0xc79   : > { %v3451_v45 = vpop.f32.mrf.mxu0  ;;  %v1645_v22 = vpop.xlane.xlu0 %1644 }
 0xc7a   : > { %v1646_v7 = vsub.f32 %v1642_v2, %v1645_v22 }
 0xc7c   : > { %v1647_v52 = vmul.f32 1.442695, %v1646_v7 }
 0xc7d   : > { %v4677_v6 = vpop.xlane.xlu0 %1332 }
 0xc7e   : > { %3680 = vpow2.f32 %v1647_v52 }
 0xc7f   : > { %3682 = vpow2.f32 %v1787_v38  ;;  %v1921_v38 = vmul.f32 2.0, %v4363_v21  ;;  %v4708_v21 = vmul.f32 %v4365_v54, %v4365_v54 }
 0xc80   : > { %3684 = vtanh.f32 %v4515_v34 }
 0xc81   : > { %v4679_v14 = vpop.xlane.xlu0 %1396 }
 0xc85   : > { %v4681_v62 = vpop.xlane.xlu0 %1468 }
 0xc86   : > { %5142 = vst [vmem:[#allocation15_spill] sm:$0xff] %v4681_v62 }
 0xc8b   : > { %v4662_v9 = vpop.eup %3680 }
 0xc8c   : > { %5141 = vst [vmem:[#allocation14_spill] sm:$0xff] %v4662_v9  ;;  %v1649_v33 = vsel %vm488_vm7, %v4662_v9, 0.0  ;;  %v4668_v1 = vpop.eup %3682 }
 0xc8d   : > { %1650 = vadd.xlane.f32.xlu0 %v1649_v33  ;;  %v3685_v2 = vpop.eup %3684  ;;  %v4692_v33 = vrot.slane %v4482_v41, %v4156_v29 }
 0xc8e   : > { %v2460_v42 = vpack.c.bf16 %v3685_v2, %v3685_v2 }
 0xca3   : > { %1790 = vrot.lane.b32.xlu0 %v4668_v1, %s3883_s16 }
 0xca7   : > { %2698 = vrot.lane.b32.xlu0 %v4531_v37, %s3882_s7  ;;  %s3257_s7 = sshll.u32 %s3866_s22, 9 }
 0xca8   : > { %s5045_s11 = scalar_lea.hbm %s5102_s4, %s3257_s7 }
 0xcab   : > { %2835 = vrot.lane.b32.xlu0 %v2460_v42, %s3881_s30 }
 0xcca   : > { %v4675_v23 = vpop.f32.mrf.mxu1 }
 0xccc   : > { %v3456_v58 = vpop.f32.mrf.mxu1 }
 0xccd   : > { %v1915_v52 = vpop.xlane.xlu1 %1914 }
 0xcce   : > { %v2583_v55 = vpop.f32.mrf.mxu1  ;;  %v1920_v60 = vadd.f32 %v4692_v33, %v1915_v52 }
 0xcd0   : > { %v3457_v57 = vpop.f32.mrf.mxu1  ;;  %v1922_v55 = vsub.f32 %v1920_v60, %v1921_v38  ;;  %v5123_v60 = vmov 64  }
 0xcd1   : > { %3579 = vset.pattern.permute.xlu1 %v5123_v60 }
 0xcd2   : > { %v1923_v57 = vmax.f32 %v1922_v55, 0.0 }
 0xd16   : > { %v4683_v39 = vpop.xlane.xlu0 %1650 }
 0xd17   : > { %5143 = vst [vmem:[#allocation16_spill] sm:$0xff] %v4683_v39 }
 0xd1a   : > { %v1791_v45 = vpop.permute.xlu0 %1790 }
 0xd1b   : > { %v1793_v22 = vsel %vm436_vm6, %v1791_v45, 0.0  ;;  %v1924_v45 = vadd.f32 1.0, %v1923_v57 }
 0xd1c   : > { %1794 = vadd.xlane.f32.xlu0 %v1793_v22 }
 0xd1d   : > { %3686 = vlog2.f32 %v1924_v45 }
 0xd1e   : > { %v2699_v7 = vpop.permute.xlu0 %2698 }
 0xd1f   : > { %3467 = vmatmul.mubr.msk.bf16.vlgmr.msra.gmra.mxu1 %vm306_vm0, %v2699_v7 }
 0xd20   : > { %3477 = vmatpush3.bf16.xpose.msra.mxu1 %v4513_v31  ;;  %3478 = vmatprep.mubr.msk.bf16.mxu1 %vm3879_vm1, %v5121_v8 }
 0xd22   : > { %v2836_v58 = vpop.permute.xlu0 %2835 }
 0xd27   : > { %3479 = vmatmul.mubr.msk.bf16.vlgmr.msra.gmra.mxu1 %vm306_vm0, %v2836_v58 }
 0xd2a   : > { %v3687_v22 = vpop.eup %3686 }
 0xd2b   : > { %v1926_v7 = vmul.f32 0.6931472, %v3687_v22 }
 0xd2d   : > { %v1927_v8 = vsub.f32 0.0, %v1926_v7 }
 0xd2f   : > { %v4700_v41 = vadd.f32 %v1927_v8, %v4126_v5 }
 0xd31   : > { %v1929_v52 = vsel %vm488_vm7, %v4700_v41, -inf }
 0xd32   : > { %2624 = vrot.lane.b32.xlu0 %v4531_v37, %s3883_s16  ;;  %v4712_v37 = vmul.f32 %v3685_v2, %v3685_v2 }
 0xd51   : > { %1930 = vmax.xlane.f32.xlu0 %v1929_v52 }
 0xd67   : > { %1991 = vrot.lane.b32.xlu0 %v4601_v46, %s3883_s16  ;;  %v5144_v46 = vmov 0.0  }
 0xd6b   : > { %2203 = vrot.lane.b32.xlu0 %v4708_v21, %s3881_s30 }
 0xd6f   : > { %2881 = vrot.lane.b32.xlu0 %v4712_v37, %s3881_s30 }
 0xda5   : > { %v1795_v8 = vpop.xlane.xlu0 %1794 }
 0xda9   : > { %v2625_v38 = vpop.permute.xlu0 %2624 }
 0xdaa   : > { %3461 = vmatmul.mubr.msk.bf16.vlgmr.msra.gmra.mxu0 %vm306_vm0, %v2625_v38 }
 0xdab   : > { %3471 = vmatpush3.bf16.xpose.msra.mxu0 %v4513_v31  ;;  %3472 = vmatprep.mubr.msk.bf16.mxu0 %vm3879_vm1, %v5144_v46 }
 0xdb2   : > { %3473 = vmatmul.mubr.msk.bf16.vlgmr.msra.gmra.mxu0 %vm306_vm0, %v2460_v42 }
 0xdda   : > { %v4722_v54 = vpop.xlane.xlu0 %1930 }
 0xdde   : > { %v1992_v2 = vpop.permute.xlu0 %1991 }
 0xddf   : > { %v4724_v58 = vpop.f32.mrf.mxu1  ;;  %v1994_v55 = vsel %vm306_vm0, %v1992_v2, 0.0  ;;  %v4734_v2 = vmul.f32 %v4527_v51, %v4527_v51  ;;  %v5146_v51 = vmov 65  }
 0xde0   : > { %5145 = vst [vmem:[#allocation17_spill] sm:$0xff] %v4724_v58  ;;  %1995 = vadd.xlane.f32.xlu1 %v1994_v55  ;;  %v1847_v55 = vsub.f32 %v4584_v10, %v4651_v11  ;;  %v5147_v10 = vmov 66   ;;  %v5122_v11 = vmov 67  }
 0xde1   : > { %v3468_v57 = vpop.f32.mrf.mxu1  ;;  %3582 = vset.pattern.permute.xlu0 %v5122_v11 }
 0xde2   : > { %v2204_v45 = vpop.permute.xlu0 %2203  ;;  %v1848_v57 = vmul.f32 1.442695, %v1847_v55 }
 0xde3   : > { %v2740_v22 = vpop.f32.mrf.mxu1  ;;  %v2206_v7 = vsel %vm306_vm0, %v2204_v45, 0.0 }
 0xde4   : > { %2207 = vadd.xlane.f32.xlu1 %v2206_v7  ;;  %3688 = vpow2.f32 %v1848_v57 }
 0xde5   : > { %v3469_v31 = vpop.f32.mrf.mxu1  ;;  %3690 = vrcp.f32 %v1795_v8  ;;  %v1998_v8 = vmul.f32 2.0, %v4654_v26 }
 0xde6   : > { %3692 = vrcp.f32 %v4329_v18 }
 0xde7   : > { %v4728_v52 = vpop.f32.mrf.mxu1  ;;  %3694 = vrcp.f32 %v4355_v20  ;;  %v2210_v20 = vmul.f32 2.0, %v4401_v28 }
 0xde8   : > { %3696 = vrcp.f32 %v4644_v35 }
 0xde9   : > { %v3480_v38 = vpop.f32.mrf.mxu1  ;;  %3698 = vrcp.f32 %v4628_v48 }
 0xdea   : > { %3700 = vrcp.f32 %v4677_v6 }
 0xdeb   : > { %v2877_v46 = vpop.f32.mrf.mxu1 }
 0xded   : > { %v3481_v42 = vpop.f32.mrf.mxu1 }
 0xdf1   : > { %v4740_v45 = vpop.eup %3688 }
 0xdf2   : > { %v1850_v22 = vsel %vm488_vm7, %v4740_v45, 0.0  ;;  %v3691_v7 = vpop.eup %3690 }
 0xdf3   : > { %v4745_v31 = vmul.f32 %v3691_v7, %v4668_v1  ;;  %v3693_v42 = vpop.eup %3692 }
 0xdf4   : > { %v584_v6 = vmul.f32 %v3693_v42, %v4266_v27 }
 0xdf5   : > { %502 = vperm.xlu1 %3579, %v4257_v13  }
 0xdf9   : > { %1179 = vperm.xlu1 %3579, %v4508_v47  }
 0xdfd   : > { %2669 = vrot.lane.b32.xlu1 %v4734_v2, %s3883_s16 }
 0xe21   : > { %1851 = vadd.xlane.f32.xlu1 %v1850_v22  ;;  %v3695_v22 = vpop.eup %3694 }
 0xe22   : > { %v3697_v11 = vpop.eup %3696  ;;  %v499_v58 = vmul.f32 %v3695_v22, %v4238_v50 }
 0xe23   : > { %v3699_v60 = vpop.eup %3698  ;;  %v1261_v27 = vmul.f32 %v3697_v11, %v4523_v25 }
 0xe24   : > { %v3701_v4 = vpop.eup %3700  ;;  %v1176_v42 = vmul.f32 %v3699_v60, %v4502_v53 }
 0xe32   : > { %1857 = vperm.xlu1 %3579, %v4745_v31  }
 0xe36   : > { %3580 = vset.pattern.permute.xlu1 %v5146_v51 }
 0xe37   : > { %1941 = vperm.xlu1 %3580, %v4745_v31  }
 0xe3b   : > { %3581 = vset.pattern.permute.xlu1 %v5147_v10 }
 0xe3c   : > { %2015 = vperm.xlu1 %3581, %v4745_v31  }
 0xe69   : > { %v1996_v1 = vpop.xlane.xlu1 %1995 }
 0xe6a   : > { %v1997_v38 = vadd.f32 %v1996_v1, %v4692_v33  ;;  %v4760_v46 = vpop.f32.mrf.mxu0 }
 0xe6b   : > { %5148 = vst [vmem:[#allocation18_spill] sm:$0xff] %v4760_v46 }
 0xe6c   : > { %v1999_v55 = vsub.f32 %v1997_v38, %v1998_v8  ;;  %v3462_v57 = vpop.f32.mrf.mxu0  ;;  %v589_v8 = vmul.f32 %v4537_v59, %v584_v6 }
 0xe6d   : > { %v2208_v18 = vpop.xlane.xlu1 %2207 }
 0xe6e   : > { %v2000_v7 = vmax.f32 %v1999_v55, 0.0  ;;  %v2209_v35 = vadd.f32 %v2208_v18, %v4692_v33  ;;  %v2666_v48 = vpop.f32.mrf.mxu0 }
 0xe70   : > { %v2001_v26 = vsub.f32 0.0, %v2000_v7  ;;  %v2211_v51 = vsub.f32 %v2209_v35, %v2210_v20  ;;  %v3463_v1 = vpop.f32.mrf.mxu0  ;;  %v1266_v35 = vmul.f32 %v4638_v16, %v1261_v27 }
 0xe71   : > { %v503_v38 = vpop.permute.xlu1 %502 }
 0xe72   : > { %v4767_v57 = vmax.f32 %v2211_v51, 0.0  ;;  %v505_v28 = vmul.f32 %v503_v38, %v499_v58  ;;  %v4769_v55 = vpop.f32.mrf.mxu0  ;;  %v4772_v18 = vadd.f32 %v2001_v26, %v4126_v5  ;;  %v1335_v51 = vmul.f32 %v3701_v4, %v4626_v36 }
 0xe73   : > { %5149 = vst [vmem:[#allocation19_spill] sm:$0xff] %v4769_v55 }
 0xe74   : > { %v2216_v20 = vand.u32 2139095040, %v4767_v57  ;;  %v4777_v7 = vadd.f32 %v589_v8, %v505_v28  ;;  %v3474_v50 = vpop.f32.mrf.mxu0  ;;  %v2003_v59 = vsel %vm488_vm7, %v4772_v18, -inf  ;;  %v1340_v60 = vmul.f32 %v4642_v61, %v1335_v51 }
 0xe75   : > { %2004 = vmax.xlane.f32.xlu0 %v2003_v59  ;;  %v1180_v58 = vpop.permute.xlu1 %1179  ;;  %v5124_v8 = vand.u32 2147483647, %v4767_v57  ;;  %v5151_v61 = vmov 2131351028   ;;  %vm2215_vm5 = vcmp.lt.s32.totalorder %v4767_v57, 0  ;;  %vm2305_vm11 = vweird.f32 %v4767_v57 }
 0xe76   : > { %v2217_v22 = vshrl.u32 %v2216_v20, 23  ;;  %v1182_v48 = vmul.f32 %v1180_v58, %v1176_v42  ;;  %v2802_v6 = vpop.f32.mrf.mxu0  ;;  %v5150_v42 = vmov 2475754826   ;;  %v5152_v58 = vmov 2102212464  }
 0xe77   : > { %v2220_v28 = vand.u32 8388607, %v5124_v8 }
 0xe78   : > { %v3222_v25 = vadd.s32 4294967169, %v2217_v22  ;;  %v1267_v11 = vadd.f32 %v1266_v35, %v1182_v48  ;;  %v3475_v53 = vpop.f32.mrf.mxu0  ;;  %v5153_v48 = vmov 920167782  }
 0xe79   : > { %v2221_v53 = vor.u32 8388608, %v2220_v28 }
 0xe7a   : > { %v2223_v26 = vadd.s32 1, %v3222_v25  ;;  %v4784_v1 = vadd.f32 %v1340_v60, %v1267_v11 }
 0xe7b   : > { %v2261_v32 = vshll.u32 %v2221_v53, 8 }
 0xe7c   : > { %vm2224_vm1 = vcmp.gt.s32.totalorder %v2223_v26, 0 }
 0xe7d   : > { %v2225_v38 = vsel %vm2224_vm1, %v2223_v26, 0 }
 0xe7e   : > { %v2227_v36 = vand.u32 31, %v2225_v38  ;;  %v2226_v16 = vshrl.u32 %v2225_v38, 5 }
 0xe80   : > { %v2228_v4 = vsub.s32 32, %v2227_v36  ;;  %v2230_v27 = vshll.u32 %v5135_v43, %v2227_v36  ;;  %v2233_v20 = vshll.u32 %v5150_v42, %v2227_v36  ;;  %v2236_v51 = vshll.u32 %v5151_v61, %v2227_v36 }
 0xe81   : > { %v2239_v35 = vshll.u32 %v5152_v58, %v2227_v36  ;;  %v2242_v25 = vshll.u32 %v5153_v48, %v2227_v36  ;;  %vm2245_vm12 = vcmp.lt.s32.totalorder %v2226_v16, 1  ;;  %vm2248_vm13 = vcmp.lt.s32.totalorder %v2226_v16, 4 }
 0xe82   : > { %v2231_v50 = vshrl.u32 %v5150_v42, %v2228_v4  ;;  %v2234_v59 = vshrl.u32 %v5151_v61, %v2228_v4  ;;  %v2237_v22 = vshrl.u32 %v5152_v58, %v2228_v4  ;;  %v2240_v6 = vshrl.u32 %v5153_v48, %v2228_v4 }
 0xe83   : > { %v2243_v11 = vshrl.u32 %v5134_v44, %v2228_v4  ;;  %v2229_v15 = vshrl.u32 %v5135_v43, %v2228_v4  ;;  %vm2247_vm14 = vcmp.lt.s32.totalorder %v2226_v16, 3  ;;  %vm2246_vm15 = vcmp.lt.s32.totalorder %v2226_v16, 2 }
 0xe84   : > { %v2232_v60 = vor.u32 %v2231_v50, %v2230_v27  ;;  %v2235_v26 = vor.u32 %v2234_v59, %v2233_v20  ;;  %v2238_v38 = vor.u32 %v2237_v22, %v2236_v51  ;;  %v2241_v8 = vor.u32 %v2240_v6, %v2239_v35 }
 0xe85   : > { %v2244_v46 = vor.u32 %v2243_v11, %v2242_v25  ;;  %v2060_v16 = vadd.f32 1.0, %v4399_v12 }
 0xe86   : > { %v2250_v9 = vsel %vm2248_vm13, %v2238_v38, 2102212464  ;;  %v2253_v56 = vsel %vm2245_vm12, %v2232_v60, %v2235_v26  ;;  %v2257_v55 = vsel %vm2245_vm12, %v2235_v26, %v2238_v38  ;;  %v2254_v39 = vsel %vm2248_vm13, %v2241_v8, 920167782 }
 0xe87   : > { %v2258_v62 = vsel %vm2248_vm13, %v2244_v46, 1326507024  ;;  %v2255_v36 = vsel %vm2247_vm14, %v2238_v38, %v2254_v39  ;;  %v2249_v28 = vsel %vm2245_vm12, %v2229_v15, %v2232_v60  ;;  %v2251_v27 = vsel %vm2247_vm14, %v2235_v26, %v2250_v9 }
 0xe88   : > { %v2259_v17 = vsel %vm2247_vm14, %v2241_v8, %v2258_v62  ;;  %v2256_v20 = vsel %vm2246_vm15, %v2253_v56, %v2255_v36  ;;  %v2252_v4 = vsel %vm2246_vm15, %v2249_v28, %v2251_v27  ;;  %v2065_v11 = vmul.f32 %v2060_v16, %v2060_v16  ;;  %v2670_v36 = vpop.permute.xlu1 %2669 }
 0xe89   : > { %v2260_v50 = vsel %vm2246_vm15, %v2257_v55, %v2259_v17  ;;  %v4803_v22 = vmul.u32.u64.low %v2261_v32, %v2256_v20  ;;  %v4804_v35 = vmul.u32.u64.high %v2261_v32, %v2256_v20, %v4803_v22  ;;  %v2268_v62 = vmul.u32 %v2261_v32, %v2252_v4 }
 0xe8a   : > { %v4800_v59 = vmul.u32.u64.low %v2261_v32, %v2260_v50  ;;  %v4801_v51 = vmul.u32.u64.high %v2261_v32, %v2260_v50, %v4800_v59  ;;  %v4813_v60 = vadd.f32 %v2065_v11, %v4126_v5 }
 0xe8b   : > { %2588 = vrot.lane.b32.xlu0 %v4734_v2, %s3881_s30  ;;  %v2271_v39 = vadd.s32 1, %v4804_v35  ;;  %s4962_s30 = scalar_lea.vmem [#allocation4], %s3160_s28 }
 0xe8c   : > { %vm2270_vm3 = vc.u32 %v4801_v51, %v4803_v22  ;;  %v2269_v32 = vadd.s32 %v4803_v22, %v4801_v51  ;;  %v2067_v12 = vsel %vm488_vm7, %v4813_v60, -inf }
 0xe8d   : > { %v2272_v15 = vsel %vm2270_vm3, %v2271_v39, %v4804_v35  ;;  %v2882_v35 = vpop.permute.xlu0 %2881 }
 0xe8e   : > { %v2273_v9 = vadd.s32 %v2272_v15, %v2268_v62  ;;  %v2884_v62 = vsel %vm306_vm0, %v2882_v35, 0.0 }
 0xe90   : > { %v2274_v56 = vadd.s32 536870912, %v2273_v9 }
 0xe92   : > { %v2275_v17 = vshrl.u32 %v2274_v56, 30 }
 0xe94   : > { %v2276_v46 = vshll.u32 %v2275_v17, 30 }
 0xe96   : > { %v2277_v55 = vsub.s32 %v2273_v9, %v2276_v46  ;;  %v2461_v9 = vsel %vm425_vm2, %v4515_v34, -inf  ;;  %v5154_v46 = vand.u32 2147483647, %v4767_v57 }
 0xe98   : > { %v2279_v8 = vsub.s32 0, %v2277_v55  ;;  %vm2214_vm8 = vcmp.le.f32.partialorder %v5154_v46, 0.7853982  ;;  %v3896_v46 = vmov 68  }
 0xe99   : > { %3584 = vset.pattern.permute.xlu1 %v3896_v46 }
 0xe9a   : > { %v3223_v6 = vmin.u32 %v2279_v8, %v2277_v55  ;;  %v2316_v8 = vsub.f32 0.0, %v4767_v57 }
 0xe9c   : > { %v2281_v25 = vclz %v3223_v6  ;;  %v2299_v6 = vsub.s32 4, %v2275_v17 }
 0xe9e   : > { %v3224_v2 = vadd.s32 4294967294, %v2281_v25  ;;  %v2317_v25 = vmul.f32 1.442695, %v2316_v8 }
 0xea0   : > { %vm3225_vm4 = vcmp.lt.s32.totalorder %v3224_v2, 0 }
 0xea1   : > { %v2284_v53 = vsel %vm3225_vm4, 0, %v3224_v2 }
 0xea2   : > { %v2285_v26 = vsub.s32 32, %v2284_v53  ;;  %v2289_v38 = vsub.s32 4294967266, %v2284_v53  ;;  %v2286_v28 = vshll.u32 %v2277_v55, %v2284_v53 }
 0xea4   : > { %v2287_v27 = vshrl.u32 %v2269_v32, %v2285_v26  ;;  %v2290_v20 = vadd.s32 127, %v2289_v38  ;;  %v2300_v32 = vsel %vm2215_vm5, %v2299_v6, %v2275_v17 }
 0xea5   : > { %v2302_v38 = vsel %vm2214_vm8, 0, %v2300_v32 }
 0xea6   : > { %v2288_v50 = vor.u32 %v2287_v27, %v2286_v28  ;;  %v2291_v59 = vshll.u32 %v2290_v20, 23  ;;  %v2306_v28 = vand.u32 3, %v2302_v38 }
 0xea8   : > { %v2292_v39 = vor.u32 4788187, %v2291_v59  ;;  %v2295_v51 = vcvt.s32.f32 %v2288_v50  ;;  %vm2311_vm2 = vcmp.eq.s32.totalorder %v2306_v28, 2  ;;  %vm2308_vm9 = vcmp.eq.s32.totalorder %v2306_v28, 0 }
 0xea9   : > { %vm2307_vm10 = vcmp.lt.s32.totalorder %v2306_v28, 2 }
 0xeaa   : > { %2068 = vmax.xlane.f32.xlu0 %v2067_v12  ;;  %v1852_v4 = vpop.xlane.xlu1 %1851  ;;  %v2293_v15 = vand.u32 2147483647, %v2292_v39 }
 0xeab   : > { %3702 = vrcp.f32 %v1852_v4 }
 0xeac   : > { %v2296_v22 = vmul.f32 %v2295_v51, %v2293_v15 }
 0xeae   : > { %2885 = vadd.xlane.f32.xlu0 %v2884_v62  ;;  %v2297_v56 = vxor.u32 2147483648, %v2296_v22  ;;  %v1858_v53 = vpop.permute.xlu1 %1857  ;;  %v3895_v62 = vmov 69  }
 0xeb0   : > { %v2298_v55 = vsel %vm2215_vm5, %v2297_v56, %v2296_v22  ;;  %v2806_v56 = vsel %vm306_vm0, %v4712_v37, 0.0  ;;  %v2888_v37 = vmul.f32 2.0, %v4728_v52 }
 0xeb1   : > { %v2301_v16 = vsel %vm2214_vm8, %v4767_v57, %v2298_v55  ;;  %v2672_v57 = vsel %vm306_vm0, %v2670_v36, 0.0  ;;  %v4851_v55 = vrot.slane %v4658_v30, %v4156_v29 }
 0xeb2   : > { %2462 = vmax.xlane.f32.xlu0 %v2461_v9  ;;  %3704 = vcosq.f32 %v2301_v16  ;;  %v2128_v9 = vsel %vm306_vm0, %v4708_v21, 0.0 }
 0xeb3   : > { %3706 = vsinq.f32 %v2301_v16 }
 0xeb4   : > { %3708 = vpow2.f32 %v2317_v25 }
 0xeb5   : > { %3710 = vrcp.f32 %v4326_v49 }
 0xeb6   : > { %3712 = vrcp.f32 %v4379_v0 }
 0xeb7   : > { %3714 = vrcp.f32 %v4679_v14 }
 0xeb8   : > { %v3703_v11 = vpop.eup %3702 }
 0xeb9   : > { %v1854_v2 = vmul.f32 %v3703_v11, %v4740_v45 }
 0xebb   : > { %v4827_v26 = vmul.f32 %v1858_v53, %v1854_v2 }
 0xebf   : > { %v3705_v27 = vpop.eup %3704 }
 0xec0   : > { %v3707_v20 = vpop.eup %3706  ;;  %v2312_v12 = vxor.u32 2147483648, %v3705_v27 }
 0xec1   : > { %v2309_v50 = vxor.u32 2147483648, %v3707_v20  ;;  %v3709_v45 = vpop.eup %3708 }
 0xec2   : > { %v2313_v59 = vsel %vm2311_vm2, %v2312_v12, %v3707_v20  ;;  %v3711_v25 = vpop.eup %3710 }
 0xec3   : > { %v2310_v35 = vsel %vm2308_vm9, %v3705_v27, %v2309_v50  ;;  %v658_v29 = vmul.f32 %v3711_v25, %v4262_v24  ;;  %v3713_v30 = vpop.eup %3712 }
 0xec4   : > { %v2314_v4 = vsel %vm2307_vm10, %v2310_v35, %v2313_v59  ;;  %v3715_v53 = vpop.eup %3714  ;;  %v722_v52 = vmul.f32 %v3713_v30, %v4347_v63 }
 0xec5   : > { %v2315_v17 = vsel %vm2305_vm11, nan, %v2314_v4  ;;  %v663_v32 = vmul.f32 %v4324_v40, %v658_v29  ;;  %v1399_v24 = vmul.f32 %v3715_v53, %v4632_v19 }
 0xec6   : > { %v4831_v39 = vmul.f32 %v3709_v45, %v2315_v17 }
 0xec7   : > { %v664_v20 = vadd.f32 %v663_v32, %v4777_v7 }
 0xec8   : > { %724 = vperm.xlu0 %3582, %v4257_v13  }
 0xecc   : > { %1401 = vperm.xlu0 %3582, %v4508_v47  }
 0xed0   : > { %2079 = vperm.xlu0 %3582, %v4745_v31  }
 0xed4   : > { %3583 = vset.pattern.permute.xlu0 %v3895_v62 }
 0xed5   : > { %978 = vperm.xlu0 %3583, %v4257_v13  }
 0xed9   : > { %1655 = vperm.xlu0 %3583, %v4508_v47  }
 0xef8   : > { %2673 = vadd.xlane.f32.xlu0 %v2672_v57 }
 0xefe   : > { %v4839_v15 = vpop.xlane.xlu0 %2004 }
 0xf02   : > { %v2589_v51 = vpop.permute.xlu0 %2588 }
 0xf03   : > { %v2591_v22 = vsel %vm306_vm0, %v2589_v51, 0.0 }
 0xf04   : > { %2592 = vadd.xlane.f32.xlu1 %v2591_v22 }
 0xf08   : > { %2129 = vadd.xlane.f32.xlu1 %v2128_v9 }
 0xf0c   : > { %2807 = vadd.xlane.f32.xlu1 %v2806_v56 }
 0xf33   : > { %v2069_v36 = vpop.xlane.xlu0 %2068 }
 0xf34   : > { %v2070_v8 = vsub.f32 %v4813_v60, %v2069_v36 }
 0xf36   : > { %v2071_v21 = vmul.f32 1.442695, %v2070_v8 }
 0xf37   : > { %v2886_v16 = vpop.xlane.xlu0 %2885 }
 0xf38   : > { %3716 = vpow2.f32 %v2071_v21  ;;  %v2887_v49 = vadd.f32 %v2886_v16, %v4851_v55 }
 0xf3a   : > { %v2889_v6 = vsub.f32 %v2887_v49, %v2888_v37 }
 0xf3b   : > { %v2463_v2 = vpop.xlane.xlu0 %2462 }
 0xf3c   : > { %v4857_v11 = vmax.f32 %v2889_v6, 0.0  ;;  %v2464_v38 = vsub.f32 %v4515_v34, %v2463_v2 }
 0xf3e   : > { %v2894_v0 = vand.u32 2139095040, %v4857_v11  ;;  %v2891_v40 = vand.u32 2147483647, %v4857_v11  ;;  %v2465_v4 = vmul.f32 1.442695, %v2464_v38  ;;  %vm2893_vm4 = vcmp.lt.s32.totalorder %v4857_v11, 0 }
 0xf3f   : > { %vm2983_vm10 = vweird.f32 %v4857_v11 }
 0xf40   : > { %v2895_v60 = vshrl.u32 %v2894_v0, 23  ;;  %v2898_v19 = vand.u32 8388607, %v2891_v40  ;;  %3718 = vpow2.f32 %v2465_v4  ;;  %vm2892_vm5 = vcmp.le.f32.partialorder %v2891_v40, 0.7853982 }
 0xf42   : > { %v3245_v14 = vadd.s32 4294967169, %v2895_v60  ;;  %v2899_v6 = vor.u32 8388608, %v2898_v19 }
 0xf43   : > { %v725_v28 = vpop.permute.xlu0 %724 }
 0xf44   : > { %v2901_v27 = vadd.s32 1, %v3245_v14  ;;  %v727_v12 = vmul.f32 %v725_v28, %v722_v52 }
 0xf45   : > { %v4865_v50 = vpop.eup %3716 }
 0xf46   : > { %vm2902_vm0 = vcmp.gt.s32.totalorder %v2901_v27, 0  ;;  %v4868_v59 = vadd.f32 %v727_v12, %v664_v20  ;;  %v2073_v35 = vsel %vm488_vm7, %v4865_v50, 0.0 }
 0xf47   : > { %v2903_v63 = vsel %vm2902_vm0, %v2901_v27, 0  ;;  %2074 = vadd.xlane.f32.xlu0 %v2073_v35  ;;  %v1402_v34 = vpop.permute.xlu0 %1401 }
 0xf48   : > { %v2905_v45 = vand.u32 31, %v2903_v63  ;;  %v1404_v17 = vmul.f32 %v1402_v34, %v1399_v24  ;;  %v2904_v51 = vshrl.u32 %v2903_v63, 5 }
 0xf4a   : > { %v2906_v7 = vsub.s32 32, %v2905_v45  ;;  %v4874_v57 = vadd.f32 %v1404_v17, %v4784_v1  ;;  %v2908_v22 = vshll.u32 %v5135_v43, %v2905_v45  ;;  %v2911_v9 = vshll.u32 %v5150_v42, %v2905_v45 }
 0xf4b   : > { %v2914_v8 = vshll.u32 %v5151_v61, %v2905_v45  ;;  %v2917_v1 = vshll.u32 %v5152_v58, %v2905_v45  ;;  %v2920_v37 = vshll.u32 %v5153_v48, %v2905_v45  ;;  %vm2923_vm1 = vcmp.lt.s32.totalorder %v2904_v51, 1 }
 0xf4c   : > { %v2909_v56 = vshrl.u32 %v5150_v42, %v2906_v7  ;;  %v2912_v36 = vshrl.u32 %v5151_v61, %v2906_v7  ;;  %v2915_v21 = vshrl.u32 %v5152_v58, %v2906_v7  ;;  %v2918_v16 = vshrl.u32 %v5153_v48, %v2906_v7 }
 0xf4d   : > { %v2921_v49 = vshrl.u32 %v5134_v44, %v2906_v7  ;;  %vm2926_vm12 = vcmp.lt.s32.totalorder %v2904_v51, 4  ;;  %v2907_v53 = vshrl.u32 %v5135_v43, %v2906_v7  ;;  %vm2925_vm13 = vcmp.lt.s32.totalorder %v2904_v51, 3  ;;  %v4895_v4 = vpop.eup %3718 }
 0xf4e   : > { %v2910_v25 = vor.u32 %v2909_v56, %v2908_v22  ;;  %v2913_v0 = vor.u32 %v2912_v36, %v2911_v9  ;;  %v2916_v29 = vor.u32 %v2915_v21, %v2914_v8  ;;  %v2919_v30 = vor.u32 %v2918_v16, %v2917_v1 }
 0xf4f   : > { %v2922_v42 = vor.u32 %v2921_v49, %v2920_v37  ;;  %vm2924_vm14 = vcmp.lt.s32.totalorder %v2904_v51, 2  ;;  %v2939_v44 = vshll.u32 %v2899_v6, 8  ;;  %v1932_v56 = vsub.f32 %v4700_v41, %v4722_v54 }
 0xf50   : > { %v2928_v2 = vsel %vm2926_vm12, %v2916_v29, 2102212464  ;;  %v2931_v61 = vsel %vm2923_vm1, %v2910_v25, %v2913_v0  ;;  %v2935_v60 = vsel %vm2923_vm1, %v2913_v0, %v2916_v29  ;;  %v2932_v58 = vsel %vm2926_vm12, %v2919_v30, 920167782 }
 0xf51   : > { %v2936_v14 = vsel %vm2926_vm12, %v2922_v42, 1326507024  ;;  %v2933_v48 = vsel %vm2925_vm13, %v2916_v29, %v2932_v58  ;;  %v2927_v52 = vsel %vm2923_vm1, %v2907_v53, %v2910_v25  ;;  %v2929_v38 = vsel %vm2925_vm13, %v2913_v0, %v2928_v2 }
 0xf52   : > { %v2937_v32 = vsel %vm2925_vm13, %v2919_v30, %v2936_v14  ;;  %v2934_v28 = vsel %vm2924_vm14, %v2931_v61, %v2933_v48  ;;  %v2930_v63 = vsel %vm2924_vm14, %v2927_v52, %v2929_v38  ;;  %v1933_v21 = vmul.f32 1.442695, %v1932_v56  ;;  %v4916_v52 = vpop.permute.xlu1 %1941 }
 0xf53   : > { %v2938_v27 = vsel %vm2924_vm14, %v2935_v60, %v2937_v32  ;;  %v4892_v24 = vmul.u32.u64.low %v2939_v44, %v2934_v28  ;;  %v4893_v35 = vmul.u32.u64.high %v2939_v44, %v2934_v28, %v4892_v24  ;;  %v2946_v34 = vmul.u32 %v2939_v44, %v2930_v63 }
 0xf54   : > { %v4889_v20 = vmul.u32.u64.low %v2939_v44, %v2938_v27  ;;  %v4890_v12 = vmul.u32.u64.high %v2939_v44, %v2938_v27, %v4889_v20  ;;  %3720 = vpow2.f32 %v1933_v21  ;;  %v2994_v58 = vsub.f32 0.0, %v4857_v11 }
 0xf55   : > { %v2949_v43 = vadd.s32 1, %v4893_v35  ;;  %v2599_v63 = vmul.f32 2.0, %v4675_v23 }
 0xf56   : > { %vm2948_vm15 = vc.u32 %v4890_v12, %v4892_v24  ;;  %v2947_v37 = vadd.s32 %v4892_v24, %v4890_v12  ;;  %v2995_v44 = vmul.f32 1.442695, %v2994_v58  ;;  %v4918_v27 = vpop.permute.xlu1 %2015 }
 0xf57   : > { %v2950_v45 = vsel %vm2948_vm15, %v2949_v43, %v4893_v35 }
 0xf58   : > { %v2951_v17 = vadd.s32 %v2950_v45, %v2946_v34 }
 0xf5a   : > { %v2952_v7 = vadd.s32 536870912, %v2951_v17 }
 0xf5c   : > { %v2953_v19 = vshrl.u32 %v2952_v7, 30 }
 0xf5d   : > { %2468 = vrot.lane.b32.xlu0 %v4895_v4, %s3883_s16  ;;  %s3035_s16 = sshll.u32 %s4962_s30, 4  ;;  %s5047_s16 = int_to_ptr.vmem [resolvable:$true] %s3035_s16 }
 0xf5e   : > { %v2954_v51 = vshll.u32 %v2953_v19, 30  ;;  %v2977_v32 = vsub.s32 4, %v2953_v19  ;;  %s3796_s22 = scalar_lea.vmem %s5047_s16, 512  ;;  %p3803_p6 = scmp.lt.s32.totalorder %s5047_s16, %s3801_s14 }
 0xf5f   : > { %p3797_p3 = scmp.ne.s32.totalorder %s5047_s16, %s3796_s22  ;;  %p3804_p7 = scmp.lt.s32.totalorder %s3802_s15, %s3796_s22 }
 0xf60   : > { %v2955_v22 = vsub.s32 %v2951_v17, %v2954_v51  ;;  %v2978_v38 = vsel %vm2893_vm4, %v2977_v32, %v2953_v19 }
 0xf61   : > { %2333 = vperm.xlu0 %3583, %v4745_v31   ;;  %v4907_v60 = vpop.eup %3720  ;;  %v2980_v28 = vsel %vm2892_vm5, 0, %v2978_v38  ;;  %p3798_p4 = pnand %p3797_p3, %p3968_p9  ;;  %p3805_p8 = por %p3804_p7, %p3803_p6 }
 0xf62   : > { %v2957_v9 = vsub.s32 0, %v2955_v22  ;;  %v1935_v48 = vsel %vm488_vm7, %v4907_v60, 0.0  ;;  %v2984_v40 = vand.u32 3, %v2980_v28 }
 0xf63   : > { %p3799_p5 = pneg %p3798_p4 }
 0xf64   : > { %v3246_v36 = vmin.u32 %v2957_v9, %v2955_v22  ;;  %vm2989_vm8 = vcmp.eq.s32.totalorder %v2984_v40, 2  ;;  %vm2986_vm2 = vcmp.eq.s32.totalorder %v2984_v40, 0  ;;  %vm2985_vm9 = vcmp.lt.s32.totalorder %v2984_v40, 2  ;;  %v5161_v40 = vld [vmem:[#allocation19_spill] sm:$0xff] }
 0xf65   : > { %3587 = vset.pattern.permute.xlu0 %v5147_v10  ;;  %v2132_v9 = vmul.f32 2.0, %v4656_v3  ;;  %v5155_v3 = vmov 64   ;;  %p3806_p10 = pnand %p3805_p8, %p3799_p5 }
 0xf66   : > { %v2959_v8 = vclz %v3246_v36 }
 0xf68   : > { %v3247_v1 = vadd.s32 4294967294, %v2959_v8 }
 0xf6a   : > { %vm3248_vm3 = vcmp.lt.s32.totalorder %v3247_v1, 0 }
 0xf6b   : > { %v2962_v16 = vsel %vm3248_vm3, 0, %v3247_v1 }
 0xf6c   : > { %v2963_v49 = vsub.s32 32, %v2962_v16  ;;  %v2967_v6 = vsub.s32 4294967266, %v2962_v16  ;;  %v2964_v25 = vshll.u32 %v2955_v22, %v2962_v16 }
 0xf6e   : > { %v2965_v0 = vshrl.u32 %v2947_v37, %v2963_v49  ;;  %v2968_v29 = vadd.s32 127, %v2967_v6 }
 0xf70   : > { %v2966_v30 = vor.u32 %v2965_v0, %v2964_v25  ;;  %v2969_v42 = vshll.u32 %v2968_v29, 23  ;;  %v4937_v25 = vadd.f32 %v4831_v39, %v4126_v5  ;;  %v5159_v29 = vld [vmem:[#allocation16_spill] sm:$0xff]  ;;  %v4949_v39 = vpop.permute.xlu0 %2079 }
 0xf72   : > { %v2970_v10 = vor.u32 4788187, %v2969_v42  ;;  %v2973_v61 = vcvt.s32.f32 %v2966_v30  ;;  %v2321_v0 = vsel %vm488_vm7, %v4937_v25, -inf }
 0xf74   : > { %v2971_v2 = vand.u32 2147483647, %v2970_v10  ;;  %v979_v42 = vpop.permute.xlu0 %978 }
 0xf76   : > { %v2974_v41 = vmul.f32 %v2973_v61, %v2971_v2 }
 0xf78   : > { %v2975_v54 = vxor.u32 2147483648, %v2974_v41 }
 0xf7a   : > { %v2976_v53 = vsel %vm2893_vm4, %v2975_v54, %v2974_v41 }
 0xf7b   : > { %v2979_v14 = vsel %vm2892_vm5, %v4857_v11, %v2976_v53 }
 0xf7c   : > { %3722 = vcosq.f32 %v2979_v14 }
 0xf7d   : > { %3724 = vsinq.f32 %v2979_v14 }
 0xf7e   : > { %3726 = vpow2.f32 %v2995_v44  ;;  %v1656_v44 = vpop.permute.xlu0 %1655 }
 0xf80   : > { %1936 = vadd.xlane.f32.xlu0 %v1935_v48  ;;  %v5160_v48 = vld [vmem:[#allocation8_spill] sm:$0xff] }
 0xf89   : > { %v3723_v20 = vpop.eup %3722 }
 0xf8a   : > { %v3725_v12 = vpop.eup %3724  ;;  %v2990_v35 = vxor.u32 2147483648, %v3723_v20 }
 0xf8b   : > { %v2987_v34 = vxor.u32 2147483648, %v3725_v12  ;;  %v3727_v22 = vpop.eup %3726 }
 0xf8c   : > { %v2991_v45 = vsel %vm2989_vm8, %v2990_v35, %v3725_v12  ;;  %v5162_v12 = vld [vmem:[#allocation9_spill] sm:$0xff] }
 0xf8d   : > { %v2593_v24 = vpop.xlane.xlu1 %2592  ;;  %v2988_v7 = vsel %vm2986_vm2, %v3723_v20, %v2987_v34  ;;  %v2810_v20 = vmul.f32 2.0, %v5161_v40 }
 0xf8e   : > { %v2598_v43 = vadd.f32 %v4851_v55, %v2593_v24  ;;  %v2992_v51 = vsel %vm2985_vm9, %v2988_v7, %v2991_v45 }
 0xf8f   : > { %v2993_v36 = vsel %vm2983_vm10, nan, %v2992_v51 }
 0xf90   : > { %v2600_v17 = vsub.f32 %v2598_v43, %v2599_v63  ;;  %v4925_v23 = vmul.f32 %v3727_v22, %v2993_v36  ;;  %v5163_v63 = vld [vmem:[#allocation12_spill] sm:$0xff]  ;;  %v2674_v22 = vpop.xlane.xlu0 %2673 }
 0xf91   : > { %v2130_v19 = vpop.xlane.xlu1 %2129 }
 0xf92   : > { %v2131_v56 = vadd.f32 %v2130_v19, %v4692_v33  ;;  %v2006_v33 = vsub.f32 %v4772_v18, %v4839_v15  ;;  %v5157_v18 = vld [vmem:[#allocation11_spill] sm:$0xff]  ;;  %v2601_v53 = vmax.f32 %v2600_v17, 0.0  ;;  %v5164_v19 = vld [vmem:[#allocation14_spill] sm:$0xff] }
 0xf93   : > { %v5158_v15 = vld [vmem:[#allocation15_spill] sm:$0xff] }
 0xf94   : > { %v2133_v8 = vsub.f32 %v2131_v56, %v2132_v9  ;;  %v2007_v11 = vmul.f32 1.442695, %v2006_v33  ;;  %v2602_v45 = vadd.f32 1.0, %v2601_v53 }
 0xf95   : > { %v2808_v30 = vpop.xlane.xlu1 %2807 }
 0xf96   : > { %v2134_v21 = vmax.f32 %v2133_v8, 0.0  ;;  %v2809_v58 = vadd.f32 %v2808_v30, %v4851_v55 }
 0xf98   : > { %v2135_v1 = vmul.f32 -0.5, %v2134_v21  ;;  %v2811_v17 = vsub.f32 %v2809_v58, %v2810_v20  ;;  %v2675_v21 = vadd.f32 %v2674_v22, %v4851_v55 }
 0xf9a   : > { %v2136_v16 = vmul.f32 1.442695, %v2135_v1  ;;  %v2812_v1 = vmax.f32 %v2811_v17, 0.0 }
 0xf9c   : > { %3728 = vpow2.f32 %v2136_v16 }
 0xf9d   : > { %3730 = vpow2.f32 %v2007_v11  ;;  %v5166_v11 = vld [vmem:[#allocation13_spill] sm:$0xff] }
 0xfa9   : > { %v3729_v37 = vpop.eup %3728 }
 0xfaa   : > { %v2138_v49 = vadd.f32 %v3729_v37, %v4126_v5 }
 0xfac   : > { %v2139_v6 = vsel %vm488_vm7, %v2138_v49, -inf }
 0xfad   : > { %2140 = vmax.xlane.f32.xlu1 %v2139_v6 }
 0xfbe   : > { %796 = vperm.xlu1 %3584, %v4257_v13   ;;  %v4941_v13 = vpop.eup %3730 }
 0xfc2   : > { %1473 = vperm.xlu1 %3584, %v4508_v47   ;;  %v2009_v47 = vsel %vm488_vm7, %v4941_v13, 0.0 }
 0xfc6   : > { %2151 = vperm.xlu1 %3584, %v4745_v31   ;;  %v5156_v31 = vld [vmem:[#allocation10_spill] sm:$0xff] }
 0xfc7   : > { %3732 = vrcp.f32 %v5156_v31 }
 0xfc8   : > { %3734 = vrcp.f32 %v5157_v18 }
 0xfc9   : > { %3736 = vrcp.f32 %v5158_v15 }
 0xfca   : > { %3585 = vset.pattern.permute.xlu1 %v5155_v3  ;;  %3738 = vrcp.f32 %v5159_v29  ;;  %v2813_v3 = vmul.f32 -0.5, %v2812_v1 }
 0xfcc   : > { %v2814_v31 = vmul.f32 1.442695, %v2813_v3 }
 0xfd0   : > { %v2075_v55 = vpop.xlane.xlu0 %2074 }
 0xfd4   : > { %v3733_v10 = vpop.eup %3732 }
 0xfd5   : > { %v3735_v41 = vpop.eup %3734  ;;  %v794_v32 = vmul.f32 %v3733_v10, %v5160_v48  ;;  %v2469_v10 = vpop.permute.xlu0 %2468 }
 0xfd6   : > { %v3737_v54 = vpop.eup %3736  ;;  %v976_v24 = vmul.f32 %v3735_v41, %v5162_v12 }
 0xfd7   : > { %v3739_v28 = vpop.eup %3738  ;;  %v1471_v43 = vmul.f32 %v3737_v54, %v5163_v63 }
 0xfd8   : > { %v981_v34 = vmul.f32 %v979_v42, %v976_v24  ;;  %v1653_v51 = vmul.f32 %v3739_v28, %v5164_v19 }
 0xfda   : > { %v1658_v8 = vmul.f32 %v1656_v44, %v1653_v51 }
 0xfdc   : > { %v4996_v20 = vpop.permute.xlu0 %2333 }
 0xfea   : > { %2322 = vmax.xlane.f32.xlu1 %v2321_v0  ;;  %v2517_v0 = vadd.f32 %v5166_v11, %v4126_v5 }
 0xfec   : > { %v2522_v30 = vsel %vm488_vm7, %v2517_v0, -inf }
 0xfee   : > { %2010 = vadd.xlane.f32.xlu1 %v2009_v47 }
0x1009   : > { %v1937_v12 = vpop.xlane.xlu0 %1936 }
0x1036   : > { %v2141_v2 = vpop.xlane.xlu1 %2140 }
0x1037   : > { %v2142_v61 = vsub.f32 %v2138_v49, %v2141_v2 }
0x1039   : > { %v2143_v14 = vmul.f32 1.442695, %v2142_v61  ;;  %v2471_v61 = vsel %vm436_vm6, %v2469_v10, 0.0 }
0x103a   : > { %v797_v38 = vpop.permute.xlu1 %796 }
0x103b   : > { %3740 = vpow2.f32 %v2143_v14  ;;  %v799_v35 = vmul.f32 %v797_v38, %v794_v32 }
0x103c   : > { %3742 = vlog2.f32 %v2602_v45 }
0x103d   : > { %v800_v7 = vadd.f32 %v799_v35, %v4868_v59  ;;  %v5165_v59 = vld [vmem:[#allocation18_spill] sm:$0xff]  ;;  %3744 = vpow2.f32 %v2814_v31  ;;  %v5168_v31 = vmov 65  }
0x103e   : > { %v1474_v9 = vpop.permute.xlu1 %1473  ;;  %v2676_v37 = vmul.f32 2.0, %v5165_v59  ;;  %3746 = vrcp.f32 %v1937_v12 }
0x103f   : > { %v982_v56 = vadd.f32 %v981_v34, %v800_v7  ;;  %v1476_v36 = vmul.f32 %v1474_v9, %v1471_v43  ;;  %3748 = vrcp.f32 %v2075_v55 }
0x1040   : > { %v2677_v6 = vsub.f32 %v2675_v21, %v2676_v37 }
0x1041   : > { %983 = vst.msk [vmem:[%s4962_s30] sm:$0xff] %vm488_vm7, %v982_v56  ;;  %v1477_v16 = vadd.f32 %v1476_v36, %v4874_v57  ;;  %v5167_v57 = vld [vmem:[#allocation17_spill] sm:$0xff] }
0x1042   : > { %v2678_v47 = vmax.f32 %v2677_v6, 0.0  ;;  %v2738_v15 = vadd.f32 1.0, %v5167_v57  ;;  %v4998_v24 = vpop.permute.xlu1 %2151 }
0x1043   : > { %v1659_v49 = vadd.f32 %v1658_v8, %v1477_v16 }
0x1044   : > { %v2679_v29 = vsub.f32 0.0, %v2678_v47  ;;  %v2743_v2 = vmul.f32 %v2738_v15, %v2738_v15 }
0x1045   : > { %3203 = vst.msk [vmem:[%s4962_s30 + $0x8] sm:$0xff] %vm488_vm7, %v1659_v49 }
0x1046   : > { %v2680_v41 = vadd.f32 %v2679_v29, %v4126_v5  ;;  %v4981_v53 = vadd.f32 %v2743_v2, %v4126_v5 }
0x1048   : > { %v4970_v33 = vpop.eup %3740  ;;  %v2681_v58 = vsel %vm488_vm7, %v2680_v41, -inf  ;;  %v2745_v48 = vsel %vm488_vm7, %v4981_v53, -inf }
0x1049   : > { %v2145_v18 = vsel %vm488_vm7, %v4970_v33, 0.0  ;;  %v3743_v42 = vpop.eup %3742 }
0x104a   : > { %2146 = vadd.xlane.f32.xlu1 %v2145_v18  ;;  %v2604_v54 = vmul.f32 0.6931472, %v3743_v42  ;;  %v3745_v44 = vpop.eup %3744 }
0x104b   : > { %v4992_v28 = vadd.f32 %v3745_v44, %v4126_v5  ;;  %v3747_v45 = vpop.eup %3746 }
0x104c   : > { %v2605_v14 = vsub.f32 0.0, %v2604_v54  ;;  %v1939_v17 = vmul.f32 %v3747_v45, %v4907_v60  ;;  %v3749_v7 = vpop.eup %3748 }
0x104d   : > { %v2817_v40 = vsel %vm488_vm7, %v4992_v28, -inf  ;;  %v2077_v56 = vmul.f32 %v3749_v7, %v4865_v50 }
0x104e   : > { %2523 = vmax.xlane.f32.xlu1 %v2522_v30  ;;  %v4987_v32 = vadd.f32 %v2605_v14, %v4126_v5  ;;  %v1944_v51 = vmul.f32 %v4916_v52, %v1939_v17 }
0x104f   : > { %v2082_v21 = vmul.f32 %v4949_v39, %v2077_v56 }
0x1050   : > { %v2607_v38 = vsel %vm488_vm7, %v4987_v32, -inf }
0x1052   : > { %2472 = vadd.xlane.f32.xlu1 %v2471_v61 }
0x1056   : > { %2682 = vmax.xlane.f32.xlu1 %v2681_v58 }
0x105a   : > { %2746 = vmax.xlane.f32.xlu1 %v2745_v48 }
0x105e   : > { %2608 = vmax.xlane.f32.xlu1 %v2607_v38 }
0x1062   : > { %2818 = vmax.xlane.f32.xlu1 %v2817_v40 }
0x1073   : > { %v2323_v35 = vpop.xlane.xlu1 %2322 }
0x1074   : > { %v2324_v63 = vsub.f32 %v4937_v25, %v2323_v35  ;;  %v1945_v25 = vadd.f32 %v1944_v51, %v4827_v26 }
0x1076   : > { %v2325_v43 = vmul.f32 1.442695, %v2324_v63 }
0x1077   : > { %v2011_v34 = vpop.xlane.xlu1 %2010 }
0x1078   : > { %3750 = vpow2.f32 %v2325_v43 }
0x1079   : > { %3752 = vrcp.f32 %v2011_v34 }
0x1085   : > { %v3751_v19 = vpop.eup %3750 }
0x1086   : > { %v3753_v22 = vpop.eup %3752  ;;  %v2327_v9 = vsel %vm488_vm7, %v3751_v19, 0.0 }
0x1087   : > { %v2013_v36 = vmul.f32 %v3753_v22, %v4941_v13  ;;  %2328 = vadd.xlane.f32.xlu0 %v2327_v9 }
0x1089   : > { %v2018_v8 = vmul.f32 %v4918_v27, %v2013_v36  ;;  %v2998_v27 = vadd.f32 %v4925_v23, %v4126_v5  ;;  %v5169_v5 = vmov 67  }
0x108b   : > { %v2019_v1 = vadd.f32 %v2018_v8, %v1945_v25  ;;  %v2999_v39 = vsel %vm488_vm7, %v2998_v27, -inf }
0x108d   : > { %v2083_v60 = vadd.f32 %v2082_v21, %v2019_v1 }
0x10d3   : > { %v2147_v16 = vpop.xlane.xlu1 %2146 }
0x10d7   : > { %v2524_v59 = vpop.xlane.xlu1 %2523 }
0x10d8   : > { %v2525_v37 = vsub.f32 %v2517_v0, %v2524_v59 }
0x10da   : > { %v2526_v52 = vmul.f32 1.442695, %v2525_v37 }
0x10db   : > { %v2473_v49 = vpop.xlane.xlu1 %2472 }
0x10dc   : > { %3754 = vpow2.f32 %v2526_v52 }
0x10df   : > { %v2683_v6 = vpop.xlane.xlu1 %2682 }
0x10e0   : > { %v2684_v3 = vsub.f32 %v2680_v41, %v2683_v6 }
0x10e2   : > { %v2685_v50 = vmul.f32 1.442695, %v2684_v3 }
0x10e3   : > { %v2747_v18 = vpop.xlane.xlu1 %2746 }
0x10e4   : > { %3756 = vpow2.f32 %v2685_v50  ;;  %v2748_v29 = vsub.f32 %v4981_v53, %v2747_v18 }
0x10e5   : > { %3758 = vrcp.f32 %v2473_v49 }
0x10e6   : > { %3760 = vrcp.f32 %v2147_v16  ;;  %v2749_v10 = vmul.f32 1.442695, %v2748_v29 }
0x10e7   : > { %v2609_v15 = vpop.xlane.xlu1 %2608 }
0x10e8   : > { %v2610_v2 = vsub.f32 %v4987_v32, %v2609_v15 }
0x10e9   : > { %v5009_v13 = vpop.eup %3754 }
0x10ea   : > { %v2528_v26 = vsel %vm488_vm7, %v5009_v13, 0.0 }
0x10eb   : > { %2529 = vadd.xlane.f32.xlu1 %v2528_v26 }
0x10ef   : > { %3000 = vmax.xlane.f32.xlu1 %v2999_v39 }
0x10f1   : > { %v5016_v55 = vpop.eup %3756 }
0x10f2   : > { %v2687_v11 = vsel %vm488_vm7, %v5016_v55, 0.0  ;;  %v3759_v0 = vpop.eup %3758 }
0x10f3   : > { %2688 = vadd.xlane.f32.xlu0 %v2687_v11  ;;  %v2475_v47 = vmul.f32 %v3759_v0, %v4895_v4  ;;  %v3761_v4 = vpop.eup %3760 }
0x10f4   : > { %v2149_v57 = vmul.f32 %v3761_v4, %v4970_v33 }
0x10f6   : > { %v2154_v30 = vmul.f32 %v4998_v24, %v2149_v57 }
0x10f8   : > { %v2155_v41 = vadd.f32 %v2154_v30, %v2083_v60 }
0x1100   : > { %2535 = vperm.xlu1 %3585, %v2475_v47  }
0x1104   : > { %3586 = vset.pattern.permute.xlu1 %v5168_v31 }
0x1105   : > { %2619 = vperm.xlu1 %3586, %v2475_v47  }
0x1109   : > { %2693 = vperm.xlu0 %3587, %v2475_v47   ;;  %3588 = vset.pattern.permute.xlu1 %v5169_v5 }
0x110a   : > { %2757 = vperm.xlu1 %3588, %v2475_v47  }
0x110d   : > { %3591 = vset.pattern.permute.xlu0 %v3895_v62 }
0x110e   : > { %3589 = vset.pattern.permute.xlu1 %v3896_v46  ;;  %v2819_v46 = vpop.xlane.xlu1 %2818 }
0x110f   : > { %2829 = vperm.xlu1 %3589, %v2475_v47   ;;  %v2820_v58 = vsub.f32 %v4992_v28, %v2819_v46 }
0x1110   : > { %v2329_v23 = vpop.xlane.xlu0 %2328 }
0x1111   : > { %3762 = vrcp.f32 %v2329_v23  ;;  %v2821_v33 = vmul.f32 1.442695, %v2820_v58 }
0x1112   : > { %3764 = vpow2.f32 %v2749_v10 }
0x1113   : > { %3590 = vset.pattern.permute.xlu1 %v3895_v62  ;;  %v2611_v62 = vmul.f32 1.442695, %v2610_v2 }
0x1115   : > { %3766 = vpow2.f32 %v2611_v62 }
0x1116   : > { %3768 = vpow2.f32 %v2821_v33 }
0x111e   : > { %v3763_v42 = vpop.eup %3762 }
0x111f   : > { %v2331_v61 = vmul.f32 %v3763_v42, %v3751_v19  ;;  %v3765_v53 = vpop.eup %3764 }
0x1120   : > { %v2751_v48 = vsel %vm488_vm7, %v3765_v53, 0.0 }
0x1121   : > { %v2336_v54 = vmul.f32 %v4996_v20, %v2331_v61 }
0x1122   : > { %v3767_v44 = vpop.eup %3766 }
0x1123   : > { %v2337_v14 = vadd.f32 %v2336_v54, %v2155_v41  ;;  %v2613_v32 = vsel %vm488_vm7, %v3767_v44, 0.0  ;;  %v3769_v38 = vpop.eup %3768 }
0x1124   : > { %v2823_v40 = vsel %vm488_vm7, %v3769_v38, 0.0 }
0x1125   : > { %3226 = vst.msk [vmem:[%s4962_s30 + $0x10] sm:$0xff] %vm488_vm7, %v2337_v14 }
0x1133   : > { %2752 = vadd.xlane.f32.xlu1 %v2751_v48 }
0x1137   : > { %2614 = vadd.xlane.f32.xlu1 %v2613_v32 }
0x113b   : > { %2824 = vadd.xlane.f32.xlu1 %v2823_v40 }
0x1174   : > { %v2530_v20 = vpop.xlane.xlu1 %2529 }
0x1178   : > { %v3001_v28 = vpop.xlane.xlu1 %3000 }
0x1179   : > { %v3002_v12 = vsub.f32 %v2998_v27, %v3001_v28 }
0x117b   : > { %v3003_v24 = vmul.f32 1.442695, %v3002_v12 }
0x117c   : > { %v2536_v43 = vpop.permute.xlu1 %2535  ;;  %v2689_v51 = vpop.xlane.xlu0 %2688 }
0x117d   : > { %3770 = vpow2.f32 %v3003_v24 }
0x1180   : > { %v2620_v34 = vpop.permute.xlu1 %2619 }
0x1184   : > { %v2694_v52 = vpop.permute.xlu0 %2693 }
0x1185   : > { %v2758_v45 = vpop.permute.xlu1 %2757 }
0x118a   : > { %v3771_v35 = vpop.eup %3770  ;;  %v2830_v17 = vpop.permute.xlu1 %2829 }
0x118b   : > { %v3005_v63 = vsel %vm488_vm7, %v3771_v35, 0.0 }
0x118c   : > { %3006 = vadd.xlane.f32.xlu1 %v3005_v63 }
0x119d   : > { %3011 = vperm.xlu1 %3590, %v2475_v47  }
0x11bc   : > { %v2753_v7 = vpop.xlane.xlu1 %2752 }
0x11c0   : > { %v2615_v19 = vpop.xlane.xlu1 %2614 }
0x11c1   : > { %3772 = vrcp.f32 %v2615_v19 }
0x11c2   : > { %3774 = vrcp.f32 %v2530_v20 }
0x11c3   : > { %3776 = vrcp.f32 %v2689_v51 }
0x11c4   : > { %3778 = vrcp.f32 %v2753_v7  ;;  %v2825_v22 = vpop.xlane.xlu1 %2824 }
0x11c5   : > { %3780 = vrcp.f32 %v2825_v22 }
0x11ce   : > { %v3773_v9 = vpop.eup %3772 }
0x11cf   : > { %v3775_v56 = vpop.eup %3774  ;;  %v2617_v36 = vmul.f32 %v3773_v9, %v3767_v44 }
0x11d0   : > { %v2532_v25 = vmul.f32 %v3775_v56, %v5009_v13  ;;  %v3777_v8 = vpop.eup %3776 }
0x11d1   : > { %v2622_v1 = vmul.f32 %v2620_v34, %v2617_v36  ;;  %v2691_v16 = vmul.f32 %v3777_v8, %v5016_v55  ;;  %v3779_v59 = vpop.eup %3778 }
0x11d2   : > { %v2538_v60 = vmul.f32 %v2536_v43, %v2532_v25  ;;  %v2755_v6 = vmul.f32 %v3779_v59, %v3765_v53  ;;  %v3781_v3 = vpop.eup %3780 }
0x11d3   : > { %v2696_v49 = vmul.f32 %v2694_v52, %v2691_v16  ;;  %v2827_v13 = vmul.f32 %v3781_v3, %v3769_v38 }
0x11d4   : > { %v2623_v37 = vadd.f32 %v2622_v1, %v2538_v60  ;;  %v2760_v26 = vmul.f32 %v2758_v45, %v2755_v6 }
0x11d5   : > { %v2832_v11 = vmul.f32 %v2830_v17, %v2827_v13 }
0x11d6   : > { %v2697_v50 = vadd.f32 %v2696_v49, %v2623_v37 }
0x11d8   : > { %v2761_v27 = vadd.f32 %v2760_v26, %v2697_v50 }
0x11da   : > { %v2833_v55 = vadd.f32 %v2832_v11, %v2761_v27 }
0x1215   : > { %v3007_v21 = vpop.xlane.xlu1 %3006 }
0x1216   : > { %3782 = vrcp.f32 %v3007_v21 }
0x1219   : > { %v3012_v47 = vpop.permute.xlu1 %3011 }
0x1223   : > { %v3783_v39 = vpop.eup %3782 }
0x1224   : > { %v3009_v0 = vmul.f32 %v3783_v39, %v3771_v35 }
0x1226   : > { %v3014_v31 = vmul.f32 %v3012_v47, %v3009_v0 }
0x1228   : > { %v3015_v5 = vadd.f32 %v3014_v31, %v2833_v55 }
0x122a   : > { %3249 = vst.msk [vmem:[%s4962_s30 + $0x18] sm:$0xff] %vm488_vm7, %v3015_v5 }
0x122b   : > { %3809 = shalt.err (!%p3806_p10)
}
0x122c   : > { %s3810_s17 = scalar_lea.hbm %s5045_s11, 512  ;;  %s3814_s26 = scalar_lea.hbm %s5102_s4, 1024 }
0x122d   : > { %p3811_p11 = scmp.ne.s32.totalorder %s5045_s11, %s3810_s17  ;;  %p3815_p1 = scmp.lt.s32.totalorder %s5045_s11, %s5102_s4 }
0x122e   : > { %p3816_p2 = scmp.lt.s32.totalorder %s3814_s26, %s3810_s17 }
0x122f   : > { %p3812_p12 = pnand %p3811_p11, %p3968_p9 }
0x1230   : > { %p3817_p3 = por %p3816_p2, %p3815_p1 }
0x1231   : > { %p3813_p0 = pneg %p3812_p12 }
0x1233   : > { %p3818_p4 = pnand %p3817_p3, %p3813_p0 }
0x1235   : > { %3821 = shalt.err (!%p3818_p4)
}
0x1236   : > { %s3898_s28 = smov 128   ;;  %s3899_s30 = smov 8  }
0x1237   : > { %3498 = dma.vmem_to_hbm [thread:$0]  (%p3968_p9), %s5047_s16, 512, %s5045_s11, %s5053_s12, %s3898_s28, %s3898_s28, %s3899_s30  }
0x1238 PF: > { %p3504_p5 = scmp.ge.s32.totalorder %s3874_s24, 2  ;;  %s3050_s7 = sand.u32 1, %s3854_s20  }
0x1239   : > { %s3051_s9 = scalar_lea.sflag [#allocation5], %s3050_s7 }
0x123a   : > { %p3501_p6 = pnand %p3504_p5, %p3975_p13 }
0x123c   : > { %p3502_p7 = pneg %p3501_p6 }
0x123e   : > { %3849 = dma.done.wait (%p3502_p7), %s3051_s9, 512  }
0x123f   : > { %3851 = vsyncadd (%p3502_p7), %s3051_s9, 4294966784  ;;  %s23_s24 = sadd.s32 1, %s3874_s24   ;;  %s5170_s20 = smov %s3858_s21 }
0x1240   : > { %p20_p8 = scmp.ge.s32.totalorder %s23_s24, 4   ;;  %s5171_s21 = smov %s3862_s0 }
0x1241   : > { %s5172_s0 = smov %s3981_s6  ;;  %s5173_s22 = smov %s3870_s23 }
0x1242   : > { %s5174_s23 = smov %s5176_s27  ;;  %22 = sbr.rel (!%p20_p8) target bundleno = 19 (0x13), region = 85 }
0x1247   :  { %3056 = vsyncpa [#allocation5], 1 }
0x1248   :  { %3058 = vsyncpa [#allocation5 + $0x1], 1 }

</bundles_post_ra>
